<compile_context>
chip_gen: v7x
topology: tpu7x:2x2x1
jax: 0.10.0
libtpu: 0.0.40
codegen_flags: <defaults>
</compile_context>

<pallas_src>
import functools
import math

import jax
import jax.numpy as jnp
from jax.experimental import pallas as pl
from jax.experimental.pallas import tpu as pltpu


# Bias / LayerNorm slab row indices inside the packed (L, 15, E) tensor.
#  0 self_q_b (pre-scaled)   1 self_k_b   2 self_v_b   3 self_out_b
#  4 cross_q_b (pre-scaled)  5 cross_k_b  6 cross_v_b  7 cross_out_b
#  8 lin2_b   9 norm1_w  10 norm1_b  11 norm2_w  12 norm2_b  13 norm3_w  14 norm3_b
#
# Square-weight slab (L, 8, E, E) indices:
#  0 self_q_w (pre-scaled)  1 self_k_w  2 self_v_w  3 self_out_w
#  4 cross_q_w (pre-scaled) 5 cross_k_w 6 cross_v_w 7 cross_out_w


# ------------------------------ fused kernel ------------------------------

def _gpt_fused_kernel(
    x_ref, w_sq_ref, b_ln_ref, w_f1_ref, b_f1_ref, w_f2_ref, fc_w_ref, fc_b_ref,
    o_ref, *, num_layers, num_heads, batch, seq, eps,
):
    """Full decoder stack + vocab projection for the whole batch in one call."""
    B, S, H = batch, seq, num_heads
    E = x_ref.shape[-1]
    Dh = E // H

    x = x_ref[...].astype(jnp.float32)          # (B*S, E), batch-major rows
    mem = x                                      # decoder memory == embedded input

    # Causal mask (finite large-negative; matches -inf softmax semantics).
    row = jax.lax.broadcasted_iota(jnp.int32, (S, S), 0)
    col = jax.lax.broadcasted_iota(jnp.int32, (S, S), 1)
    allowed = col <= row
    neg_big = jnp.float32(-1e30)

    def layer_norm(y, g, b):
        mu = jnp.mean(y, axis=-1, keepdims=True)
        var = jnp.mean((y - mu) ** 2, axis=-1, keepdims=True)
        return (y - mu) * jax.lax.rsqrt(var + eps) * g + b

    def mm(a, w):
        # Wide projection matmul: bf16 inputs (native MXU), f32 accumulate.
        return jnp.dot(a.astype(jnp.bfloat16), w.astype(jnp.bfloat16),
                       preferred_element_type=jnp.float32)

    def attention(xq, xkv, wq, bq, wk, bk, wv, bv, wo, bo, causal):
        # One wide matmul per projection on the full (B*S, E) slab.
        q = mm(xq, wq) + bq        # 1/sqrt(Dh) already folded into wq / bq
        k = mm(xkv, wk) + bk
        v = mm(xkv, wv) + bv
        rows_out = []
        for b in range(B):                      # tiny per-row score/PV matmuls
            r0 = b * S
            head_outs = []
            for h in range(H):
                c0 = h * Dh
                qh = q[r0:r0 + S, c0:c0 + Dh]   # (S, Dh), f32
                kh = k[r0:r0 + S, c0:c0 + Dh]
                vh = v[r0:r0 + S, c0:c0 + Dh]
                s = jnp.dot(qh, kh.T, preferred_element_type=jnp.float32)  # (S, S)
                if causal:
                    s = jnp.where(allowed, s, neg_big)
                m = jnp.max(s, axis=-1, keepdims=True)
                p = jnp.exp(s - m)
                denom = jnp.sum(p, axis=-1, keepdims=True)
                oh = jnp.dot(p, vh, preferred_element_type=jnp.float32)    # (S, Dh)
                head_outs.append(oh * pl.reciprocal(denom, approx=True))
            rows_out.append(jnp.concatenate(head_outs, axis=-1))           # (S, E)
        concat = jnp.concatenate(rows_out, axis=0)                          # (B*S, E)
        return mm(concat, wo) + bo              # single concat-heads out-proj

    # TODO(synk): dropout layers are treated as identity (eval/inference semantics).
    for l in range(num_layers):                  # L=2: static unroll is fine
        bln = b_ln_ref[l]                        # (15, E) biases + norm params
        bias = lambda i: bln[i:i + 1, :]         # (1, E) row slice

        # --- masked self-attention (causal), post-norm residual ---
        sa = attention(x, x,
                       w_sq_ref[l, 0], bias(0), w_sq_ref[l, 1], bias(1),
                       w_sq_ref[l, 2], bias(2), w_sq_ref[l, 3], bias(3),
                       causal=True)
        x = layer_norm(x + sa, bias(9), bias(10))

        # --- cross-attention over memory (no mask) ---
        ca = attention(x, mem,
                       w_sq_ref[l, 4], bias(4), w_sq_ref[l, 5], bias(5),
                       w_sq_ref[l, 6], bias(6), w_sq_ref[l, 7], bias(7),
                       causal=False)
        x = layer_norm(x + ca, bias(11), bias(12))

        # --- feed-forward: linear2(relu(linear1(x))) ---
        h1 = jnp.maximum(mm(x, w_f1_ref[l]) + b_f1_ref[l], 0.0)
        ff = mm(h1, w_f2_ref[l]) + bias(8)
        x = layer_norm(x + ff, bias(13), bias(14))

    # final vocab projection -> lane-dense (B*S, V) slab
    logits = mm(x, fc_w_ref[...]) + fc_b_ref[...]
    o_ref[...] = logits.astype(o_ref.dtype)


# ------------------------------- forward pass -------------------------------

_PACKED_KEYS = ("w_sq", "b_ln", "w_f1", "b_f1", "w_f2", "fc_w", "fc_b")


@functools.partial(jax.jit, static_argnames=("num_heads", "num_layers"))
def custom_gpt_forward(packed, embedding, pe, input_ids, *, num_heads, num_layers):
    # mirror torch: if 2-D and dims differ, transpose to seq-first (S, B)
    if input_ids.ndim == 2 and input_ids.shape[0] != input_ids.shape[1]:
        input_ids = input_ids.T
    S, B = input_ids.shape
    E = embedding.shape[1]
    V = packed["fc_w"].shape[-1]

    # Embedding lookup + positional encoding stay as XLA glue (gather).
    x = jnp.take(embedding, input_ids, axis=0) + pe[:S]       # (S, B, E)
    xb = jnp.transpose(x, (1, 0, 2)).reshape(B * S, E)        # batch-major slab

    kernel = functools.partial(
        _gpt_fused_kernel,
        num_layers=num_layers, num_heads=num_heads, batch=B, seq=S, eps=1e-5)

    vmem = pl.BlockSpec(memory_space=pltpu.MemorySpace.VMEM)  # whole array resident
    out = pl.pallas_call(
        kernel,
        out_shape=jax.ShapeDtypeStruct((B * S, V), jnp.float32),
        in_specs=[vmem] * (1 + len(_PACKED_KEYS)),
        out_specs=vmem,
    )(xb, *[packed[k] for k in _PACKED_KEYS])

    return jnp.transpose(out.reshape(B, S, V), (1, 0, 2))     # (S, B, vocab)


# ----------------------------- parameter setup -----------------------------

def sinusoidal_pe(max_len, emb_size):
    position = jnp.arange(max_len, dtype=jnp.float32)[:, None]
    div_term = jnp.exp(
        jnp.arange(0, emb_size, 2, dtype=jnp.float32) * (-math.log(10000.0) / emb_size)
    )
    pe = jnp.zeros((max_len, emb_size), dtype=jnp.float32)
    pe = pe.at[:, 0::2].set(jnp.sin(position * div_term))
    pe = pe.at[:, 1::2].set(jnp.cos(position * div_term))
    return pe[:, None, :]  # (max_len, 1, E)


def init_params(key, vocab_size, emb_size, num_heads, num_layers, dim_feedforward, max_len):
    keys = jax.random.split(key, 2 + num_layers)

    def dense(k, shape, scale=0.02):
        return scale * jax.random.normal(k, shape, dtype=jnp.float32)

    kf = jax.random.split(keys[1], 2)
    params = {
        "embedding": dense(keys[0], (vocab_size, emb_size)),
        "pe": sinusoidal_pe(max_len, emb_size),
        "fc_out_w": dense(kf[0], (emb_size, vocab_size)),
        "fc_out_b": dense(kf[1], (vocab_size,)),
        "layers": [],
    }
    for l in range(num_layers):
        lk = jax.random.split(keys[2 + l], 14)
        params["layers"].append({
            # self-attention (single fused in_proj, like torch MHA)
            "self_in_w": dense(lk[0], (emb_size, 3 * emb_size)),
            "self_in_b": dense(lk[1], (3 * emb_size,)),
            "self_out_w": dense(lk[2], (emb_size, emb_size)),
            "self_out_b": dense(lk[3], (emb_size,)),
            # cross-attention (q from tgt, k/v from memory)
            "cross_q_w": dense(lk[4], (emb_size, emb_size)),
            "cross_q_b": dense(lk[5], (emb_size,)),
            "cross_kv_w": dense(lk[6], (emb_size, 2 * emb_size)),
            "cross_kv_b": dense(lk[7], (2 * emb_size,)),
            "cross_out_w": dense(lk[8], (emb_size, emb_size)),
            "cross_out_b": dense(lk[9], (emb_size,)),
            # feed-forward
            "lin1_w": dense(lk[10], (emb_size, dim_feedforward)),
            "lin1_b": dense(lk[11], (dim_feedforward,)),
            "lin2_w": dense(lk[12], (dim_feedforward, emb_size)),
            "lin2_b": dense(lk[13], (emb_size,)),
            # layer norms (torch default init: weight=1, bias=0)
            "norm1_w": jnp.ones((emb_size,), jnp.float32),
            "norm1_b": jnp.zeros((emb_size,), jnp.float32),
            "norm2_w": jnp.ones((emb_size,), jnp.float32),
            "norm2_b": jnp.zeros((emb_size,), jnp.float32),
            "norm3_w": jnp.ones((emb_size,), jnp.float32),
            "norm3_b": jnp.zeros((emb_size,), jnp.float32),
        })
    return params


def pack_params(params, num_heads):
    """Repack torch-shaped params into a handful of fused slabs.

    * All square (E, E) projection weights -> (L, 8, E, E), one DMA.
    * All E-length biases + LayerNorm gamma/beta -> (L, 15, E), one DMA.
    * FFN weights/bias kept full-width: (L, E, F), (L, 1, F), (L, F, E).
    * 1/sqrt(Dh) attention scale folded into Q weights/biases here (host-side).
    Column groups of Dh within the Q/K/V projections correspond to heads.
    """
    E = params["embedding"].shape[1]
    Dh = E // num_heads
    scale = 1.0 / math.sqrt(Dh)

    w_sq, b_ln, w_f1, b_f1, w_f2 = [], [], [], [], []
    for layer in params["layers"]:
        qw, kw, vw = jnp.split(layer["self_in_w"], 3, axis=-1)
        qb, kb, vb = jnp.split(layer["self_in_b"], 3)
        ckw, cvw = jnp.split(layer["cross_kv_w"], 2, axis=-1)
        ckb, cvb = jnp.split(layer["cross_kv_b"], 2)

        w_sq.append(jnp.stack([
            qw * scale, kw, vw, layer["self_out_w"],
            layer["cross_q_w"] * scale, ckw, cvw, layer["cross_out_w"],
        ]))
        b_ln.append(jnp.stack([
            qb * scale, kb, vb, layer["self_out_b"],
            layer["cross_q_b"] * scale, ckb, cvb, layer["cross_out_b"],
            layer["lin2_b"],
            layer["norm1_w"], layer["norm1_b"],
            layer["norm2_w"], layer["norm2_b"],
            layer["norm3_w"], layer["norm3_b"],
        ]))
        w_f1.append(layer["lin1_w"])
        b_f1.append(layer["lin1_b"].reshape(1, -1))
        w_f2.append(layer["lin2_w"])

    return {
        "w_sq": jnp.stack(w_sq),                     # (L, 8, E, E)
        "b_ln": jnp.stack(b_ln),                     # (L, 15, E)
        "w_f1": jnp.stack(w_f1),                     # (L, E, F)
        "b_f1": jnp.stack(b_f1),                     # (L, 1, F)
        "w_f2": jnp.stack(w_f2),                     # (L, F, E)
        "fc_w": params["fc_out_w"],                  # (E, V)
        "fc_b": params["fc_out_b"].reshape(1, -1),   # (1, V)
    }


# ----------------------------------- main -----------------------------------

if __name__ == "__main__":
    VOCAB, EMB, HEADS, LAYERS, FFN, MAX_LEN = 128, 32, 4, 2, 64, 16
    B, S = 2, 8

    key = jax.random.PRNGKey(0)
    pkey, ikey = jax.random.split(key)
    params = init_params(pkey, VOCAB, EMB, HEADS, LAYERS, FFN, MAX_LEN)
    packed = pack_params(params, HEADS)
    input_ids = jax.random.randint(ikey, (B, S), 0, VOCAB, dtype=jnp.int32)

    logits = custom_gpt_forward(packed, params["embedding"], params["pe"], input_ids,
                                num_heads=HEADS, num_layers=LAYERS)
    logits = jax.block_until_ready(logits)

    assert logits.shape == (S, B, VOCAB), logits.shape
    assert bool(jnp.all(jnp.isfinite(logits)))
    print("KERNEL_OK")
</pallas_src>

<mosaic_0001>
module attributes {stable_mosaic.version = 11 : i64} {
  func.func @_gpt_fused_kernel(%arg0: memref<16x32xf32, #tpu.memory_space<vmem>>, %arg1: memref<2x8x32x32xf32, #tpu.memory_space<vmem>>, %arg2: memref<2x15x32xf32, #tpu.memory_space<vmem>>, %arg3: memref<2x32x64xf32, #tpu.memory_space<vmem>>, %arg4: memref<2x1x64xf32, #tpu.memory_space<vmem>>, %arg5: memref<2x64x32xf32, #tpu.memory_space<vmem>>, %arg6: memref<32x128xf32, #tpu.memory_space<vmem>>, %arg7: memref<1x128xf32, #tpu.memory_space<vmem>>, %arg8: memref<16x128xf32, #tpu.memory_space<vmem>>) attributes {dimension_semantics = [], scalar_prefetch = 0 : i64, scratch_operands = 0 : i64, tpu.core_type = #tpu.core_type<tc>} {
    %c0 = arith.constant 0 : index
    %c0_0 = arith.constant 0 : index
    %0 = vector.load %arg0[%c0, %c0_0] : memref<16x32xf32, #tpu.memory_space<vmem>>, vector<16x32xf32>
    %1 = tpu.iota {dimensions = array<i32: 0>} : vector<8x8xi32>
    %2 = tpu.iota {dimensions = array<i32: 1>} : vector<8x8xi32>
    %3 = arith.cmpi sle, %2, %1 : vector<8x8xi32>
    %c0_1 = arith.constant 0 : index
    %c0_2 = arith.constant 0 : index
    %c0_3 = arith.constant 0 : index
    %4 = vector.load %arg2[%c0_1, %c0_2, %c0_3] : memref<2x15x32xf32, #tpu.memory_space<vmem>>, vector<1x15x32xf32>
    %5 = vector.shape_cast %4 : vector<1x15x32xf32> to vector<15x32xf32>
    %c0_4 = arith.constant 0 : index
    %c0_5 = arith.constant 0 : index
    %c0_6 = arith.constant 0 : index
    %c0_7 = arith.constant 0 : index
    %6 = vector.load %arg1[%c0_4, %c0_5, %c0_6, %c0_7] : memref<2x8x32x32xf32, #tpu.memory_space<vmem>>, vector<1x1x32x32xf32>
    %7 = vector.shape_cast %6 : vector<1x1x32x32xf32> to vector<32x32xf32>
    %8 = vector.extract_strided_slice %5 {offsets = [0, 0], sizes = [1, 32], strides = [1, 1]} : vector<15x32xf32> to vector<1x32xf32>
    %c0_8 = arith.constant 0 : index
    %c1 = arith.constant 1 : index
    %c0_9 = arith.constant 0 : index
    %c0_10 = arith.constant 0 : index
    %9 = vector.load %arg1[%c0_8, %c1, %c0_9, %c0_10] : memref<2x8x32x32xf32, #tpu.memory_space<vmem>>, vector<1x1x32x32xf32>
    %10 = vector.shape_cast %9 : vector<1x1x32x32xf32> to vector<32x32xf32>
    %11 = vector.extract_strided_slice %5 {offsets = [1, 0], sizes = [1, 32], strides = [1, 1]} : vector<15x32xf32> to vector<1x32xf32>
    %c0_11 = arith.constant 0 : index
    %c2 = arith.constant 2 : index
    %c0_12 = arith.constant 0 : index
    %c0_13 = arith.constant 0 : index
    %12 = vector.load %arg1[%c0_11, %c2, %c0_12, %c0_13] : memref<2x8x32x32xf32, #tpu.memory_space<vmem>>, vector<1x1x32x32xf32>
    %13 = vector.shape_cast %12 : vector<1x1x32x32xf32> to vector<32x32xf32>
    %14 = vector.extract_strided_slice %5 {offsets = [2, 0], sizes = [1, 32], strides = [1, 1]} : vector<15x32xf32> to vector<1x32xf32>
    %c0_14 = arith.constant 0 : index
    %c3 = arith.constant 3 : index
    %c0_15 = arith.constant 0 : index
    %c0_16 = arith.constant 0 : index
    %15 = vector.load %arg1[%c0_14, %c3, %c0_15, %c0_16] : memref<2x8x32x32xf32, #tpu.memory_space<vmem>>, vector<1x1x32x32xf32>
    %16 = vector.shape_cast %15 : vector<1x1x32x32xf32> to vector<32x32xf32>
    %17 = vector.extract_strided_slice %5 {offsets = [3, 0], sizes = [1, 32], strides = [1, 1]} : vector<15x32xf32> to vector<1x32xf32>
    %18 = arith.truncf %0 : vector<16x32xf32> to vector<16x32xbf16>
    %19 = arith.truncf %7 : vector<32x32xf32> to vector<32x32xbf16>
    %cst = arith.constant dense<0.000000e+00> : vector<16x32xf32>
    %20 = tpu.matmul %18, %19, %cst {dimension_numbers = #tpu.dot_dimension_numbers<[1], [0], [0], [1], [0, 0, 1, 1], [], []>} : vector<16x32xbf16>, vector<32x32xbf16>, vector<16x32xf32> -> vector<16x32xf32>
    %21 = vector.broadcast %8 : vector<1x32xf32> to vector<16x32xf32>
    %22 = arith.addf %20, %21 : vector<16x32xf32>
    %23 = arith.truncf %0 : vector<16x32xf32> to vector<16x32xbf16>
    %24 = arith.truncf %10 : vector<32x32xf32> to vector<32x32xbf16>
    %cst_17 = arith.constant dense<0.000000e+00> : vector<16x32xf32>
    %25 = tpu.matmul %23, %24, %cst_17 {dimension_numbers = #tpu.dot_dimension_numbers<[1], [0], [0], [1], [0, 0, 1, 1], [], []>} : vector<16x32xbf16>, vector<32x32xbf16>, vector<16x32xf32> -> vector<16x32xf32>
    %26 = vector.broadcast %11 : vector<1x32xf32> to vector<16x32xf32>
    %27 = arith.addf %25, %26 : vector<16x32xf32>
    %28 = arith.truncf %0 : vector<16x32xf32> to vector<16x32xbf16>
    %29 = arith.truncf %13 : vector<32x32xf32> to vector<32x32xbf16>
    %cst_18 = arith.constant dense<0.000000e+00> : vector<16x32xf32>
    %30 = tpu.matmul %28, %29, %cst_18 {dimension_numbers = #tpu.dot_dimension_numbers<[1], [0], [0], [1], [0, 0, 1, 1], [], []>} : vector<16x32xbf16>, vector<32x32xbf16>, vector<16x32xf32> -> vector<16x32xf32>
    %31 = vector.broadcast %14 : vector<1x32xf32> to vector<16x32xf32>
    %32 = arith.addf %30, %31 : vector<16x32xf32>
    %33 = vector.extract_strided_slice %22 {offsets = [0, 0], sizes = [8, 8], strides = [1, 1]} : vector<16x32xf32> to vector<8x8xf32>
    %34 = vector.extract_strided_slice %27 {offsets = [0, 0], sizes = [8, 8], strides = [1, 1]} : vector<16x32xf32> to vector<8x8xf32>
    %35 = vector.extract_strided_slice %32 {offsets = [0, 0], sizes = [8, 8], strides = [1, 1]} : vector<16x32xf32> to vector<8x8xf32>
    %36 = tpu.transpose %34, [1, 0] : vector<8x8xf32> -> vector<8x8xf32>
    %cst_19 = arith.constant dense<0.000000e+00> : vector<8x8xf32>
    %37 = tpu.matmul %33, %36, %cst_19 {dimension_numbers = #tpu.dot_dimension_numbers<[1], [0], [0], [1], [0, 0, 1, 1], [], []>} : vector<8x8xf32>, vector<8x8xf32>, vector<8x8xf32> -> vector<8x8xf32>
    %cst_20 = arith.constant -1.000000e+30 : f32
    %38 = vector.broadcast %cst_20 : f32 to vector<8x8xf32>
    %39 = arith.select %3, %37, %38 : vector<8x8xi1>, vector<8x8xf32>
    %cst_21 = arith.constant dense<0xFF800000> : vector<8xf32>
    %40 = vector.multi_reduction <maximumf>, %39, %cst_21 [1] : vector<8x8xf32> to vector<8xf32>
    %41 = vector.shape_cast %40 : vector<8xf32> to vector<8x1xf32>
    %42 = vector.broadcast %41 : vector<8x1xf32> to vector<8x8xf32>
    %43 = arith.subf %39, %42 : vector<8x8xf32>
    %44 = math.exp %43 : vector<8x8xf32>
    %cst_22 = arith.constant dense<0.000000e+00> : vector<8xf32>
    %45 = vector.multi_reduction <add>, %44, %cst_22 [1] : vector<8x8xf32> to vector<8xf32>
    %46 = vector.shape_cast %45 : vector<8xf32> to vector<8x1xf32>
    %cst_23 = arith.constant dense<0.000000e+00> : vector<8x8xf32>
    %47 = tpu.matmul %44, %35, %cst_23 {dimension_numbers = #tpu.dot_dimension_numbers<[1], [0], [0], [1], [0, 0, 1, 1], [], []>} : vector<8x8xf32>, vector<8x8xf32>, vector<8x8xf32> -> vector<8x8xf32>
    %48 = tpu.reciprocal %46 {approx = true} : vector<8x1xf32> -> vector<8x1xf32>
    %49 = vector.broadcast %48 : vector<8x1xf32> to vector<8x8xf32>
    %50 = arith.mulf %47, %49 : vector<8x8xf32>
    %51 = vector.extract_strided_slice %22 {offsets = [0, 8], sizes = [8, 8], strides = [1, 1]} : vector<16x32xf32> to vector<8x8xf32>
    %52 = vector.extract_strided_slice %27 {offsets = [0, 8], sizes = [8, 8], strides = [1, 1]} : vector<16x32xf32> to vector<8x8xf32>
    %53 = vector.extract_strided_slice %32 {offsets = [0, 8], sizes = [8, 8], strides = [1, 1]} : vector<16x32xf32> to vector<8x8xf32>
    %54 = tpu.transpose %52, [1, 0] : vector<8x8xf32> -> vector<8x8xf32>
    %cst_24 = arith.constant dense<0.000000e+00> : vector<8x8xf32>
    %55 = tpu.matmul %51, %54, %cst_24 {dimension_numbers = #tpu.dot_dimension_numbers<[1], [0], [0], [1], [0, 0, 1, 1], [], []>} : vector<8x8xf32>, vector<8x8xf32>, vector<8x8xf32> -> vector<8x8xf32>
    %cst_25 = arith.constant -1.000000e+30 : f32
    %56 = vector.broadcast %cst_25 : f32 to vector<8x8xf32>
    %57 = arith.select %3, %55, %56 : vector<8x8xi1>, vector<8x8xf32>
    %cst_26 = arith.constant dense<0xFF800000> : vector<8xf32>
    %58 = vector.multi_reduction <maximumf>, %57, %cst_26 [1] : vector<8x8xf32> to vector<8xf32>
    %59 = vector.shape_cast %58 : vector<8xf32> to vector<8x1xf32>
    %60 = vector.broadcast %59 : vector<8x1xf32> to vector<8x8xf32>
    %61 = arith.subf %57, %60 : vector<8x8xf32>
    %62 = math.exp %61 : vector<8x8xf32>
    %cst_27 = arith.constant dense<0.000000e+00> : vector<8xf32>
    %63 = vector.multi_reduction <add>, %62, %cst_27 [1] : vector<8x8xf32> to vector<8xf32>
    %64 = vector.shape_cast %63 : vector<8xf32> to vector<8x1xf32>
    %cst_28 = arith.constant dense<0.000000e+00> : vector<8x8xf32>
    %65 = tpu.matmul %62, %53, %cst_28 {dimension_numbers = #tpu.dot_dimension_numbers<[1], [0], [0], [1], [0, 0, 1, 1], [], []>} : vector<8x8xf32>, vector<8x8xf32>, vector<8x8xf32> -> vector<8x8xf32>
    %66 = tpu.reciprocal %64 {approx = true} : vector<8x1xf32> -> vector<8x1xf32>
    %67 = vector.broadcast %66 : vector<8x1xf32> to vector<8x8xf32>
    %68 = arith.mulf %65, %67 : vector<8x8xf32>
    %69 = vector.extract_strided_slice %22 {offsets = [0, 16], sizes = [8, 8], strides = [1, 1]} : vector<16x32xf32> to vector<8x8xf32>
    %70 = vector.extract_strided_slice %27 {offsets = [0, 16], sizes = [8, 8], strides = [1, 1]} : vector<16x32xf32> to vector<8x8xf32>
    %71 = vector.extract_strided_slice %32 {offsets = [0, 16], sizes = [8, 8], strides = [1, 1]} : vector<16x32xf32> to vector<8x8xf32>
    %72 = tpu.transpose %70, [1, 0] : vector<8x8xf32> -> vector<8x8xf32>
    %cst_29 = arith.constant dense<0.000000e+00> : vector<8x8xf32>
    %73 = tpu.matmul %69, %72, %cst_29 {dimension_numbers = #tpu.dot_dimension_numbers<[1], [0], [0], [1], [0, 0, 1, 1], [], []>} : vector<8x8xf32>, vector<8x8xf32>, vector<8x8xf32> -> vector<8x8xf32>
    %cst_30 = arith.constant -1.000000e+30 : f32
    %74 = vector.broadcast %cst_30 : f32 to vector<8x8xf32>
    %75 = arith.select %3, %73, %74 : vector<8x8xi1>, vector<8x8xf32>
    %cst_31 = arith.constant dense<0xFF800000> : vector<8xf32>
    %76 = vector.multi_reduction <maximumf>, %75, %cst_31 [1] : vector<8x8xf32> to vector<8xf32>
    %77 = vector.shape_cast %76 : vector<8xf32> to vector<8x1xf32>
    %78 = vector.broadcast %77 : vector<8x1xf32> to vector<8x8xf32>
    %79 = arith.subf %75, %78 : vector<8x8xf32>
    %80 = math.exp %79 : vector<8x8xf32>
    %cst_32 = arith.constant dense<0.000000e+00> : vector<8xf32>
    %81 = vector.multi_reduction <add>, %80, %cst_32 [1] : vector<8x8xf32> to vector<8xf32>
    %82 = vector.shape_cast %81 : vector<8xf32> to vector<8x1xf32>
    %cst_33 = arith.constant dense<0.000000e+00> : vector<8x8xf32>
    %83 = tpu.matmul %80, %71, %cst_33 {dimension_numbers = #tpu.dot_dimension_numbers<[1], [0], [0], [1], [0, 0, 1, 1], [], []>} : vector<8x8xf32>, vector<8x8xf32>, vector<8x8xf32> -> vector<8x8xf32>
    %84 = tpu.reciprocal %82 {approx = true} : vector<8x1xf32> -> vector<8x1xf32>
    %85 = vector.broadcast %84 : vector<8x1xf32> to vector<8x8xf32>
    %86 = arith.mulf %83, %85 : vector<8x8xf32>
    %87 = vector.extract_strided_slice %22 {offsets = [0, 24], sizes = [8, 8], strides = [1, 1]} : vector<16x32xf32> to vector<8x8xf32>
    %88 = vector.extract_strided_slice %27 {offsets = [0, 24], sizes = [8, 8], strides = [1, 1]} : vector<16x32xf32> to vector<8x8xf32>
    %89 = vector.extract_strided_slice %32 {offsets = [0, 24], sizes = [8, 8], strides = [1, 1]} : vector<16x32xf32> to vector<8x8xf32>
    %90 = tpu.transpose %88, [1, 0] : vector<8x8xf32> -> vector<8x8xf32>
    %cst_34 = arith.constant dense<0.000000e+00> : vector<8x8xf32>
    %91 = tpu.matmul %87, %90, %cst_34 {dimension_numbers = #tpu.dot_dimension_numbers<[1], [0], [0], [1], [0, 0, 1, 1], [], []>} : vector<8x8xf32>, vector<8x8xf32>, vector<8x8xf32> -> vector<8x8xf32>
    %cst_35 = arith.constant -1.000000e+30 : f32
    %92 = vector.broadcast %cst_35 : f32 to vector<8x8xf32>
    %93 = arith.select %3, %91, %92 : vector<8x8xi1>, vector<8x8xf32>
    %cst_36 = arith.constant dense<0xFF800000> : vector<8xf32>
    %94 = vector.multi_reduction <maximumf>, %93, %cst_36 [1] : vector<8x8xf32> to vector<8xf32>
    %95 = vector.shape_cast %94 : vector<8xf32> to vector<8x1xf32>
    %96 = vector.broadcast %95 : vector<8x1xf32> to vector<8x8xf32>
    %97 = arith.subf %93, %96 : vector<8x8xf32>
    %98 = math.exp %97 : vector<8x8xf32>
    %cst_37 = arith.constant dense<0.000000e+00> : vector<8xf32>
    %99 = vector.multi_reduction <add>, %98, %cst_37 [1] : vector<8x8xf32> to vector<8xf32>
    %100 = vector.shape_cast %99 : vector<8xf32> to vector<8x1xf32>
    %cst_38 = arith.constant dense<0.000000e+00> : vector<8x8xf32>
    %101 = tpu.matmul %98, %89, %cst_38 {dimension_numbers = #tpu.dot_dimension_numbers<[1], [0], [0], [1], [0, 0, 1, 1], [], []>} : vector<8x8xf32>, vector<8x8xf32>, vector<8x8xf32> -> vector<8x8xf32>
    %102 = tpu.reciprocal %100 {approx = true} : vector<8x1xf32> -> vector<8x1xf32>
    %103 = vector.broadcast %102 : vector<8x1xf32> to vector<8x8xf32>
    %104 = arith.mulf %101, %103 : vector<8x8xf32>
    %105 = tpu.concatenate %50, %68, %86, %104 in 1 : vector<8x8xf32>, vector<8x8xf32>, vector<8x8xf32>, vector<8x8xf32> -> vector<8x32xf32>
    %106 = vector.extract_strided_slice %22 {offsets = [8, 0], sizes = [8, 8], strides = [1, 1]} : vector<16x32xf32> to vector<8x8xf32>
    %107 = vector.extract_strided_slice %27 {offsets = [8, 0], sizes = [8, 8], strides = [1, 1]} : vector<16x32xf32> to vector<8x8xf32>
    %108 = vector.extract_strided_slice %32 {offsets = [8, 0], sizes = [8, 8], strides = [1, 1]} : vector<16x32xf32> to vector<8x8xf32>
    %109 = tpu.transpose %107, [1, 0] : vector<8x8xf32> -> vector<8x8xf32>
    %cst_39 = arith.constant dense<0.000000e+00> : vector<8x8xf32>
    %110 = tpu.matmul %106, %109, %cst_39 {dimension_numbers = #tpu.dot_dimension_numbers<[1], [0], [0], [1], [0, 0, 1, 1], [], []>} : vector<8x8xf32>, vector<8x8xf32>, vector<8x8xf32> -> vector<8x8xf32>
    %cst_40 = arith.constant -1.000000e+30 : f32
    %111 = vector.broadcast %cst_40 : f32 to vector<8x8xf32>
    %112 = arith.select %3, %110, %111 : vector<8x8xi1>, vector<8x8xf32>
    %cst_41 = arith.constant dense<0xFF800000> : vector<8xf32>
    %113 = vector.multi_reduction <maximumf>, %112, %cst_41 [1] : vector<8x8xf32> to vector<8xf32>
    %114 = vector.shape_cast %113 : vector<8xf32> to vector<8x1xf32>
    %115 = vector.broadcast %114 : vector<8x1xf32> to vector<8x8xf32>
    %116 = arith.subf %112, %115 : vector<8x8xf32>
    %117 = math.exp %116 : vector<8x8xf32>
    %cst_42 = arith.constant dense<0.000000e+00> : vector<8xf32>
    %118 = vector.multi_reduction <add>, %117, %cst_42 [1] : vector<8x8xf32> to vector<8xf32>
    %119 = vector.shape_cast %118 : vector<8xf32> to vector<8x1xf32>
    %cst_43 = arith.constant dense<0.000000e+00> : vector<8x8xf32>
    %120 = tpu.matmul %117, %108, %cst_43 {dimension_numbers = #tpu.dot_dimension_numbers<[1], [0], [0], [1], [0, 0, 1, 1], [], []>} : vector<8x8xf32>, vector<8x8xf32>, vector<8x8xf32> -> vector<8x8xf32>
    %121 = tpu.reciprocal %119 {approx = true} : vector<8x1xf32> -> vector<8x1xf32>
    %122 = vector.broadcast %121 : vector<8x1xf32> to vector<8x8xf32>
    %123 = arith.mulf %120, %122 : vector<8x8xf32>
    %124 = vector.extract_strided_slice %22 {offsets = [8, 8], sizes = [8, 8], strides = [1, 1]} : vector<16x32xf32> to vector<8x8xf32>
    %125 = vector.extract_strided_slice %27 {offsets = [8, 8], sizes = [8, 8], strides = [1, 1]} : vector<16x32xf32> to vector<8x8xf32>
    %126 = vector.extract_strided_slice %32 {offsets = [8, 8], sizes = [8, 8], strides = [1, 1]} : vector<16x32xf32> to vector<8x8xf32>
    %127 = tpu.transpose %125, [1, 0] : vector<8x8xf32> -> vector<8x8xf32>
    %cst_44 = arith.constant dense<0.000000e+00> : vector<8x8xf32>
    %128 = tpu.matmul %124, %127, %cst_44 {dimension_numbers = #tpu.dot_dimension_numbers<[1], [0], [0], [1], [0, 0, 1, 1], [], []>} : vector<8x8xf32>, vector<8x8xf32>, vector<8x8xf32> -> vector<8x8xf32>
    %cst_45 = arith.constant -1.000000e+30 : f32
    %129 = vector.broadcast %cst_45 : f32 to vector<8x8xf32>
    %130 = arith.select %3, %128, %129 : vector<8x8xi1>, vector<8x8xf32>
    %cst_46 = arith.constant dense<0xFF800000> : vector<8xf32>
    %131 = vector.multi_reduction <maximumf>, %130, %cst_46 [1] : vector<8x8xf32> to vector<8xf32>
    %132 = vector.shape_cast %131 : vector<8xf32> to vector<8x1xf32>
    %133 = vector.broadcast %132 : vector<8x1xf32> to vector<8x8xf32>
    %134 = arith.subf %130, %133 : vector<8x8xf32>
    %135 = math.exp %134 : vector<8x8xf32>
    %cst_47 = arith.constant dense<0.000000e+00> : vector<8xf32>
    %136 = vector.multi_reduction <add>, %135, %cst_47 [1] : vector<8x8xf32> to vector<8xf32>
    %137 = vector.shape_cast %136 : vector<8xf32> to vector<8x1xf32>
    %cst_48 = arith.constant dense<0.000000e+00> : vector<8x8xf32>
    %138 = tpu.matmul %135, %126, %cst_48 {dimension_numbers = #tpu.dot_dimension_numbers<[1], [0], [0], [1], [0, 0, 1, 1], [], []>} : vector<8x8xf32>, vector<8x8xf32>, vector<8x8xf32> -> vector<8x8xf32>
    %139 = tpu.reciprocal %137 {approx = true} : vector<8x1xf32> -> vector<8x1xf32>
    %140 = vector.broadcast %139 : vector<8x1xf32> to vector<8x8xf32>
    %141 = arith.mulf %138, %140 : vector<8x8xf32>
    %142 = vector.extract_strided_slice %22 {offsets = [8, 16], sizes = [8, 8], strides = [1, 1]} : vector<16x32xf32> to vector<8x8xf32>
    %143 = vector.extract_strided_slice %27 {offsets = [8, 16], sizes = [8, 8], strides = [1, 1]} : vector<16x32xf32> to vector<8x8xf32>
    %144 = vector.extract_strided_slice %32 {offsets = [8, 16], sizes = [8, 8], strides = [1, 1]} : vector<16x32xf32> to vector<8x8xf32>
    %145 = tpu.transpose %143, [1, 0] : vector<8x8xf32> -> vector<8x8xf32>
    %cst_49 = arith.constant dense<0.000000e+00> : vector<8x8xf32>
    %146 = tpu.matmul %142, %145, %cst_49 {dimension_numbers = #tpu.dot_dimension_numbers<[1], [0], [0], [1], [0, 0, 1, 1], [], []>} : vector<8x8xf32>, vector<8x8xf32>, vector<8x8xf32> -> vector<8x8xf32>
    %cst_50 = arith.constant -1.000000e+30 : f32
    %147 = vector.broadcast %cst_50 : f32 to vector<8x8xf32>
    %148 = arith.select %3, %146, %147 : vector<8x8xi1>, vector<8x8xf32>
    %cst_51 = arith.constant dense<0xFF800000> : vector<8xf32>
    %149 = vector.multi_reduction <maximumf>, %148, %cst_51 [1] : vector<8x8xf32> to vector<8xf32>
    %150 = vector.shape_cast %149 : vector<8xf32> to vector<8x1xf32>
    %151 = vector.broadcast %150 : vector<8x1xf32> to vector<8x8xf32>
    %152 = arith.subf %148, %151 : vector<8x8xf32>
    %153 = math.exp %152 : vector<8x8xf32>
    %cst_52 = arith.constant dense<0.000000e+00> : vector<8xf32>
    %154 = vector.multi_reduction <add>, %153, %cst_52 [1] : vector<8x8xf32> to vector<8xf32>
    %155 = vector.shape_cast %154 : vector<8xf32> to vector<8x1xf32>
    %cst_53 = arith.constant dense<0.000000e+00> : vector<8x8xf32>
    %156 = tpu.matmul %153, %144, %cst_53 {dimension_numbers = #tpu.dot_dimension_numbers<[1], [0], [0], [1], [0, 0, 1, 1], [], []>} : vector<8x8xf32>, vector<8x8xf32>, vector<8x8xf32> -> vector<8x8xf32>
    %157 = tpu.reciprocal %155 {approx = true} : vector<8x1xf32> -> vector<8x1xf32>
    %158 = vector.broadcast %157 : vector<8x1xf32> to vector<8x8xf32>
    %159 = arith.mulf %156, %158 : vector<8x8xf32>
    %160 = vector.extract_strided_slice %22 {offsets = [8, 24], sizes = [8, 8], strides = [1, 1]} : vector<16x32xf32> to vector<8x8xf32>
    %161 = vector.extract_strided_slice %27 {offsets = [8, 24], sizes = [8, 8], strides = [1, 1]} : vector<16x32xf32> to vector<8x8xf32>
    %162 = vector.extract_strided_slice %32 {offsets = [8, 24], sizes = [8, 8], strides = [1, 1]} : vector<16x32xf32> to vector<8x8xf32>
    %163 = tpu.transpose %161, [1, 0] : vector<8x8xf32> -> vector<8x8xf32>
    %cst_54 = arith.constant dense<0.000000e+00> : vector<8x8xf32>
    %164 = tpu.matmul %160, %163, %cst_54 {dimension_numbers = #tpu.dot_dimension_numbers<[1], [0], [0], [1], [0, 0, 1, 1], [], []>} : vector<8x8xf32>, vector<8x8xf32>, vector<8x8xf32> -> vector<8x8xf32>
    %cst_55 = arith.constant -1.000000e+30 : f32
    %165 = vector.broadcast %cst_55 : f32 to vector<8x8xf32>
    %166 = arith.select %3, %164, %165 : vector<8x8xi1>, vector<8x8xf32>
    %cst_56 = arith.constant dense<0xFF800000> : vector<8xf32>
    %167 = vector.multi_reduction <maximumf>, %166, %cst_56 [1] : vector<8x8xf32> to vector<8xf32>
    %168 = vector.shape_cast %167 : vector<8xf32> to vector<8x1xf32>
    %169 = vector.broadcast %168 : vector<8x1xf32> to vector<8x8xf32>
    %170 = arith.subf %166, %169 : vector<8x8xf32>
    %171 = math.exp %170 : vector<8x8xf32>
    %cst_57 = arith.constant dense<0.000000e+00> : vector<8xf32>
    %172 = vector.multi_reduction <add>, %171, %cst_57 [1] : vector<8x8xf32> to vector<8xf32>
    %173 = vector.shape_cast %172 : vector<8xf32> to vector<8x1xf32>
    %cst_58 = arith.constant dense<0.000000e+00> : vector<8x8xf32>
    %174 = tpu.matmul %171, %162, %cst_58 {dimension_numbers = #tpu.dot_dimension_numbers<[1], [0], [0], [1], [0, 0, 1, 1], [], []>} : vector<8x8xf32>, vector<8x8xf32>, vector<8x8xf32> -> vector<8x8xf32>
    %175 = tpu.reciprocal %173 {approx = true} : vector<8x1xf32> -> vector<8x1xf32>
    %176 = vector.broadcast %175 : vector<8x1xf32> to vector<8x8xf32>
    %177 = arith.mulf %174, %176 : vector<8x8xf32>
    %178 = tpu.concatenate %123, %141, %159, %177 in 1 : vector<8x8xf32>, vector<8x8xf32>, vector<8x8xf32>, vector<8x8xf32> -> vector<8x32xf32>
    %179 = tpu.concatenate %105, %178 in 0 : vector<8x32xf32>, vector<8x32xf32> -> vector<16x32xf32>
    %180 = arith.truncf %179 : vector<16x32xf32> to vector<16x32xbf16>
    %181 = arith.truncf %16 : vector<32x32xf32> to vector<32x32xbf16>
    %cst_59 = arith.constant dense<0.000000e+00> : vector<16x32xf32>
    %182 = tpu.matmul %180, %181, %cst_59 {dimension_numbers = #tpu.dot_dimension_numbers<[1], [0], [0], [1], [0, 0, 1, 1], [], []>} : vector<16x32xbf16>, vector<32x32xbf16>, vector<16x32xf32> -> vector<16x32xf32>
    %183 = vector.broadcast %17 : vector<1x32xf32> to vector<16x32xf32>
    %184 = arith.addf %182, %183 : vector<16x32xf32>
    %185 = arith.addf %0, %184 : vector<16x32xf32>
    %186 = vector.extract_strided_slice %5 {offsets = [9, 0], sizes = [1, 32], strides = [1, 1]} : vector<15x32xf32> to vector<1x32xf32>
    %187 = vector.extract_strided_slice %5 {offsets = [10, 0], sizes = [1, 32], strides = [1, 1]} : vector<15x32xf32> to vector<1x32xf32>
    %cst_60 = arith.constant dense<0.000000e+00> : vector<16xf32>
    %188 = vector.multi_reduction <add>, %185, %cst_60 [1] : vector<16x32xf32> to vector<16xf32>
    %189 = vector.shape_cast %188 : vector<16xf32> to vector<16x1xf32>
    %cst_61 = arith.constant 3.200000e+01 : f32
    %190 = vector.broadcast %cst_61 : f32 to vector<16x1xf32>
    %191 = arith.divf %189, %190 : vector<16x1xf32>
    %192 = vector.broadcast %191 : vector<16x1xf32> to vector<16x32xf32>
    %193 = arith.subf %185, %192 : vector<16x32xf32>
    %194 = arith.mulf %193, %193 : vector<16x32xf32>
    %cst_62 = arith.constant dense<0.000000e+00> : vector<16xf32>
    %195 = vector.multi_reduction <add>, %194, %cst_62 [1] : vector<16x32xf32> to vector<16xf32>
    %196 = vector.shape_cast %195 : vector<16xf32> to vector<16x1xf32>
    %cst_63 = arith.constant 3.200000e+01 : f32
    %197 = vector.broadcast %cst_63 : f32 to vector<16x1xf32>
    %198 = arith.divf %196, %197 : vector<16x1xf32>
    %199 = vector.broadcast %191 : vector<16x1xf32> to vector<16x32xf32>
    %200 = arith.subf %185, %199 : vector<16x32xf32>
    %cst_64 = arith.constant 9.99999974E-6 : f32
    %201 = vector.broadcast %cst_64 : f32 to vector<16x1xf32>
    %202 = arith.addf %198, %201 : vector<16x1xf32>
    %203 = math.rsqrt %202 : vector<16x1xf32>
    %204 = vector.broadcast %203 : vector<16x1xf32> to vector<16x32xf32>
    %205 = arith.mulf %200, %204 : vector<16x32xf32>
    %206 = vector.broadcast %186 : vector<1x32xf32> to vector<16x32xf32>
    %207 = arith.mulf %205, %206 : vector<16x32xf32>
    %208 = vector.broadcast %187 : vector<1x32xf32> to vector<16x32xf32>
    %209 = arith.addf %207, %208 : vector<16x32xf32>
    %c0_65 = arith.constant 0 : index
    %c4 = arith.constant 4 : index
    %c0_66 = arith.constant 0 : index
    %c0_67 = arith.constant 0 : index
    %210 = vector.load %arg1[%c0_65, %c4, %c0_66, %c0_67] : memref<2x8x32x32xf32, #tpu.memory_space<vmem>>, vector<1x1x32x32xf32>
    %211 = vector.shape_cast %210 : vector<1x1x32x32xf32> to vector<32x32xf32>
    %212 = vector.extract_strided_slice %5 {offsets = [4, 0], sizes = [1, 32], strides = [1, 1]} : vector<15x32xf32> to vector<1x32xf32>
    %c0_68 = arith.constant 0 : index
    %c5 = arith.constant 5 : index
    %c0_69 = arith.constant 0 : index
    %c0_70 = arith.constant 0 : index
    %213 = vector.load %arg1[%c0_68, %c5, %c0_69, %c0_70] : memref<2x8x32x32xf32, #tpu.memory_space<vmem>>, vector<1x1x32x32xf32>
    %214 = vector.shape_cast %213 : vector<1x1x32x32xf32> to vector<32x32xf32>
    %215 = vector.extract_strided_slice %5 {offsets = [5, 0], sizes = [1, 32], strides = [1, 1]} : vector<15x32xf32> to vector<1x32xf32>
    %c0_71 = arith.constant 0 : index
    %c6 = arith.constant 6 : index
    %c0_72 = arith.constant 0 : index
    %c0_73 = arith.constant 0 : index
    %216 = vector.load %arg1[%c0_71, %c6, %c0_72, %c0_73] : memref<2x8x32x32xf32, #tpu.memory_space<vmem>>, vector<1x1x32x32xf32>
    %217 = vector.shape_cast %216 : vector<1x1x32x32xf32> to vector<32x32xf32>
    %218 = vector.extract_strided_slice %5 {offsets = [6, 0], sizes = [1, 32], strides = [1, 1]} : vector<15x32xf32> to vector<1x32xf32>
    %c0_74 = arith.constant 0 : index
    %c7 = arith.constant 7 : index
    %c0_75 = arith.constant 0 : index
    %c0_76 = arith.constant 0 : index
    %219 = vector.load %arg1[%c0_74, %c7, %c0_75, %c0_76] : memref<2x8x32x32xf32, #tpu.memory_space<vmem>>, vector<1x1x32x32xf32>
    %220 = vector.shape_cast %219 : vector<1x1x32x32xf32> to vector<32x32xf32>
    %221 = vector.extract_strided_slice %5 {offsets = [7, 0], sizes = [1, 32], strides = [1, 1]} : vector<15x32xf32> to vector<1x32xf32>
    %222 = arith.truncf %209 : vector<16x32xf32> to vector<16x32xbf16>
    %223 = arith.truncf %211 : vector<32x32xf32> to vector<32x32xbf16>
    %cst_77 = arith.constant dense<0.000000e+00> : vector<16x32xf32>
    %224 = tpu.matmul %222, %223, %cst_77 {dimension_numbers = #tpu.dot_dimension_numbers<[1], [0], [0], [1], [0, 0, 1, 1], [], []>} : vector<16x32xbf16>, vector<32x32xbf16>, vector<16x32xf32> -> vector<16x32xf32>
    %225 = vector.broadcast %212 : vector<1x32xf32> to vector<16x32xf32>
    %226 = arith.addf %224, %225 : vector<16x32xf32>
    %227 = arith.truncf %0 : vector<16x32xf32> to vector<16x32xbf16>
    %228 = arith.truncf %214 : vector<32x32xf32> to vector<32x32xbf16>
    %cst_78 = arith.constant dense<0.000000e+00> : vector<16x32xf32>
    %229 = tpu.matmul %227, %228, %cst_78 {dimension_numbers = #tpu.dot_dimension_numbers<[1], [0], [0], [1], [0, 0, 1, 1], [], []>} : vector<16x32xbf16>, vector<32x32xbf16>, vector<16x32xf32> -> vector<16x32xf32>
    %230 = vector.broadcast %215 : vector<1x32xf32> to vector<16x32xf32>
    %231 = arith.addf %229, %230 : vector<16x32xf32>
    %232 = arith.truncf %0 : vector<16x32xf32> to vector<16x32xbf16>
    %233 = arith.truncf %217 : vector<32x32xf32> to vector<32x32xbf16>
    %cst_79 = arith.constant dense<0.000000e+00> : vector<16x32xf32>
    %234 = tpu.matmul %232, %233, %cst_79 {dimension_numbers = #tpu.dot_dimension_numbers<[1], [0], [0], [1], [0, 0, 1, 1], [], []>} : vector<16x32xbf16>, vector<32x32xbf16>, vector<16x32xf32> -> vector<16x32xf32>
    %235 = vector.broadcast %218 : vector<1x32xf32> to vector<16x32xf32>
    %236 = arith.addf %234, %235 : vector<16x32xf32>
    %237 = vector.extract_strided_slice %226 {offsets = [0, 0], sizes = [8, 8], strides = [1, 1]} : vector<16x32xf32> to vector<8x8xf32>
    %238 = vector.extract_strided_slice %231 {offsets = [0, 0], sizes = [8, 8], strides = [1, 1]} : vector<16x32xf32> to vector<8x8xf32>
    %239 = vector.extract_strided_slice %236 {offsets = [0, 0], sizes = [8, 8], strides = [1, 1]} : vector<16x32xf32> to vector<8x8xf32>
    %240 = tpu.transpose %238, [1, 0] : vector<8x8xf32> -> vector<8x8xf32>
    %cst_80 = arith.constant dense<0.000000e+00> : vector<8x8xf32>
    %241 = tpu.matmul %237, %240, %cst_80 {dimension_numbers = #tpu.dot_dimension_numbers<[1], [0], [0], [1], [0, 0, 1, 1], [], []>} : vector<8x8xf32>, vector<8x8xf32>, vector<8x8xf32> -> vector<8x8xf32>
    %cst_81 = arith.constant dense<0xFF800000> : vector<8xf32>
    %242 = vector.multi_reduction <maximumf>, %241, %cst_81 [1] : vector<8x8xf32> to vector<8xf32>
    %243 = vector.shape_cast %242 : vector<8xf32> to vector<8x1xf32>
    %244 = vector.broadcast %243 : vector<8x1xf32> to vector<8x8xf32>
    %245 = arith.subf %241, %244 : vector<8x8xf32>
    %246 = math.exp %245 : vector<8x8xf32>
    %cst_82 = arith.constant dense<0.000000e+00> : vector<8xf32>
    %247 = vector.multi_reduction <add>, %246, %cst_82 [1] : vector<8x8xf32> to vector<8xf32>
    %248 = vector.shape_cast %247 : vector<8xf32> to vector<8x1xf32>
    %cst_83 = arith.constant dense<0.000000e+00> : vector<8x8xf32>
    %249 = tpu.matmul %246, %239, %cst_83 {dimension_numbers = #tpu.dot_dimension_numbers<[1], [0], [0], [1], [0, 0, 1, 1], [], []>} : vector<8x8xf32>, vector<8x8xf32>, vector<8x8xf32> -> vector<8x8xf32>
    %250 = tpu.reciprocal %248 {approx = true} : vector<8x1xf32> -> vector<8x1xf32>
    %251 = vector.broadcast %250 : vector<8x1xf32> to vector<8x8xf32>
    %252 = arith.mulf %249, %251 : vector<8x8xf32>
    %253 = vector.extract_strided_slice %226 {offsets = [0, 8], sizes = [8, 8], strides = [1, 1]} : vector<16x32xf32> to vector<8x8xf32>
    %254 = vector.extract_strided_slice %231 {offsets = [0, 8], sizes = [8, 8], strides = [1, 1]} : vector<16x32xf32> to vector<8x8xf32>
    %255 = vector.extract_strided_slice %236 {offsets = [0, 8], sizes = [8, 8], strides = [1, 1]} : vector<16x32xf32> to vector<8x8xf32>
    %256 = tpu.transpose %254, [1, 0] : vector<8x8xf32> -> vector<8x8xf32>
    %cst_84 = arith.constant dense<0.000000e+00> : vector<8x8xf32>
    %257 = tpu.matmul %253, %256, %cst_84 {dimension_numbers = #tpu.dot_dimension_numbers<[1], [0], [0], [1], [0, 0, 1, 1], [], []>} : vector<8x8xf32>, vector<8x8xf32>, vector<8x8xf32> -> vector<8x8xf32>
    %cst_85 = arith.constant dense<0xFF800000> : vector<8xf32>
    %258 = vector.multi_reduction <maximumf>, %257, %cst_85 [1] : vector<8x8xf32> to vector<8xf32>
    %259 = vector.shape_cast %258 : vector<8xf32> to vector<8x1xf32>
    %260 = vector.broadcast %259 : vector<8x1xf32> to vector<8x8xf32>
    %261 = arith.subf %257, %260 : vector<8x8xf32>
    %262 = math.exp %261 : vector<8x8xf32>
    %cst_86 = arith.constant dense<0.000000e+00> : vector<8xf32>
    %263 = vector.multi_reduction <add>, %262, %cst_86 [1] : vector<8x8xf32> to vector<8xf32>
    %264 = vector.shape_cast %263 : vector<8xf32> to vector<8x1xf32>
    %cst_87 = arith.constant dense<0.000000e+00> : vector<8x8xf32>
    %265 = tpu.matmul %262, %255, %cst_87 {dimension_numbers = #tpu.dot_dimension_numbers<[1], [0], [0], [1], [0, 0, 1, 1], [], []>} : vector<8x8xf32>, vector<8x8xf32>, vector<8x8xf32> -> vector<8x8xf32>
    %266 = tpu.reciprocal %264 {approx = true} : vector<8x1xf32> -> vector<8x1xf32>
    %267 = vector.broadcast %266 : vector<8x1xf32> to vector<8x8xf32>
    %268 = arith.mulf %265, %267 : vector<8x8xf32>
    %269 = vector.extract_strided_slice %226 {offsets = [0, 16], sizes = [8, 8], strides = [1, 1]} : vector<16x32xf32> to vector<8x8xf32>
    %270 = vector.extract_strided_slice %231 {offsets = [0, 16], sizes = [8, 8], strides = [1, 1]} : vector<16x32xf32> to vector<8x8xf32>
    %271 = vector.extract_strided_slice %236 {offsets = [0, 16], sizes = [8, 8], strides = [1, 1]} : vector<16x32xf32> to vector<8x8xf32>
    %272 = tpu.transpose %270, [1, 0] : vector<8x8xf32> -> vector<8x8xf32>
    %cst_88 = arith.constant dense<0.000000e+00> : vector<8x8xf32>
    %273 = tpu.matmul %269, %272, %cst_88 {dimension_numbers = #tpu.dot_dimension_numbers<[1], [0], [0], [1], [0, 0, 1, 1], [], []>} : vector<8x8xf32>, vector<8x8xf32>, vector<8x8xf32> -> vector<8x8xf32>
    %cst_89 = arith.constant dense<0xFF800000> : vector<8xf32>
    %274 = vector.multi_reduction <maximumf>, %273, %cst_89 [1] : vector<8x8xf32> to vector<8xf32>
    %275 = vector.shape_cast %274 : vector<8xf32> to vector<8x1xf32>
    %276 = vector.broadcast %275 : vector<8x1xf32> to vector<8x8xf32>
    %277 = arith.subf %273, %276 : vector<8x8xf32>
    %278 = math.exp %277 : vector<8x8xf32>
    %cst_90 = arith.constant dense<0.000000e+00> : vector<8xf32>
    %279 = vector.multi_reduction <add>, %278, %cst_90 [1] : vector<8x8xf32> to vector<8xf32>
    %280 = vector.shape_cast %279 : vector<8xf32> to vector<8x1xf32>
    %cst_91 = arith.constant dense<0.000000e+00> : vector<8x8xf32>
    %281 = tpu.matmul %278, %271, %cst_91 {dimension_numbers = #tpu.dot_dimension_numbers<[1], [0], [0], [1], [0, 0, 1, 1], [], []>} : vector<8x8xf32>, vector<8x8xf32>, vector<8x8xf32> -> vector<8x8xf32>
    %282 = tpu.reciprocal %280 {approx = true} : vector<8x1xf32> -> vector<8x1xf32>
    %283 = vector.broadcast %282 : vector<8x1xf32> to vector<8x8xf32>
    %284 = arith.mulf %281, %283 : vector<8x8xf32>
    %285 = vector.extract_strided_slice %226 {offsets = [0, 24], sizes = [8, 8], strides = [1, 1]} : vector<16x32xf32> to vector<8x8xf32>
    %286 = vector.extract_strided_slice %231 {offsets = [0, 24], sizes = [8, 8], strides = [1, 1]} : vector<16x32xf32> to vector<8x8xf32>
    %287 = vector.extract_strided_slice %236 {offsets = [0, 24], sizes = [8, 8], strides = [1, 1]} : vector<16x32xf32> to vector<8x8xf32>
    %288 = tpu.transpose %286, [1, 0] : vector<8x8xf32> -> vector<8x8xf32>
    %cst_92 = arith.constant dense<0.000000e+00> : vector<8x8xf32>
    %289 = tpu.matmul %285, %288, %cst_92 {dimension_numbers = #tpu.dot_dimension_numbers<[1], [0], [0], [1], [0, 0, 1, 1], [], []>} : vector<8x8xf32>, vector<8x8xf32>, vector<8x8xf32> -> vector<8x8xf32>
    %cst_93 = arith.constant dense<0xFF800000> : vector<8xf32>
    %290 = vector.multi_reduction <maximumf>, %289, %cst_93 [1] : vector<8x8xf32> to vector<8xf32>
    %291 = vector.shape_cast %290 : vector<8xf32> to vector<8x1xf32>
    %292 = vector.broadcast %291 : vector<8x1xf32> to vector<8x8xf32>
    %293 = arith.subf %289, %292 : vector<8x8xf32>
    %294 = math.exp %293 : vector<8x8xf32>
    %cst_94 = arith.constant dense<0.000000e+00> : vector<8xf32>
    %295 = vector.multi_reduction <add>, %294, %cst_94 [1] : vector<8x8xf32> to vector<8xf32>
    %296 = vector.shape_cast %295 : vector<8xf32> to vector<8x1xf32>
    %cst_95 = arith.constant dense<0.000000e+00> : vector<8x8xf32>
    %297 = tpu.matmul %294, %287, %cst_95 {dimension_numbers = #tpu.dot_dimension_numbers<[1], [0], [0], [1], [0, 0, 1, 1], [], []>} : vector<8x8xf32>, vector<8x8xf32>, vector<8x8xf32> -> vector<8x8xf32>
    %298 = tpu.reciprocal %296 {approx = true} : vector<8x1xf32> -> vector<8x1xf32>
    %299 = vector.broadcast %298 : vector<8x1xf32> to vector<8x8xf32>
    %300 = arith.mulf %297, %299 : vector<8x8xf32>
    %301 = tpu.concatenate %252, %268, %284, %300 in 1 : vector<8x8xf32>, vector<8x8xf32>, vector<8x8xf32>, vector<8x8xf32> -> vector<8x32xf32>
    %302 = vector.extract_strided_slice %226 {offsets = [8, 0], sizes = [8, 8], strides = [1, 1]} : vector<16x32xf32> to vector<8x8xf32>
    %303 = vector.extract_strided_slice %231 {offsets = [8, 0], sizes = [8, 8], strides = [1, 1]} : vector<16x32xf32> to vector<8x8xf32>
    %304 = vector.extract_strided_slice %236 {offsets = [8, 0], sizes = [8, 8], strides = [1, 1]} : vector<16x32xf32> to vector<8x8xf32>
    %305 = tpu.transpose %303, [1, 0] : vector<8x8xf32> -> vector<8x8xf32>
    %cst_96 = arith.constant dense<0.000000e+00> : vector<8x8xf32>
    %306 = tpu.matmul %302, %305, %cst_96 {dimension_numbers = #tpu.dot_dimension_numbers<[1], [0], [0], [1], [0, 0, 1, 1], [], []>} : vector<8x8xf32>, vector<8x8xf32>, vector<8x8xf32> -> vector<8x8xf32>
    %cst_97 = arith.constant dense<0xFF800000> : vector<8xf32>
    %307 = vector.multi_reduction <maximumf>, %306, %cst_97 [1] : vector<8x8xf32> to vector<8xf32>
    %308 = vector.shape_cast %307 : vector<8xf32> to vector<8x1xf32>
    %309 = vector.broadcast %308 : vector<8x1xf32> to vector<8x8xf32>
    %310 = arith.subf %306, %309 : vector<8x8xf32>
    %311 = math.exp %310 : vector<8x8xf32>
    %cst_98 = arith.constant dense<0.000000e+00> : vector<8xf32>
    %312 = vector.multi_reduction <add>, %311, %cst_98 [1] : vector<8x8xf32> to vector<8xf32>
    %313 = vector.shape_cast %312 : vector<8xf32> to vector<8x1xf32>
    %cst_99 = arith.constant dense<0.000000e+00> : vector<8x8xf32>
    %314 = tpu.matmul %311, %304, %cst_99 {dimension_numbers = #tpu.dot_dimension_numbers<[1], [0], [0], [1], [0, 0, 1, 1], [], []>} : vector<8x8xf32>, vector<8x8xf32>, vector<8x8xf32> -> vector<8x8xf32>
    %315 = tpu.reciprocal %313 {approx = true} : vector<8x1xf32> -> vector<8x1xf32>
    %316 = vector.broadcast %315 : vector<8x1xf32> to vector<8x8xf32>
    %317 = arith.mulf %314, %316 : vector<8x8xf32>
    %318 = vector.extract_strided_slice %226 {offsets = [8, 8], sizes = [8, 8], strides = [1, 1]} : vector<16x32xf32> to vector<8x8xf32>
    %319 = vector.extract_strided_slice %231 {offsets = [8, 8], sizes = [8, 8], strides = [1, 1]} : vector<16x32xf32> to vector<8x8xf32>
    %320 = vector.extract_strided_slice %236 {offsets = [8, 8], sizes = [8, 8], strides = [1, 1]} : vector<16x32xf32> to vector<8x8xf32>
    %321 = tpu.transpose %319, [1, 0] : vector<8x8xf32> -> vector<8x8xf32>
    %cst_100 = arith.constant dense<0.000000e+00> : vector<8x8xf32>
    %322 = tpu.matmul %318, %321, %cst_100 {dimension_numbers = #tpu.dot_dimension_numbers<[1], [0], [0], [1], [0, 0, 1, 1], [], []>} : vector<8x8xf32>, vector<8x8xf32>, vector<8x8xf32> -> vector<8x8xf32>
    %cst_101 = arith.constant dense<0xFF800000> : vector<8xf32>
    %323 = vector.multi_reduction <maximumf>, %322, %cst_101 [1] : vector<8x8xf32> to vector<8xf32>
    %324 = vector.shape_cast %323 : vector<8xf32> to vector<8x1xf32>
    %325 = vector.broadcast %324 : vector<8x1xf32> to vector<8x8xf32>
    %326 = arith.subf %322, %325 : vector<8x8xf32>
    %327 = math.exp %326 : vector<8x8xf32>
    %cst_102 = arith.constant dense<0.000000e+00> : vector<8xf32>
    %328 = vector.multi_reduction <add>, %327, %cst_102 [1] : vector<8x8xf32> to vector<8xf32>
    %329 = vector.shape_cast %328 : vector<8xf32> to vector<8x1xf32>
    %cst_103 = arith.constant dense<0.000000e+00> : vector<8x8xf32>
    %330 = tpu.matmul %327, %320, %cst_103 {dimension_numbers = #tpu.dot_dimension_numbers<[1], [0], [0], [1], [0, 0, 1, 1], [], []>} : vector<8x8xf32>, vector<8x8xf32>, vector<8x8xf32> -> vector<8x8xf32>
    %331 = tpu.reciprocal %329 {approx = true} : vector<8x1xf32> -> vector<8x1xf32>
    %332 = vector.broadcast %331 : vector<8x1xf32> to vector<8x8xf32>
    %333 = arith.mulf %330, %332 : vector<8x8xf32>
    %334 = vector.extract_strided_slice %226 {offsets = [8, 16], sizes = [8, 8], strides = [1, 1]} : vector<16x32xf32> to vector<8x8xf32>
    %335 = vector.extract_strided_slice %231 {offsets = [8, 16], sizes = [8, 8], strides = [1, 1]} : vector<16x32xf32> to vector<8x8xf32>
    %336 = vector.extract_strided_slice %236 {offsets = [8, 16], sizes = [8, 8], strides = [1, 1]} : vector<16x32xf32> to vector<8x8xf32>
    %337 = tpu.transpose %335, [1, 0] : vector<8x8xf32> -> vector<8x8xf32>
    %cst_104 = arith.constant dense<0.000000e+00> : vector<8x8xf32>
    %338 = tpu.matmul %334, %337, %cst_104 {dimension_numbers = #tpu.dot_dimension_numbers<[1], [0], [0], [1], [0, 0, 1, 1], [], []>} : vector<8x8xf32>, vector<8x8xf32>, vector<8x8xf32> -> vector<8x8xf32>
    %cst_105 = arith.constant dense<0xFF800000> : vector<8xf32>
    %339 = vector.multi_reduction <maximumf>, %338, %cst_105 [1] : vector<8x8xf32> to vector<8xf32>
    %340 = vector.shape_cast %339 : vector<8xf32> to vector<8x1xf32>
    %341 = vector.broadcast %340 : vector<8x1xf32> to vector<8x8xf32>
    %342 = arith.subf %338, %341 : vector<8x8xf32>
    %343 = math.exp %342 : vector<8x8xf32>
    %cst_106 = arith.constant dense<0.000000e+00> : vector<8xf32>
    %344 = vector.multi_reduction <add>, %343, %cst_106 [1] : vector<8x8xf32> to vector<8xf32>
    %345 = vector.shape_cast %344 : vector<8xf32> to vector<8x1xf32>
    %cst_107 = arith.constant dense<0.000000e+00> : vector<8x8xf32>
    %346 = tpu.matmul %343, %336, %cst_107 {dimension_numbers = #tpu.dot_dimension_numbers<[1], [0], [0], [1], [0, 0, 1, 1], [], []>} : vector<8x8xf32>, vector<8x8xf32>, vector<8x8xf32> -> vector<8x8xf32>
    %347 = tpu.reciprocal %345 {approx = true} : vector<8x1xf32> -> vector<8x1xf32>
    %348 = vector.broadcast %347 : vector<8x1xf32> to vector<8x8xf32>
    %349 = arith.mulf %346, %348 : vector<8x8xf32>
    %350 = vector.extract_strided_slice %226 {offsets = [8, 24], sizes = [8, 8], strides = [1, 1]} : vector<16x32xf32> to vector<8x8xf32>
    %351 = vector.extract_strided_slice %231 {offsets = [8, 24], sizes = [8, 8], strides = [1, 1]} : vector<16x32xf32> to vector<8x8xf32>
    %352 = vector.extract_strided_slice %236 {offsets = [8, 24], sizes = [8, 8], strides = [1, 1]} : vector<16x32xf32> to vector<8x8xf32>
    %353 = tpu.transpose %351, [1, 0] : vector<8x8xf32> -> vector<8x8xf32>
    %cst_108 = arith.constant dense<0.000000e+00> : vector<8x8xf32>
    %354 = tpu.matmul %350, %353, %cst_108 {dimension_numbers = #tpu.dot_dimension_numbers<[1], [0], [0], [1], [0, 0, 1, 1], [], []>} : vector<8x8xf32>, vector<8x8xf32>, vector<8x8xf32> -> vector<8x8xf32>
    %cst_109 = arith.constant dense<0xFF800000> : vector<8xf32>
    %355 = vector.multi_reduction <maximumf>, %354, %cst_109 [1] : vector<8x8xf32> to vector<8xf32>
    %356 = vector.shape_cast %355 : vector<8xf32> to vector<8x1xf32>
    %357 = vector.broadcast %356 : vector<8x1xf32> to vector<8x8xf32>
    %358 = arith.subf %354, %357 : vector<8x8xf32>
    %359 = math.exp %358 : vector<8x8xf32>
    %cst_110 = arith.constant dense<0.000000e+00> : vector<8xf32>
    %360 = vector.multi_reduction <add>, %359, %cst_110 [1] : vector<8x8xf32> to vector<8xf32>
    %361 = vector.shape_cast %360 : vector<8xf32> to vector<8x1xf32>
    %cst_111 = arith.constant dense<0.000000e+00> : vector<8x8xf32>
    %362 = tpu.matmul %359, %352, %cst_111 {dimension_numbers = #tpu.dot_dimension_numbers<[1], [0], [0], [1], [0, 0, 1, 1], [], []>} : vector<8x8xf32>, vector<8x8xf32>, vector<8x8xf32> -> vector<8x8xf32>
    %363 = tpu.reciprocal %361 {approx = true} : vector<8x1xf32> -> vector<8x1xf32>
    %364 = vector.broadcast %363 : vector<8x1xf32> to vector<8x8xf32>
    %365 = arith.mulf %362, %364 : vector<8x8xf32>
    %366 = tpu.concatenate %317, %333, %349, %365 in 1 : vector<8x8xf32>, vector<8x8xf32>, vector<8x8xf32>, vector<8x8xf32> -> vector<8x32xf32>
    %367 = tpu.concatenate %301, %366 in 0 : vector<8x32xf32>, vector<8x32xf32> -> vector<16x32xf32>
    %368 = arith.truncf %367 : vector<16x32xf32> to vector<16x32xbf16>
    %369 = arith.truncf %220 : vector<32x32xf32> to vector<32x32xbf16>
    %cst_112 = arith.constant dense<0.000000e+00> : vector<16x32xf32>
    %370 = tpu.matmul %368, %369, %cst_112 {dimension_numbers = #tpu.dot_dimension_numbers<[1], [0], [0], [1], [0, 0, 1, 1], [], []>} : vector<16x32xbf16>, vector<32x32xbf16>, vector<16x32xf32> -> vector<16x32xf32>
    %371 = vector.broadcast %221 : vector<1x32xf32> to vector<16x32xf32>
    %372 = arith.addf %370, %371 : vector<16x32xf32>
    %373 = arith.addf %209, %372 : vector<16x32xf32>
    %374 = vector.extract_strided_slice %5 {offsets = [11, 0], sizes = [1, 32], strides = [1, 1]} : vector<15x32xf32> to vector<1x32xf32>
    %375 = vector.extract_strided_slice %5 {offsets = [12, 0], sizes = [1, 32], strides = [1, 1]} : vector<15x32xf32> to vector<1x32xf32>
    %cst_113 = arith.constant dense<0.000000e+00> : vector<16xf32>
    %376 = vector.multi_reduction <add>, %373, %cst_113 [1] : vector<16x32xf32> to vector<16xf32>
    %377 = vector.shape_cast %376 : vector<16xf32> to vector<16x1xf32>
    %cst_114 = arith.constant 3.200000e+01 : f32
    %378 = vector.broadcast %cst_114 : f32 to vector<16x1xf32>
    %379 = arith.divf %377, %378 : vector<16x1xf32>
    %380 = vector.broadcast %379 : vector<16x1xf32> to vector<16x32xf32>
    %381 = arith.subf %373, %380 : vector<16x32xf32>
    %382 = arith.mulf %381, %381 : vector<16x32xf32>
    %cst_115 = arith.constant dense<0.000000e+00> : vector<16xf32>
    %383 = vector.multi_reduction <add>, %382, %cst_115 [1] : vector<16x32xf32> to vector<16xf32>
    %384 = vector.shape_cast %383 : vector<16xf32> to vector<16x1xf32>
    %cst_116 = arith.constant 3.200000e+01 : f32
    %385 = vector.broadcast %cst_116 : f32 to vector<16x1xf32>
    %386 = arith.divf %384, %385 : vector<16x1xf32>
    %387 = vector.broadcast %379 : vector<16x1xf32> to vector<16x32xf32>
    %388 = arith.subf %373, %387 : vector<16x32xf32>
    %cst_117 = arith.constant 9.99999974E-6 : f32
    %389 = vector.broadcast %cst_117 : f32 to vector<16x1xf32>
    %390 = arith.addf %386, %389 : vector<16x1xf32>
    %391 = math.rsqrt %390 : vector<16x1xf32>
    %392 = vector.broadcast %391 : vector<16x1xf32> to vector<16x32xf32>
    %393 = arith.mulf %388, %392 : vector<16x32xf32>
    %394 = vector.broadcast %374 : vector<1x32xf32> to vector<16x32xf32>
    %395 = arith.mulf %393, %394 : vector<16x32xf32>
    %396 = vector.broadcast %375 : vector<1x32xf32> to vector<16x32xf32>
    %397 = arith.addf %395, %396 : vector<16x32xf32>
    %c0_118 = arith.constant 0 : index
    %c0_119 = arith.constant 0 : index
    %c0_120 = arith.constant 0 : index
    %398 = vector.load %arg3[%c0_118, %c0_119, %c0_120] : memref<2x32x64xf32, #tpu.memory_space<vmem>>, vector<1x32x64xf32>
    %399 = vector.shape_cast %398 : vector<1x32x64xf32> to vector<32x64xf32>
    %400 = arith.truncf %397 : vector<16x32xf32> to vector<16x32xbf16>
    %401 = arith.truncf %399 : vector<32x64xf32> to vector<32x64xbf16>
    %cst_121 = arith.constant dense<0.000000e+00> : vector<16x64xf32>
    %402 = tpu.matmul %400, %401, %cst_121 {dimension_numbers = #tpu.dot_dimension_numbers<[1], [0], [0], [1], [0, 0, 1, 1], [], []>} : vector<16x32xbf16>, vector<32x64xbf16>, vector<16x64xf32> -> vector<16x64xf32>
    %c0_122 = arith.constant 0 : index
    %c0_123 = arith.constant 0 : index
    %c0_124 = arith.constant 0 : index
    %403 = vector.load %arg4[%c0_122, %c0_123, %c0_124] : memref<2x1x64xf32, #tpu.memory_space<vmem>>, vector<1x1x64xf32>
    %404 = vector.shape_cast %403 : vector<1x1x64xf32> to vector<1x64xf32>
    %405 = vector.broadcast %404 : vector<1x64xf32> to vector<16x64xf32>
    %406 = arith.addf %402, %405 : vector<16x64xf32>
    %cst_125 = arith.constant 0.000000e+00 : f32
    %407 = vector.broadcast %cst_125 : f32 to vector<16x64xf32>
    %408 = arith.maximumf %406, %407 : vector<16x64xf32>
    %c0_126 = arith.constant 0 : index
    %c0_127 = arith.constant 0 : index
    %c0_128 = arith.constant 0 : index
    %409 = vector.load %arg5[%c0_126, %c0_127, %c0_128] : memref<2x64x32xf32, #tpu.memory_space<vmem>>, vector<1x64x32xf32>
    %410 = vector.shape_cast %409 : vector<1x64x32xf32> to vector<64x32xf32>
    %411 = arith.truncf %408 : vector<16x64xf32> to vector<16x64xbf16>
    %412 = arith.truncf %410 : vector<64x32xf32> to vector<64x32xbf16>
    %cst_129 = arith.constant dense<0.000000e+00> : vector<16x32xf32>
    %413 = tpu.matmul %411, %412, %cst_129 {dimension_numbers = #tpu.dot_dimension_numbers<[1], [0], [0], [1], [0, 0, 1, 1], [], []>} : vector<16x64xbf16>, vector<64x32xbf16>, vector<16x32xf32> -> vector<16x32xf32>
    %414 = vector.extract_strided_slice %5 {offsets = [8, 0], sizes = [1, 32], strides = [1, 1]} : vector<15x32xf32> to vector<1x32xf32>
    %415 = vector.broadcast %414 : vector<1x32xf32> to vector<16x32xf32>
    %416 = arith.addf %413, %415 : vector<16x32xf32>
    %417 = arith.addf %397, %416 : vector<16x32xf32>
    %418 = vector.extract_strided_slice %5 {offsets = [13, 0], sizes = [1, 32], strides = [1, 1]} : vector<15x32xf32> to vector<1x32xf32>
    %419 = vector.extract_strided_slice %5 {offsets = [14, 0], sizes = [1, 32], strides = [1, 1]} : vector<15x32xf32> to vector<1x32xf32>
    %cst_130 = arith.constant dense<0.000000e+00> : vector<16xf32>
    %420 = vector.multi_reduction <add>, %417, %cst_130 [1] : vector<16x32xf32> to vector<16xf32>
    %421 = vector.shape_cast %420 : vector<16xf32> to vector<16x1xf32>
    %cst_131 = arith.constant 3.200000e+01 : f32
    %422 = vector.broadcast %cst_131 : f32 to vector<16x1xf32>
    %423 = arith.divf %421, %422 : vector<16x1xf32>
    %424 = vector.broadcast %423 : vector<16x1xf32> to vector<16x32xf32>
    %425 = arith.subf %417, %424 : vector<16x32xf32>
    %426 = arith.mulf %425, %425 : vector<16x32xf32>
    %cst_132 = arith.constant dense<0.000000e+00> : vector<16xf32>
    %427 = vector.multi_reduction <add>, %426, %cst_132 [1] : vector<16x32xf32> to vector<16xf32>
    %428 = vector.shape_cast %427 : vector<16xf32> to vector<16x1xf32>
    %cst_133 = arith.constant 3.200000e+01 : f32
    %429 = vector.broadcast %cst_133 : f32 to vector<16x1xf32>
    %430 = arith.divf %428, %429 : vector<16x1xf32>
    %431 = vector.broadcast %423 : vector<16x1xf32> to vector<16x32xf32>
    %432 = arith.subf %417, %431 : vector<16x32xf32>
    %cst_134 = arith.constant 9.99999974E-6 : f32
    %433 = vector.broadcast %cst_134 : f32 to vector<16x1xf32>
    %434 = arith.addf %430, %433 : vector<16x1xf32>
    %435 = math.rsqrt %434 : vector<16x1xf32>
    %436 = vector.broadcast %435 : vector<16x1xf32> to vector<16x32xf32>
    %437 = arith.mulf %432, %436 : vector<16x32xf32>
    %438 = vector.broadcast %418 : vector<1x32xf32> to vector<16x32xf32>
    %439 = arith.mulf %437, %438 : vector<16x32xf32>
    %440 = vector.broadcast %419 : vector<1x32xf32> to vector<16x32xf32>
    %441 = arith.addf %439, %440 : vector<16x32xf32>
    %c1_135 = arith.constant 1 : index
    %c0_136 = arith.constant 0 : index
    %c0_137 = arith.constant 0 : index
    %442 = vector.load %arg2[%c1_135, %c0_136, %c0_137] : memref<2x15x32xf32, #tpu.memory_space<vmem>>, vector<1x15x32xf32>
    %443 = vector.shape_cast %442 : vector<1x15x32xf32> to vector<15x32xf32>
    %c1_138 = arith.constant 1 : index
    %c0_139 = arith.constant 0 : index
    %c0_140 = arith.constant 0 : index
    %c0_141 = arith.constant 0 : index
    %444 = vector.load %arg1[%c1_138, %c0_139, %c0_140, %c0_141] : memref<2x8x32x32xf32, #tpu.memory_space<vmem>>, vector<1x1x32x32xf32>
    %445 = vector.shape_cast %444 : vector<1x1x32x32xf32> to vector<32x32xf32>
    %446 = vector.extract_strided_slice %443 {offsets = [0, 0], sizes = [1, 32], strides = [1, 1]} : vector<15x32xf32> to vector<1x32xf32>
    %c1_142 = arith.constant 1 : index
    %c1_143 = arith.constant 1 : index
    %c0_144 = arith.constant 0 : index
    %c0_145 = arith.constant 0 : index
    %447 = vector.load %arg1[%c1_142, %c1_143, %c0_144, %c0_145] : memref<2x8x32x32xf32, #tpu.memory_space<vmem>>, vector<1x1x32x32xf32>
    %448 = vector.shape_cast %447 : vector<1x1x32x32xf32> to vector<32x32xf32>
    %449 = vector.extract_strided_slice %443 {offsets = [1, 0], sizes = [1, 32], strides = [1, 1]} : vector<15x32xf32> to vector<1x32xf32>
    %c1_146 = arith.constant 1 : index
    %c2_147 = arith.constant 2 : index
    %c0_148 = arith.constant 0 : index
    %c0_149 = arith.constant 0 : index
    %450 = vector.load %arg1[%c1_146, %c2_147, %c0_148, %c0_149] : memref<2x8x32x32xf32, #tpu.memory_space<vmem>>, vector<1x1x32x32xf32>
    %451 = vector.shape_cast %450 : vector<1x1x32x32xf32> to vector<32x32xf32>
    %452 = vector.extract_strided_slice %443 {offsets = [2, 0], sizes = [1, 32], strides = [1, 1]} : vector<15x32xf32> to vector<1x32xf32>
    %c1_150 = arith.constant 1 : index
    %c3_151 = arith.constant 3 : index
    %c0_152 = arith.constant 0 : index
    %c0_153 = arith.constant 0 : index
    %453 = vector.load %arg1[%c1_150, %c3_151, %c0_152, %c0_153] : memref<2x8x32x32xf32, #tpu.memory_space<vmem>>, vector<1x1x32x32xf32>
    %454 = vector.shape_cast %453 : vector<1x1x32x32xf32> to vector<32x32xf32>
    %455 = vector.extract_strided_slice %443 {offsets = [3, 0], sizes = [1, 32], strides = [1, 1]} : vector<15x32xf32> to vector<1x32xf32>
    %456 = arith.truncf %441 : vector<16x32xf32> to vector<16x32xbf16>
    %457 = arith.truncf %445 : vector<32x32xf32> to vector<32x32xbf16>
    %cst_154 = arith.constant dense<0.000000e+00> : vector<16x32xf32>
    %458 = tpu.matmul %456, %457, %cst_154 {dimension_numbers = #tpu.dot_dimension_numbers<[1], [0], [0], [1], [0, 0, 1, 1], [], []>} : vector<16x32xbf16>, vector<32x32xbf16>, vector<16x32xf32> -> vector<16x32xf32>
    %459 = vector.broadcast %446 : vector<1x32xf32> to vector<16x32xf32>
    %460 = arith.addf %458, %459 : vector<16x32xf32>
    %461 = arith.truncf %441 : vector<16x32xf32> to vector<16x32xbf16>
    %462 = arith.truncf %448 : vector<32x32xf32> to vector<32x32xbf16>
    %cst_155 = arith.constant dense<0.000000e+00> : vector<16x32xf32>
    %463 = tpu.matmul %461, %462, %cst_155 {dimension_numbers = #tpu.dot_dimension_numbers<[1], [0], [0], [1], [0, 0, 1, 1], [], []>} : vector<16x32xbf16>, vector<32x32xbf16>, vector<16x32xf32> -> vector<16x32xf32>
    %464 = vector.broadcast %449 : vector<1x32xf32> to vector<16x32xf32>
    %465 = arith.addf %463, %464 : vector<16x32xf32>
    %466 = arith.truncf %441 : vector<16x32xf32> to vector<16x32xbf16>
    %467 = arith.truncf %451 : vector<32x32xf32> to vector<32x32xbf16>
    %cst_156 = arith.constant dense<0.000000e+00> : vector<16x32xf32>
    %468 = tpu.matmul %466, %467, %cst_156 {dimension_numbers = #tpu.dot_dimension_numbers<[1], [0], [0], [1], [0, 0, 1, 1], [], []>} : vector<16x32xbf16>, vector<32x32xbf16>, vector<16x32xf32> -> vector<16x32xf32>
    %469 = vector.broadcast %452 : vector<1x32xf32> to vector<16x32xf32>
    %470 = arith.addf %468, %469 : vector<16x32xf32>
    %471 = vector.extract_strided_slice %460 {offsets = [0, 0], sizes = [8, 8], strides = [1, 1]} : vector<16x32xf32> to vector<8x8xf32>
    %472 = vector.extract_strided_slice %465 {offsets = [0, 0], sizes = [8, 8], strides = [1, 1]} : vector<16x32xf32> to vector<8x8xf32>
    %473 = vector.extract_strided_slice %470 {offsets = [0, 0], sizes = [8, 8], strides = [1, 1]} : vector<16x32xf32> to vector<8x8xf32>
    %474 = tpu.transpose %472, [1, 0] : vector<8x8xf32> -> vector<8x8xf32>
    %cst_157 = arith.constant dense<0.000000e+00> : vector<8x8xf32>
    %475 = tpu.matmul %471, %474, %cst_157 {dimension_numbers = #tpu.dot_dimension_numbers<[1], [0], [0], [1], [0, 0, 1, 1], [], []>} : vector<8x8xf32>, vector<8x8xf32>, vector<8x8xf32> -> vector<8x8xf32>
    %cst_158 = arith.constant -1.000000e+30 : f32
    %476 = vector.broadcast %cst_158 : f32 to vector<8x8xf32>
    %477 = arith.select %3, %475, %476 : vector<8x8xi1>, vector<8x8xf32>
    %cst_159 = arith.constant dense<0xFF800000> : vector<8xf32>
    %478 = vector.multi_reduction <maximumf>, %477, %cst_159 [1] : vector<8x8xf32> to vector<8xf32>
    %479 = vector.shape_cast %478 : vector<8xf32> to vector<8x1xf32>
    %480 = vector.broadcast %479 : vector<8x1xf32> to vector<8x8xf32>
    %481 = arith.subf %477, %480 : vector<8x8xf32>
    %482 = math.exp %481 : vector<8x8xf32>
    %cst_160 = arith.constant dense<0.000000e+00> : vector<8xf32>
    %483 = vector.multi_reduction <add>, %482, %cst_160 [1] : vector<8x8xf32> to vector<8xf32>
    %484 = vector.shape_cast %483 : vector<8xf32> to vector<8x1xf32>
    %cst_161 = arith.constant dense<0.000000e+00> : vector<8x8xf32>
    %485 = tpu.matmul %482, %473, %cst_161 {dimension_numbers = #tpu.dot_dimension_numbers<[1], [0], [0], [1], [0, 0, 1, 1], [], []>} : vector<8x8xf32>, vector<8x8xf32>, vector<8x8xf32> -> vector<8x8xf32>
    %486 = tpu.reciprocal %484 {approx = true} : vector<8x1xf32> -> vector<8x1xf32>
    %487 = vector.broadcast %486 : vector<8x1xf32> to vector<8x8xf32>
    %488 = arith.mulf %485, %487 : vector<8x8xf32>
    %489 = vector.extract_strided_slice %460 {offsets = [0, 8], sizes = [8, 8], strides = [1, 1]} : vector<16x32xf32> to vector<8x8xf32>
    %490 = vector.extract_strided_slice %465 {offsets = [0, 8], sizes = [8, 8], strides = [1, 1]} : vector<16x32xf32> to vector<8x8xf32>
    %491 = vector.extract_strided_slice %470 {offsets = [0, 8], sizes = [8, 8], strides = [1, 1]} : vector<16x32xf32> to vector<8x8xf32>
    %492 = tpu.transpose %490, [1, 0] : vector<8x8xf32> -> vector<8x8xf32>
    %cst_162 = arith.constant dense<0.000000e+00> : vector<8x8xf32>
    %493 = tpu.matmul %489, %492, %cst_162 {dimension_numbers = #tpu.dot_dimension_numbers<[1], [0], [0], [1], [0, 0, 1, 1], [], []>} : vector<8x8xf32>, vector<8x8xf32>, vector<8x8xf32> -> vector<8x8xf32>
    %cst_163 = arith.constant -1.000000e+30 : f32
    %494 = vector.broadcast %cst_163 : f32 to vector<8x8xf32>
    %495 = arith.select %3, %493, %494 : vector<8x8xi1>, vector<8x8xf32>
    %cst_164 = arith.constant dense<0xFF800000> : vector<8xf32>
    %496 = vector.multi_reduction <maximumf>, %495, %cst_164 [1] : vector<8x8xf32> to vector<8xf32>
    %497 = vector.shape_cast %496 : vector<8xf32> to vector<8x1xf32>
    %498 = vector.broadcast %497 : vector<8x1xf32> to vector<8x8xf32>
    %499 = arith.subf %495, %498 : vector<8x8xf32>
    %500 = math.exp %499 : vector<8x8xf32>
    %cst_165 = arith.constant dense<0.000000e+00> : vector<8xf32>
    %501 = vector.multi_reduction <add>, %500, %cst_165 [1] : vector<8x8xf32> to vector<8xf32>
    %502 = vector.shape_cast %501 : vector<8xf32> to vector<8x1xf32>
    %cst_166 = arith.constant dense<0.000000e+00> : vector<8x8xf32>
    %503 = tpu.matmul %500, %491, %cst_166 {dimension_numbers = #tpu.dot_dimension_numbers<[1], [0], [0], [1], [0, 0, 1, 1], [], []>} : vector<8x8xf32>, vector<8x8xf32>, vector<8x8xf32> -> vector<8x8xf32>
    %504 = tpu.reciprocal %502 {approx = true} : vector<8x1xf32> -> vector<8x1xf32>
    %505 = vector.broadcast %504 : vector<8x1xf32> to vector<8x8xf32>
    %506 = arith.mulf %503, %505 : vector<8x8xf32>
    %507 = vector.extract_strided_slice %460 {offsets = [0, 16], sizes = [8, 8], strides = [1, 1]} : vector<16x32xf32> to vector<8x8xf32>
    %508 = vector.extract_strided_slice %465 {offsets = [0, 16], sizes = [8, 8], strides = [1, 1]} : vector<16x32xf32> to vector<8x8xf32>
    %509 = vector.extract_strided_slice %470 {offsets = [0, 16], sizes = [8, 8], strides = [1, 1]} : vector<16x32xf32> to vector<8x8xf32>
    %510 = tpu.transpose %508, [1, 0] : vector<8x8xf32> -> vector<8x8xf32>
    %cst_167 = arith.constant dense<0.000000e+00> : vector<8x8xf32>
    %511 = tpu.matmul %507, %510, %cst_167 {dimension_numbers = #tpu.dot_dimension_numbers<[1], [0], [0], [1], [0, 0, 1, 1], [], []>} : vector<8x8xf32>, vector<8x8xf32>, vector<8x8xf32> -> vector<8x8xf32>
    %cst_168 = arith.constant -1.000000e+30 : f32
    %512 = vector.broadcast %cst_168 : f32 to vector<8x8xf32>
    %513 = arith.select %3, %511, %512 : vector<8x8xi1>, vector<8x8xf32>
    %cst_169 = arith.constant dense<0xFF800000> : vector<8xf32>
    %514 = vector.multi_reduction <maximumf>, %513, %cst_169 [1] : vector<8x8xf32> to vector<8xf32>
    %515 = vector.shape_cast %514 : vector<8xf32> to vector<8x1xf32>
    %516 = vector.broadcast %515 : vector<8x1xf32> to vector<8x8xf32>
    %517 = arith.subf %513, %516 : vector<8x8xf32>
    %518 = math.exp %517 : vector<8x8xf32>
    %cst_170 = arith.constant dense<0.000000e+00> : vector<8xf32>
    %519 = vector.multi_reduction <add>, %518, %cst_170 [1] : vector<8x8xf32> to vector<8xf32>
    %520 = vector.shape_cast %519 : vector<8xf32> to vector<8x1xf32>
    %cst_171 = arith.constant dense<0.000000e+00> : vector<8x8xf32>
    %521 = tpu.matmul %518, %509, %cst_171 {dimension_numbers = #tpu.dot_dimension_numbers<[1], [0], [0], [1], [0, 0, 1, 1], [], []>} : vector<8x8xf32>, vector<8x8xf32>, vector<8x8xf32> -> vector<8x8xf32>
    %522 = tpu.reciprocal %520 {approx = true} : vector<8x1xf32> -> vector<8x1xf32>
    %523 = vector.broadcast %522 : vector<8x1xf32> to vector<8x8xf32>
    %524 = arith.mulf %521, %523 : vector<8x8xf32>
    %525 = vector.extract_strided_slice %460 {offsets = [0, 24], sizes = [8, 8], strides = [1, 1]} : vector<16x32xf32> to vector<8x8xf32>
    %526 = vector.extract_strided_slice %465 {offsets = [0, 24], sizes = [8, 8], strides = [1, 1]} : vector<16x32xf32> to vector<8x8xf32>
    %527 = vector.extract_strided_slice %470 {offsets = [0, 24], sizes = [8, 8], strides = [1, 1]} : vector<16x32xf32> to vector<8x8xf32>
    %528 = tpu.transpose %526, [1, 0] : vector<8x8xf32> -> vector<8x8xf32>
    %cst_172 = arith.constant dense<0.000000e+00> : vector<8x8xf32>
    %529 = tpu.matmul %525, %528, %cst_172 {dimension_numbers = #tpu.dot_dimension_numbers<[1], [0], [0], [1], [0, 0, 1, 1], [], []>} : vector<8x8xf32>, vector<8x8xf32>, vector<8x8xf32> -> vector<8x8xf32>
    %cst_173 = arith.constant -1.000000e+30 : f32
    %530 = vector.broadcast %cst_173 : f32 to vector<8x8xf32>
    %531 = arith.select %3, %529, %530 : vector<8x8xi1>, vector<8x8xf32>
    %cst_174 = arith.constant dense<0xFF800000> : vector<8xf32>
    %532 = vector.multi_reduction <maximumf>, %531, %cst_174 [1] : vector<8x8xf32> to vector<8xf32>
    %533 = vector.shape_cast %532 : vector<8xf32> to vector<8x1xf32>
    %534 = vector.broadcast %533 : vector<8x1xf32> to vector<8x8xf32>
    %535 = arith.subf %531, %534 : vector<8x8xf32>
    %536 = math.exp %535 : vector<8x8xf32>
    %cst_175 = arith.constant dense<0.000000e+00> : vector<8xf32>
    %537 = vector.multi_reduction <add>, %536, %cst_175 [1] : vector<8x8xf32> to vector<8xf32>
    %538 = vector.shape_cast %537 : vector<8xf32> to vector<8x1xf32>
    %cst_176 = arith.constant dense<0.000000e+00> : vector<8x8xf32>
    %539 = tpu.matmul %536, %527, %cst_176 {dimension_numbers = #tpu.dot_dimension_numbers<[1], [0], [0], [1], [0, 0, 1, 1], [], []>} : vector<8x8xf32>, vector<8x8xf32>, vector<8x8xf32> -> vector<8x8xf32>
    %540 = tpu.reciprocal %538 {approx = true} : vector<8x1xf32> -> vector<8x1xf32>
    %541 = vector.broadcast %540 : vector<8x1xf32> to vector<8x8xf32>
    %542 = arith.mulf %539, %541 : vector<8x8xf32>
    %543 = tpu.concatenate %488, %506, %524, %542 in 1 : vector<8x8xf32>, vector<8x8xf32>, vector<8x8xf32>, vector<8x8xf32> -> vector<8x32xf32>
    %544 = vector.extract_strided_slice %460 {offsets = [8, 0], sizes = [8, 8], strides = [1, 1]} : vector<16x32xf32> to vector<8x8xf32>
    %545 = vector.extract_strided_slice %465 {offsets = [8, 0], sizes = [8, 8], strides = [1, 1]} : vector<16x32xf32> to vector<8x8xf32>
    %546 = vector.extract_strided_slice %470 {offsets = [8, 0], sizes = [8, 8], strides = [1, 1]} : vector<16x32xf32> to vector<8x8xf32>
    %547 = tpu.transpose %545, [1, 0] : vector<8x8xf32> -> vector<8x8xf32>
    %cst_177 = arith.constant dense<0.000000e+00> : vector<8x8xf32>
    %548 = tpu.matmul %544, %547, %cst_177 {dimension_numbers = #tpu.dot_dimension_numbers<[1], [0], [0], [1], [0, 0, 1, 1], [], []>} : vector<8x8xf32>, vector<8x8xf32>, vector<8x8xf32> -> vector<8x8xf32>
    %cst_178 = arith.constant -1.000000e+30 : f32
    %549 = vector.broadcast %cst_178 : f32 to vector<8x8xf32>
    %550 = arith.select %3, %548, %549 : vector<8x8xi1>, vector<8x8xf32>
    %cst_179 = arith.constant dense<0xFF800000> : vector<8xf32>
    %551 = vector.multi_reduction <maximumf>, %550, %cst_179 [1] : vector<8x8xf32> to vector<8xf32>
    %552 = vector.shape_cast %551 : vector<8xf32> to vector<8x1xf32>
    %553 = vector.broadcast %552 : vector<8x1xf32> to vector<8x8xf32>
    %554 = arith.subf %550, %553 : vector<8x8xf32>
    %555 = math.exp %554 : vector<8x8xf32>
    %cst_180 = arith.constant dense<0.000000e+00> : vector<8xf32>
    %556 = vector.multi_reduction <add>, %555, %cst_180 [1] : vector<8x8xf32> to vector<8xf32>
    %557 = vector.shape_cast %556 : vector<8xf32> to vector<8x1xf32>
    %cst_181 = arith.constant dense<0.000000e+00> : vector<8x8xf32>
    %558 = tpu.matmul %555, %546, %cst_181 {dimension_numbers = #tpu.dot_dimension_numbers<[1], [0], [0], [1], [0, 0, 1, 1], [], []>} : vector<8x8xf32>, vector<8x8xf32>, vector<8x8xf32> -> vector<8x8xf32>
    %559 = tpu.reciprocal %557 {approx = true} : vector<8x1xf32> -> vector<8x1xf32>
    %560 = vector.broadcast %559 : vector<8x1xf32> to vector<8x8xf32>
    %561 = arith.mulf %558, %560 : vector<8x8xf32>
    %562 = vector.extract_strided_slice %460 {offsets = [8, 8], sizes = [8, 8], strides = [1, 1]} : vector<16x32xf32> to vector<8x8xf32>
    %563 = vector.extract_strided_slice %465 {offsets = [8, 8], sizes = [8, 8], strides = [1, 1]} : vector<16x32xf32> to vector<8x8xf32>
    %564 = vector.extract_strided_slice %470 {offsets = [8, 8], sizes = [8, 8], strides = [1, 1]} : vector<16x32xf32> to vector<8x8xf32>
    %565 = tpu.transpose %563, [1, 0] : vector<8x8xf32> -> vector<8x8xf32>
    %cst_182 = arith.constant dense<0.000000e+00> : vector<8x8xf32>
    %566 = tpu.matmul %562, %565, %cst_182 {dimension_numbers = #tpu.dot_dimension_numbers<[1], [0], [0], [1], [0, 0, 1, 1], [], []>} : vector<8x8xf32>, vector<8x8xf32>, vector<8x8xf32> -> vector<8x8xf32>
    %cst_183 = arith.constant -1.000000e+30 : f32
    %567 = vector.broadcast %cst_183 : f32 to vector<8x8xf32>
    %568 = arith.select %3, %566, %567 : vector<8x8xi1>, vector<8x8xf32>
    %cst_184 = arith.constant dense<0xFF800000> : vector<8xf32>
    %569 = vector.multi_reduction <maximumf>, %568, %cst_184 [1] : vector<8x8xf32> to vector<8xf32>
    %570 = vector.shape_cast %569 : vector<8xf32> to vector<8x1xf32>
    %571 = vector.broadcast %570 : vector<8x1xf32> to vector<8x8xf32>
    %572 = arith.subf %568, %571 : vector<8x8xf32>
    %573 = math.exp %572 : vector<8x8xf32>
    %cst_185 = arith.constant dense<0.000000e+00> : vector<8xf32>
    %574 = vector.multi_reduction <add>, %573, %cst_185 [1] : vector<8x8xf32> to vector<8xf32>
    %575 = vector.shape_cast %574 : vector<8xf32> to vector<8x1xf32>
    %cst_186 = arith.constant dense<0.000000e+00> : vector<8x8xf32>
    %576 = tpu.matmul %573, %564, %cst_186 {dimension_numbers = #tpu.dot_dimension_numbers<[1], [0], [0], [1], [0, 0, 1, 1], [], []>} : vector<8x8xf32>, vector<8x8xf32>, vector<8x8xf32> -> vector<8x8xf32>
    %577 = tpu.reciprocal %575 {approx = true} : vector<8x1xf32> -> vector<8x1xf32>
    %578 = vector.broadcast %577 : vector<8x1xf32> to vector<8x8xf32>
    %579 = arith.mulf %576, %578 : vector<8x8xf32>
    %580 = vector.extract_strided_slice %460 {offsets = [8, 16], sizes = [8, 8], strides = [1, 1]} : vector<16x32xf32> to vector<8x8xf32>
    %581 = vector.extract_strided_slice %465 {offsets = [8, 16], sizes = [8, 8], strides = [1, 1]} : vector<16x32xf32> to vector<8x8xf32>
    %582 = vector.extract_strided_slice %470 {offsets = [8, 16], sizes = [8, 8], strides = [1, 1]} : vector<16x32xf32> to vector<8x8xf32>
    %583 = tpu.transpose %581, [1, 0] : vector<8x8xf32> -> vector<8x8xf32>
    %cst_187 = arith.constant dense<0.000000e+00> : vector<8x8xf32>
    %584 = tpu.matmul %580, %583, %cst_187 {dimension_numbers = #tpu.dot_dimension_numbers<[1], [0], [0], [1], [0, 0, 1, 1], [], []>} : vector<8x8xf32>, vector<8x8xf32>, vector<8x8xf32> -> vector<8x8xf32>
    %cst_188 = arith.constant -1.000000e+30 : f32
    %585 = vector.broadcast %cst_188 : f32 to vector<8x8xf32>
    %586 = arith.select %3, %584, %585 : vector<8x8xi1>, vector<8x8xf32>
    %cst_189 = arith.constant dense<0xFF800000> : vector<8xf32>
    %587 = vector.multi_reduction <maximumf>, %586, %cst_189 [1] : vector<8x8xf32> to vector<8xf32>
    %588 = vector.shape_cast %587 : vector<8xf32> to vector<8x1xf32>
    %589 = vector.broadcast %588 : vector<8x1xf32> to vector<8x8xf32>
    %590 = arith.subf %586, %589 : vector<8x8xf32>
    %591 = math.exp %590 : vector<8x8xf32>
    %cst_190 = arith.constant dense<0.000000e+00> : vector<8xf32>
    %592 = vector.multi_reduction <add>, %591, %cst_190 [1] : vector<8x8xf32> to vector<8xf32>
    %593 = vector.shape_cast %592 : vector<8xf32> to vector<8x1xf32>
    %cst_191 = arith.constant dense<0.000000e+00> : vector<8x8xf32>
    %594 = tpu.matmul %591, %582, %cst_191 {dimension_numbers = #tpu.dot_dimension_numbers<[1], [0], [0], [1], [0, 0, 1, 1], [], []>} : vector<8x8xf32>, vector<8x8xf32>, vector<8x8xf32> -> vector<8x8xf32>
    %595 = tpu.reciprocal %593 {approx = true} : vector<8x1xf32> -> vector<8x1xf32>
    %596 = vector.broadcast %595 : vector<8x1xf32> to vector<8x8xf32>
    %597 = arith.mulf %594, %596 : vector<8x8xf32>
    %598 = vector.extract_strided_slice %460 {offsets = [8, 24], sizes = [8, 8], strides = [1, 1]} : vector<16x32xf32> to vector<8x8xf32>
    %599 = vector.extract_strided_slice %465 {offsets = [8, 24], sizes = [8, 8], strides = [1, 1]} : vector<16x32xf32> to vector<8x8xf32>
    %600 = vector.extract_strided_slice %470 {offsets = [8, 24], sizes = [8, 8], strides = [1, 1]} : vector<16x32xf32> to vector<8x8xf32>
    %601 = tpu.transpose %599, [1, 0] : vector<8x8xf32> -> vector<8x8xf32>
    %cst_192 = arith.constant dense<0.000000e+00> : vector<8x8xf32>
    %602 = tpu.matmul %598, %601, %cst_192 {dimension_numbers = #tpu.dot_dimension_numbers<[1], [0], [0], [1], [0, 0, 1, 1], [], []>} : vector<8x8xf32>, vector<8x8xf32>, vector<8x8xf32> -> vector<8x8xf32>
    %cst_193 = arith.constant -1.000000e+30 : f32
    %603 = vector.broadcast %cst_193 : f32 to vector<8x8xf32>
    %604 = arith.select %3, %602, %603 : vector<8x8xi1>, vector<8x8xf32>
    %cst_194 = arith.constant dense<0xFF800000> : vector<8xf32>
    %605 = vector.multi_reduction <maximumf>, %604, %cst_194 [1] : vector<8x8xf32> to vector<8xf32>
    %606 = vector.shape_cast %605 : vector<8xf32> to vector<8x1xf32>
    %607 = vector.broadcast %606 : vector<8x1xf32> to vector<8x8xf32>
    %608 = arith.subf %604, %607 : vector<8x8xf32>
    %609 = math.exp %608 : vector<8x8xf32>
    %cst_195 = arith.constant dense<0.000000e+00> : vector<8xf32>
    %610 = vector.multi_reduction <add>, %609, %cst_195 [1] : vector<8x8xf32> to vector<8xf32>
    %611 = vector.shape_cast %610 : vector<8xf32> to vector<8x1xf32>
    %cst_196 = arith.constant dense<0.000000e+00> : vector<8x8xf32>
    %612 = tpu.matmul %609, %600, %cst_196 {dimension_numbers = #tpu.dot_dimension_numbers<[1], [0], [0], [1], [0, 0, 1, 1], [], []>} : vector<8x8xf32>, vector<8x8xf32>, vector<8x8xf32> -> vector<8x8xf32>
    %613 = tpu.reciprocal %611 {approx = true} : vector<8x1xf32> -> vector<8x1xf32>
    %614 = vector.broadcast %613 : vector<8x1xf32> to vector<8x8xf32>
    %615 = arith.mulf %612, %614 : vector<8x8xf32>
    %616 = tpu.concatenate %561, %579, %597, %615 in 1 : vector<8x8xf32>, vector<8x8xf32>, vector<8x8xf32>, vector<8x8xf32> -> vector<8x32xf32>
    %617 = tpu.concatenate %543, %616 in 0 : vector<8x32xf32>, vector<8x32xf32> -> vector<16x32xf32>
    %618 = arith.truncf %617 : vector<16x32xf32> to vector<16x32xbf16>
    %619 = arith.truncf %454 : vector<32x32xf32> to vector<32x32xbf16>
    %cst_197 = arith.constant dense<0.000000e+00> : vector<16x32xf32>
    %620 = tpu.matmul %618, %619, %cst_197 {dimension_numbers = #tpu.dot_dimension_numbers<[1], [0], [0], [1], [0, 0, 1, 1], [], []>} : vector<16x32xbf16>, vector<32x32xbf16>, vector<16x32xf32> -> vector<16x32xf32>
    %621 = vector.broadcast %455 : vector<1x32xf32> to vector<16x32xf32>
    %622 = arith.addf %620, %621 : vector<16x32xf32>
    %623 = arith.addf %441, %622 : vector<16x32xf32>
    %624 = vector.extract_strided_slice %443 {offsets = [9, 0], sizes = [1, 32], strides = [1, 1]} : vector<15x32xf32> to vector<1x32xf32>
    %625 = vector.extract_strided_slice %443 {offsets = [10, 0], sizes = [1, 32], strides = [1, 1]} : vector<15x32xf32> to vector<1x32xf32>
    %cst_198 = arith.constant dense<0.000000e+00> : vector<16xf32>
    %626 = vector.multi_reduction <add>, %623, %cst_198 [1] : vector<16x32xf32> to vector<16xf32>
    %627 = vector.shape_cast %626 : vector<16xf32> to vector<16x1xf32>
    %cst_199 = arith.constant 3.200000e+01 : f32
    %628 = vector.broadcast %cst_199 : f32 to vector<16x1xf32>
    %629 = arith.divf %627, %628 : vector<16x1xf32>
    %630 = vector.broadcast %629 : vector<16x1xf32> to vector<16x32xf32>
    %631 = arith.subf %623, %630 : vector<16x32xf32>
    %632 = arith.mulf %631, %631 : vector<16x32xf32>
    %cst_200 = arith.constant dense<0.000000e+00> : vector<16xf32>
    %633 = vector.multi_reduction <add>, %632, %cst_200 [1] : vector<16x32xf32> to vector<16xf32>
    %634 = vector.shape_cast %633 : vector<16xf32> to vector<16x1xf32>
    %cst_201 = arith.constant 3.200000e+01 : f32
    %635 = vector.broadcast %cst_201 : f32 to vector<16x1xf32>
    %636 = arith.divf %634, %635 : vector<16x1xf32>
    %637 = vector.broadcast %629 : vector<16x1xf32> to vector<16x32xf32>
    %638 = arith.subf %623, %637 : vector<16x32xf32>
    %cst_202 = arith.constant 9.99999974E-6 : f32
    %639 = vector.broadcast %cst_202 : f32 to vector<16x1xf32>
    %640 = arith.addf %636, %639 : vector<16x1xf32>
    %641 = math.rsqrt %640 : vector<16x1xf32>
    %642 = vector.broadcast %641 : vector<16x1xf32> to vector<16x32xf32>
    %643 = arith.mulf %638, %642 : vector<16x32xf32>
    %644 = vector.broadcast %624 : vector<1x32xf32> to vector<16x32xf32>
    %645 = arith.mulf %643, %644 : vector<16x32xf32>
    %646 = vector.broadcast %625 : vector<1x32xf32> to vector<16x32xf32>
    %647 = arith.addf %645, %646 : vector<16x32xf32>
    %c1_203 = arith.constant 1 : index
    %c4_204 = arith.constant 4 : index
    %c0_205 = arith.constant 0 : index
    %c0_206 = arith.constant 0 : index
    %648 = vector.load %arg1[%c1_203, %c4_204, %c0_205, %c0_206] : memref<2x8x32x32xf32, #tpu.memory_space<vmem>>, vector<1x1x32x32xf32>
    %649 = vector.shape_cast %648 : vector<1x1x32x32xf32> to vector<32x32xf32>
    %650 = vector.extract_strided_slice %443 {offsets = [4, 0], sizes = [1, 32], strides = [1, 1]} : vector<15x32xf32> to vector<1x32xf32>
    %c1_207 = arith.constant 1 : index
    %c5_208 = arith.constant 5 : index
    %c0_209 = arith.constant 0 : index
    %c0_210 = arith.constant 0 : index
    %651 = vector.load %arg1[%c1_207, %c5_208, %c0_209, %c0_210] : memref<2x8x32x32xf32, #tpu.memory_space<vmem>>, vector<1x1x32x32xf32>
    %652 = vector.shape_cast %651 : vector<1x1x32x32xf32> to vector<32x32xf32>
    %653 = vector.extract_strided_slice %443 {offsets = [5, 0], sizes = [1, 32], strides = [1, 1]} : vector<15x32xf32> to vector<1x32xf32>
    %c1_211 = arith.constant 1 : index
    %c6_212 = arith.constant 6 : index
    %c0_213 = arith.constant 0 : index
    %c0_214 = arith.constant 0 : index
    %654 = vector.load %arg1[%c1_211, %c6_212, %c0_213, %c0_214] : memref<2x8x32x32xf32, #tpu.memory_space<vmem>>, vector<1x1x32x32xf32>
    %655 = vector.shape_cast %654 : vector<1x1x32x32xf32> to vector<32x32xf32>
    %656 = vector.extract_strided_slice %443 {offsets = [6, 0], sizes = [1, 32], strides = [1, 1]} : vector<15x32xf32> to vector<1x32xf32>
    %c1_215 = arith.constant 1 : index
    %c7_216 = arith.constant 7 : index
    %c0_217 = arith.constant 0 : index
    %c0_218 = arith.constant 0 : index
    %657 = vector.load %arg1[%c1_215, %c7_216, %c0_217, %c0_218] : memref<2x8x32x32xf32, #tpu.memory_space<vmem>>, vector<1x1x32x32xf32>
    %658 = vector.shape_cast %657 : vector<1x1x32x32xf32> to vector<32x32xf32>
    %659 = vector.extract_strided_slice %443 {offsets = [7, 0], sizes = [1, 32], strides = [1, 1]} : vector<15x32xf32> to vector<1x32xf32>
    %660 = arith.truncf %647 : vector<16x32xf32> to vector<16x32xbf16>
    %661 = arith.truncf %649 : vector<32x32xf32> to vector<32x32xbf16>
    %cst_219 = arith.constant dense<0.000000e+00> : vector<16x32xf32>
    %662 = tpu.matmul %660, %661, %cst_219 {dimension_numbers = #tpu.dot_dimension_numbers<[1], [0], [0], [1], [0, 0, 1, 1], [], []>} : vector<16x32xbf16>, vector<32x32xbf16>, vector<16x32xf32> -> vector<16x32xf32>
    %663 = vector.broadcast %650 : vector<1x32xf32> to vector<16x32xf32>
    %664 = arith.addf %662, %663 : vector<16x32xf32>
    %665 = arith.truncf %0 : vector<16x32xf32> to vector<16x32xbf16>
    %666 = arith.truncf %652 : vector<32x32xf32> to vector<32x32xbf16>
    %cst_220 = arith.constant dense<0.000000e+00> : vector<16x32xf32>
    %667 = tpu.matmul %665, %666, %cst_220 {dimension_numbers = #tpu.dot_dimension_numbers<[1], [0], [0], [1], [0, 0, 1, 1], [], []>} : vector<16x32xbf16>, vector<32x32xbf16>, vector<16x32xf32> -> vector<16x32xf32>
    %668 = vector.broadcast %653 : vector<1x32xf32> to vector<16x32xf32>
    %669 = arith.addf %667, %668 : vector<16x32xf32>
    %670 = arith.truncf %0 : vector<16x32xf32> to vector<16x32xbf16>
    %671 = arith.truncf %655 : vector<32x32xf32> to vector<32x32xbf16>
    %cst_221 = arith.constant dense<0.000000e+00> : vector<16x32xf32>
    %672 = tpu.matmul %670, %671, %cst_221 {dimension_numbers = #tpu.dot_dimension_numbers<[1], [0], [0], [1], [0, 0, 1, 1], [], []>} : vector<16x32xbf16>, vector<32x32xbf16>, vector<16x32xf32> -> vector<16x32xf32>
    %673 = vector.broadcast %656 : vector<1x32xf32> to vector<16x32xf32>
    %674 = arith.addf %672, %673 : vector<16x32xf32>
    %675 = vector.extract_strided_slice %664 {offsets = [0, 0], sizes = [8, 8], strides = [1, 1]} : vector<16x32xf32> to vector<8x8xf32>
    %676 = vector.extract_strided_slice %669 {offsets = [0, 0], sizes = [8, 8], strides = [1, 1]} : vector<16x32xf32> to vector<8x8xf32>
    %677 = vector.extract_strided_slice %674 {offsets = [0, 0], sizes = [8, 8], strides = [1, 1]} : vector<16x32xf32> to vector<8x8xf32>
    %678 = tpu.transpose %676, [1, 0] : vector<8x8xf32> -> vector<8x8xf32>
    %cst_222 = arith.constant dense<0.000000e+00> : vector<8x8xf32>
    %679 = tpu.matmul %675, %678, %cst_222 {dimension_numbers = #tpu.dot_dimension_numbers<[1], [0], [0], [1], [0, 0, 1, 1], [], []>} : vector<8x8xf32>, vector<8x8xf32>, vector<8x8xf32> -> vector<8x8xf32>
    %cst_223 = arith.constant dense<0xFF800000> : vector<8xf32>
    %680 = vector.multi_reduction <maximumf>, %679, %cst_223 [1] : vector<8x8xf32> to vector<8xf32>
    %681 = vector.shape_cast %680 : vector<8xf32> to vector<8x1xf32>
    %682 = vector.broadcast %681 : vector<8x1xf32> to vector<8x8xf32>
    %683 = arith.subf %679, %682 : vector<8x8xf32>
    %684 = math.exp %683 : vector<8x8xf32>
    %cst_224 = arith.constant dense<0.000000e+00> : vector<8xf32>
    %685 = vector.multi_reduction <add>, %684, %cst_224 [1] : vector<8x8xf32> to vector<8xf32>
    %686 = vector.shape_cast %685 : vector<8xf32> to vector<8x1xf32>
    %cst_225 = arith.constant dense<0.000000e+00> : vector<8x8xf32>
    %687 = tpu.matmul %684, %677, %cst_225 {dimension_numbers = #tpu.dot_dimension_numbers<[1], [0], [0], [1], [0, 0, 1, 1], [], []>} : vector<8x8xf32>, vector<8x8xf32>, vector<8x8xf32> -> vector<8x8xf32>
    %688 = tpu.reciprocal %686 {approx = true} : vector<8x1xf32> -> vector<8x1xf32>
    %689 = vector.broadcast %688 : vector<8x1xf32> to vector<8x8xf32>
    %690 = arith.mulf %687, %689 : vector<8x8xf32>
    %691 = vector.extract_strided_slice %664 {offsets = [0, 8], sizes = [8, 8], strides = [1, 1]} : vector<16x32xf32> to vector<8x8xf32>
    %692 = vector.extract_strided_slice %669 {offsets = [0, 8], sizes = [8, 8], strides = [1, 1]} : vector<16x32xf32> to vector<8x8xf32>
    %693 = vector.extract_strided_slice %674 {offsets = [0, 8], sizes = [8, 8], strides = [1, 1]} : vector<16x32xf32> to vector<8x8xf32>
    %694 = tpu.transpose %692, [1, 0] : vector<8x8xf32> -> vector<8x8xf32>
    %cst_226 = arith.constant dense<0.000000e+00> : vector<8x8xf32>
    %695 = tpu.matmul %691, %694, %cst_226 {dimension_numbers = #tpu.dot_dimension_numbers<[1], [0], [0], [1], [0, 0, 1, 1], [], []>} : vector<8x8xf32>, vector<8x8xf32>, vector<8x8xf32> -> vector<8x8xf32>
    %cst_227 = arith.constant dense<0xFF800000> : vector<8xf32>
    %696 = vector.multi_reduction <maximumf>, %695, %cst_227 [1] : vector<8x8xf32> to vector<8xf32>
    %697 = vector.shape_cast %696 : vector<8xf32> to vector<8x1xf32>
    %698 = vector.broadcast %697 : vector<8x1xf32> to vector<8x8xf32>
    %699 = arith.subf %695, %698 : vector<8x8xf32>
    %700 = math.exp %699 : vector<8x8xf32>
    %cst_228 = arith.constant dense<0.000000e+00> : vector<8xf32>
    %701 = vector.multi_reduction <add>, %700, %cst_228 [1] : vector<8x8xf32> to vector<8xf32>
    %702 = vector.shape_cast %701 : vector<8xf32> to vector<8x1xf32>
    %cst_229 = arith.constant dense<0.000000e+00> : vector<8x8xf32>
    %703 = tpu.matmul %700, %693, %cst_229 {dimension_numbers = #tpu.dot_dimension_numbers<[1], [0], [0], [1], [0, 0, 1, 1], [], []>} : vector<8x8xf32>, vector<8x8xf32>, vector<8x8xf32> -> vector<8x8xf32>
    %704 = tpu.reciprocal %702 {approx = true} : vector<8x1xf32> -> vector<8x1xf32>
    %705 = vector.broadcast %704 : vector<8x1xf32> to vector<8x8xf32>
    %706 = arith.mulf %703, %705 : vector<8x8xf32>
    %707 = vector.extract_strided_slice %664 {offsets = [0, 16], sizes = [8, 8], strides = [1, 1]} : vector<16x32xf32> to vector<8x8xf32>
    %708 = vector.extract_strided_slice %669 {offsets = [0, 16], sizes = [8, 8], strides = [1, 1]} : vector<16x32xf32> to vector<8x8xf32>
    %709 = vector.extract_strided_slice %674 {offsets = [0, 16], sizes = [8, 8], strides = [1, 1]} : vector<16x32xf32> to vector<8x8xf32>
    %710 = tpu.transpose %708, [1, 0] : vector<8x8xf32> -> vector<8x8xf32>
    %cst_230 = arith.constant dense<0.000000e+00> : vector<8x8xf32>
    %711 = tpu.matmul %707, %710, %cst_230 {dimension_numbers = #tpu.dot_dimension_numbers<[1], [0], [0], [1], [0, 0, 1, 1], [], []>} : vector<8x8xf32>, vector<8x8xf32>, vector<8x8xf32> -> vector<8x8xf32>
    %cst_231 = arith.constant dense<0xFF800000> : vector<8xf32>
    %712 = vector.multi_reduction <maximumf>, %711, %cst_231 [1] : vector<8x8xf32> to vector<8xf32>
    %713 = vector.shape_cast %712 : vector<8xf32> to vector<8x1xf32>
    %714 = vector.broadcast %713 : vector<8x1xf32> to vector<8x8xf32>
    %715 = arith.subf %711, %714 : vector<8x8xf32>
    %716 = math.exp %715 : vector<8x8xf32>
    %cst_232 = arith.constant dense<0.000000e+00> : vector<8xf32>
    %717 = vector.multi_reduction <add>, %716, %cst_232 [1] : vector<8x8xf32> to vector<8xf32>
    %718 = vector.shape_cast %717 : vector<8xf32> to vector<8x1xf32>
    %cst_233 = arith.constant dense<0.000000e+00> : vector<8x8xf32>
    %719 = tpu.matmul %716, %709, %cst_233 {dimension_numbers = #tpu.dot_dimension_numbers<[1], [0], [0], [1], [0, 0, 1, 1], [], []>} : vector<8x8xf32>, vector<8x8xf32>, vector<8x8xf32> -> vector<8x8xf32>
    %720 = tpu.reciprocal %718 {approx = true} : vector<8x1xf32> -> vector<8x1xf32>
    %721 = vector.broadcast %720 : vector<8x1xf32> to vector<8x8xf32>
    %722 = arith.mulf %719, %721 : vector<8x8xf32>
    %723 = vector.extract_strided_slice %664 {offsets = [0, 24], sizes = [8, 8], strides = [1, 1]} : vector<16x32xf32> to vector<8x8xf32>
    %724 = vector.extract_strided_slice %669 {offsets = [0, 24], sizes = [8, 8], strides = [1, 1]} : vector<16x32xf32> to vector<8x8xf32>
    %725 = vector.extract_strided_slice %674 {offsets = [0, 24], sizes = [8, 8], strides = [1, 1]} : vector<16x32xf32> to vector<8x8xf32>
    %726 = tpu.transpose %724, [1, 0] : vector<8x8xf32> -> vector<8x8xf32>
    %cst_234 = arith.constant dense<0.000000e+00> : vector<8x8xf32>
    %727 = tpu.matmul %723, %726, %cst_234 {dimension_numbers = #tpu.dot_dimension_numbers<[1], [0], [0], [1], [0, 0, 1, 1], [], []>} : vector<8x8xf32>, vector<8x8xf32>, vector<8x8xf32> -> vector<8x8xf32>
    %cst_235 = arith.constant dense<0xFF800000> : vector<8xf32>
    %728 = vector.multi_reduction <maximumf>, %727, %cst_235 [1] : vector<8x8xf32> to vector<8xf32>
    %729 = vector.shape_cast %728 : vector<8xf32> to vector<8x1xf32>
    %730 = vector.broadcast %729 : vector<8x1xf32> to vector<8x8xf32>
    %731 = arith.subf %727, %730 : vector<8x8xf32>
    %732 = math.exp %731 : vector<8x8xf32>
    %cst_236 = arith.constant dense<0.000000e+00> : vector<8xf32>
    %733 = vector.multi_reduction <add>, %732, %cst_236 [1] : vector<8x8xf32> to vector<8xf32>
    %734 = vector.shape_cast %733 : vector<8xf32> to vector<8x1xf32>
    %cst_237 = arith.constant dense<0.000000e+00> : vector<8x8xf32>
    %735 = tpu.matmul %732, %725, %cst_237 {dimension_numbers = #tpu.dot_dimension_numbers<[1], [0], [0], [1], [0, 0, 1, 1], [], []>} : vector<8x8xf32>, vector<8x8xf32>, vector<8x8xf32> -> vector<8x8xf32>
    %736 = tpu.reciprocal %734 {approx = true} : vector<8x1xf32> -> vector<8x1xf32>
    %737 = vector.broadcast %736 : vector<8x1xf32> to vector<8x8xf32>
    %738 = arith.mulf %735, %737 : vector<8x8xf32>
    %739 = tpu.concatenate %690, %706, %722, %738 in 1 : vector<8x8xf32>, vector<8x8xf32>, vector<8x8xf32>, vector<8x8xf32> -> vector<8x32xf32>
    %740 = vector.extract_strided_slice %664 {offsets = [8, 0], sizes = [8, 8], strides = [1, 1]} : vector<16x32xf32> to vector<8x8xf32>
    %741 = vector.extract_strided_slice %669 {offsets = [8, 0], sizes = [8, 8], strides = [1, 1]} : vector<16x32xf32> to vector<8x8xf32>
    %742 = vector.extract_strided_slice %674 {offsets = [8, 0], sizes = [8, 8], strides = [1, 1]} : vector<16x32xf32> to vector<8x8xf32>
    %743 = tpu.transpose %741, [1, 0] : vector<8x8xf32> -> vector<8x8xf32>
    %cst_238 = arith.constant dense<0.000000e+00> : vector<8x8xf32>
    %744 = tpu.matmul %740, %743, %cst_238 {dimension_numbers = #tpu.dot_dimension_numbers<[1], [0], [0], [1], [0, 0, 1, 1], [], []>} : vector<8x8xf32>, vector<8x8xf32>, vector<8x8xf32> -> vector<8x8xf32>
    %cst_239 = arith.constant dense<0xFF800000> : vector<8xf32>
    %745 = vector.multi_reduction <maximumf>, %744, %cst_239 [1] : vector<8x8xf32> to vector<8xf32>
    %746 = vector.shape_cast %745 : vector<8xf32> to vector<8x1xf32>
    %747 = vector.broadcast %746 : vector<8x1xf32> to vector<8x8xf32>
    %748 = arith.subf %744, %747 : vector<8x8xf32>
    %749 = math.exp %748 : vector<8x8xf32>
    %cst_240 = arith.constant dense<0.000000e+00> : vector<8xf32>
    %750 = vector.multi_reduction <add>, %749, %cst_240 [1] : vector<8x8xf32> to vector<8xf32>
    %751 = vector.shape_cast %750 : vector<8xf32> to vector<8x1xf32>
    %cst_241 = arith.constant dense<0.000000e+00> : vector<8x8xf32>
    %752 = tpu.matmul %749, %742, %cst_241 {dimension_numbers = #tpu.dot_dimension_numbers<[1], [0], [0], [1], [0, 0, 1, 1], [], []>} : vector<8x8xf32>, vector<8x8xf32>, vector<8x8xf32> -> vector<8x8xf32>
    %753 = tpu.reciprocal %751 {approx = true} : vector<8x1xf32> -> vector<8x1xf32>
    %754 = vector.broadcast %753 : vector<8x1xf32> to vector<8x8xf32>
    %755 = arith.mulf %752, %754 : vector<8x8xf32>
    %756 = vector.extract_strided_slice %664 {offsets = [8, 8], sizes = [8, 8], strides = [1, 1]} : vector<16x32xf32> to vector<8x8xf32>
    %757 = vector.extract_strided_slice %669 {offsets = [8, 8], sizes = [8, 8], strides = [1, 1]} : vector<16x32xf32> to vector<8x8xf32>
    %758 = vector.extract_strided_slice %674 {offsets = [8, 8], sizes = [8, 8], strides = [1, 1]} : vector<16x32xf32> to vector<8x8xf32>
    %759 = tpu.transpose %757, [1, 0] : vector<8x8xf32> -> vector<8x8xf32>
    %cst_242 = arith.constant dense<0.000000e+00> : vector<8x8xf32>
    %760 = tpu.matmul %756, %759, %cst_242 {dimension_numbers = #tpu.dot_dimension_numbers<[1], [0], [0], [1], [0, 0, 1, 1], [], []>} : vector<8x8xf32>, vector<8x8xf32>, vector<8x8xf32> -> vector<8x8xf32>
    %cst_243 = arith.constant dense<0xFF800000> : vector<8xf32>
    %761 = vector.multi_reduction <maximumf>, %760, %cst_243 [1] : vector<8x8xf32> to vector<8xf32>
    %762 = vector.shape_cast %761 : vector<8xf32> to vector<8x1xf32>
    %763 = vector.broadcast %762 : vector<8x1xf32> to vector<8x8xf32>
    %764 = arith.subf %760, %763 : vector<8x8xf32>
    %765 = math.exp %764 : vector<8x8xf32>
    %cst_244 = arith.constant dense<0.000000e+00> : vector<8xf32>
    %766 = vector.multi_reduction <add>, %765, %cst_244 [1] : vector<8x8xf32> to vector<8xf32>
    %767 = vector.shape_cast %766 : vector<8xf32> to vector<8x1xf32>
    %cst_245 = arith.constant dense<0.000000e+00> : vector<8x8xf32>
    %768 = tpu.matmul %765, %758, %cst_245 {dimension_numbers = #tpu.dot_dimension_numbers<[1], [0], [0], [1], [0, 0, 1, 1], [], []>} : vector<8x8xf32>, vector<8x8xf32>, vector<8x8xf32> -> vector<8x8xf32>
    %769 = tpu.reciprocal %767 {approx = true} : vector<8x1xf32> -> vector<8x1xf32>
    %770 = vector.broadcast %769 : vector<8x1xf32> to vector<8x8xf32>
    %771 = arith.mulf %768, %770 : vector<8x8xf32>
    %772 = vector.extract_strided_slice %664 {offsets = [8, 16], sizes = [8, 8], strides = [1, 1]} : vector<16x32xf32> to vector<8x8xf32>
    %773 = vector.extract_strided_slice %669 {offsets = [8, 16], sizes = [8, 8], strides = [1, 1]} : vector<16x32xf32> to vector<8x8xf32>
    %774 = vector.extract_strided_slice %674 {offsets = [8, 16], sizes = [8, 8], strides = [1, 1]} : vector<16x32xf32> to vector<8x8xf32>
    %775 = tpu.transpose %773, [1, 0] : vector<8x8xf32> -> vector<8x8xf32>
    %cst_246 = arith.constant dense<0.000000e+00> : vector<8x8xf32>
    %776 = tpu.matmul %772, %775, %cst_246 {dimension_numbers = #tpu.dot_dimension_numbers<[1], [0], [0], [1], [0, 0, 1, 1], [], []>} : vector<8x8xf32>, vector<8x8xf32>, vector<8x8xf32> -> vector<8x8xf32>
    %cst_247 = arith.constant dense<0xFF800000> : vector<8xf32>
    %777 = vector.multi_reduction <maximumf>, %776, %cst_247 [1] : vector<8x8xf32> to vector<8xf32>
    %778 = vector.shape_cast %777 : vector<8xf32> to vector<8x1xf32>
    %779 = vector.broadcast %778 : vector<8x1xf32> to vector<8x8xf32>
    %780 = arith.subf %776, %779 : vector<8x8xf32>
    %781 = math.exp %780 : vector<8x8xf32>
    %cst_248 = arith.constant dense<0.000000e+00> : vector<8xf32>
    %782 = vector.multi_reduction <add>, %781, %cst_248 [1] : vector<8x8xf32> to vector<8xf32>
    %783 = vector.shape_cast %782 : vector<8xf32> to vector<8x1xf32>
    %cst_249 = arith.constant dense<0.000000e+00> : vector<8x8xf32>
    %784 = tpu.matmul %781, %774, %cst_249 {dimension_numbers = #tpu.dot_dimension_numbers<[1], [0], [0], [1], [0, 0, 1, 1], [], []>} : vector<8x8xf32>, vector<8x8xf32>, vector<8x8xf32> -> vector<8x8xf32>
    %785 = tpu.reciprocal %783 {approx = true} : vector<8x1xf32> -> vector<8x1xf32>
    %786 = vector.broadcast %785 : vector<8x1xf32> to vector<8x8xf32>
    %787 = arith.mulf %784, %786 : vector<8x8xf32>
    %788 = vector.extract_strided_slice %664 {offsets = [8, 24], sizes = [8, 8], strides = [1, 1]} : vector<16x32xf32> to vector<8x8xf32>
    %789 = vector.extract_strided_slice %669 {offsets = [8, 24], sizes = [8, 8], strides = [1, 1]} : vector<16x32xf32> to vector<8x8xf32>
    %790 = vector.extract_strided_slice %674 {offsets = [8, 24], sizes = [8, 8], strides = [1, 1]} : vector<16x32xf32> to vector<8x8xf32>
    %791 = tpu.transpose %789, [1, 0] : vector<8x8xf32> -> vector<8x8xf32>
    %cst_250 = arith.constant dense<0.000000e+00> : vector<8x8xf32>
    %792 = tpu.matmul %788, %791, %cst_250 {dimension_numbers = #tpu.dot_dimension_numbers<[1], [0], [0], [1], [0, 0, 1, 1], [], []>} : vector<8x8xf32>, vector<8x8xf32>, vector<8x8xf32> -> vector<8x8xf32>
    %cst_251 = arith.constant dense<0xFF800000> : vector<8xf32>
    %793 = vector.multi_reduction <maximumf>, %792, %cst_251 [1] : vector<8x8xf32> to vector<8xf32>
    %794 = vector.shape_cast %793 : vector<8xf32> to vector<8x1xf32>
    %795 = vector.broadcast %794 : vector<8x1xf32> to vector<8x8xf32>
    %796 = arith.subf %792, %795 : vector<8x8xf32>
    %797 = math.exp %796 : vector<8x8xf32>
    %cst_252 = arith.constant dense<0.000000e+00> : vector<8xf32>
    %798 = vector.multi_reduction <add>, %797, %cst_252 [1] : vector<8x8xf32> to vector<8xf32>
    %799 = vector.shape_cast %798 : vector<8xf32> to vector<8x1xf32>
    %cst_253 = arith.constant dense<0.000000e+00> : vector<8x8xf32>
    %800 = tpu.matmul %797, %790, %cst_253 {dimension_numbers = #tpu.dot_dimension_numbers<[1], [0], [0], [1], [0, 0, 1, 1], [], []>} : vector<8x8xf32>, vector<8x8xf32>, vector<8x8xf32> -> vector<8x8xf32>
    %801 = tpu.reciprocal %799 {approx = true} : vector<8x1xf32> -> vector<8x1xf32>
    %802 = vector.broadcast %801 : vector<8x1xf32> to vector<8x8xf32>
    %803 = arith.mulf %800, %802 : vector<8x8xf32>
    %804 = tpu.concatenate %755, %771, %787, %803 in 1 : vector<8x8xf32>, vector<8x8xf32>, vector<8x8xf32>, vector<8x8xf32> -> vector<8x32xf32>
    %805 = tpu.concatenate %739, %804 in 0 : vector<8x32xf32>, vector<8x32xf32> -> vector<16x32xf32>
    %806 = arith.truncf %805 : vector<16x32xf32> to vector<16x32xbf16>
    %807 = arith.truncf %658 : vector<32x32xf32> to vector<32x32xbf16>
    %cst_254 = arith.constant dense<0.000000e+00> : vector<16x32xf32>
    %808 = tpu.matmul %806, %807, %cst_254 {dimension_numbers = #tpu.dot_dimension_numbers<[1], [0], [0], [1], [0, 0, 1, 1], [], []>} : vector<16x32xbf16>, vector<32x32xbf16>, vector<16x32xf32> -> vector<16x32xf32>
    %809 = vector.broadcast %659 : vector<1x32xf32> to vector<16x32xf32>
    %810 = arith.addf %808, %809 : vector<16x32xf32>
    %811 = arith.addf %647, %810 : vector<16x32xf32>
    %812 = vector.extract_strided_slice %443 {offsets = [11, 0], sizes = [1, 32], strides = [1, 1]} : vector<15x32xf32> to vector<1x32xf32>
    %813 = vector.extract_strided_slice %443 {offsets = [12, 0], sizes = [1, 32], strides = [1, 1]} : vector<15x32xf32> to vector<1x32xf32>
    %cst_255 = arith.constant dense<0.000000e+00> : vector<16xf32>
    %814 = vector.multi_reduction <add>, %811, %cst_255 [1] : vector<16x32xf32> to vector<16xf32>
    %815 = vector.shape_cast %814 : vector<16xf32> to vector<16x1xf32>
    %cst_256 = arith.constant 3.200000e+01 : f32
    %816 = vector.broadcast %cst_256 : f32 to vector<16x1xf32>
    %817 = arith.divf %815, %816 : vector<16x1xf32>
    %818 = vector.broadcast %817 : vector<16x1xf32> to vector<16x32xf32>
    %819 = arith.subf %811, %818 : vector<16x32xf32>
    %820 = arith.mulf %819, %819 : vector<16x32xf32>
    %cst_257 = arith.constant dense<0.000000e+00> : vector<16xf32>
    %821 = vector.multi_reduction <add>, %820, %cst_257 [1] : vector<16x32xf32> to vector<16xf32>
    %822 = vector.shape_cast %821 : vector<16xf32> to vector<16x1xf32>
    %cst_258 = arith.constant 3.200000e+01 : f32
    %823 = vector.broadcast %cst_258 : f32 to vector<16x1xf32>
    %824 = arith.divf %822, %823 : vector<16x1xf32>
    %825 = vector.broadcast %817 : vector<16x1xf32> to vector<16x32xf32>
    %826 = arith.subf %811, %825 : vector<16x32xf32>
    %cst_259 = arith.constant 9.99999974E-6 : f32
    %827 = vector.broadcast %cst_259 : f32 to vector<16x1xf32>
    %828 = arith.addf %824, %827 : vector<16x1xf32>
    %829 = math.rsqrt %828 : vector<16x1xf32>
    %830 = vector.broadcast %829 : vector<16x1xf32> to vector<16x32xf32>
    %831 = arith.mulf %826, %830 : vector<16x32xf32>
    %832 = vector.broadcast %812 : vector<1x32xf32> to vector<16x32xf32>
    %833 = arith.mulf %831, %832 : vector<16x32xf32>
    %834 = vector.broadcast %813 : vector<1x32xf32> to vector<16x32xf32>
    %835 = arith.addf %833, %834 : vector<16x32xf32>
    %c1_260 = arith.constant 1 : index
    %c0_261 = arith.constant 0 : index
    %c0_262 = arith.constant 0 : index
    %836 = vector.load %arg3[%c1_260, %c0_261, %c0_262] : memref<2x32x64xf32, #tpu.memory_space<vmem>>, vector<1x32x64xf32>
    %837 = vector.shape_cast %836 : vector<1x32x64xf32> to vector<32x64xf32>
    %838 = arith.truncf %835 : vector<16x32xf32> to vector<16x32xbf16>
    %839 = arith.truncf %837 : vector<32x64xf32> to vector<32x64xbf16>
    %cst_263 = arith.constant dense<0.000000e+00> : vector<16x64xf32>
    %840 = tpu.matmul %838, %839, %cst_263 {dimension_numbers = #tpu.dot_dimension_numbers<[1], [0], [0], [1], [0, 0, 1, 1], [], []>} : vector<16x32xbf16>, vector<32x64xbf16>, vector<16x64xf32> -> vector<16x64xf32>
    %c1_264 = arith.constant 1 : index
    %c0_265 = arith.constant 0 : index
    %c0_266 = arith.constant 0 : index
    %841 = vector.load %arg4[%c1_264, %c0_265, %c0_266] : memref<2x1x64xf32, #tpu.memory_space<vmem>>, vector<1x1x64xf32>
    %842 = vector.shape_cast %841 : vector<1x1x64xf32> to vector<1x64xf32>
    %843 = vector.broadcast %842 : vector<1x64xf32> to vector<16x64xf32>
    %844 = arith.addf %840, %843 : vector<16x64xf32>
    %cst_267 = arith.constant 0.000000e+00 : f32
    %845 = vector.broadcast %cst_267 : f32 to vector<16x64xf32>
    %846 = arith.maximumf %844, %845 : vector<16x64xf32>
    %c1_268 = arith.constant 1 : index
    %c0_269 = arith.constant 0 : index
    %c0_270 = arith.constant 0 : index
    %847 = vector.load %arg5[%c1_268, %c0_269, %c0_270] : memref<2x64x32xf32, #tpu.memory_space<vmem>>, vector<1x64x32xf32>
    %848 = vector.shape_cast %847 : vector<1x64x32xf32> to vector<64x32xf32>
    %849 = arith.truncf %846 : vector<16x64xf32> to vector<16x64xbf16>
    %850 = arith.truncf %848 : vector<64x32xf32> to vector<64x32xbf16>
    %cst_271 = arith.constant dense<0.000000e+00> : vector<16x32xf32>
    %851 = tpu.matmul %849, %850, %cst_271 {dimension_numbers = #tpu.dot_dimension_numbers<[1], [0], [0], [1], [0, 0, 1, 1], [], []>} : vector<16x64xbf16>, vector<64x32xbf16>, vector<16x32xf32> -> vector<16x32xf32>
    %852 = vector.extract_strided_slice %443 {offsets = [8, 0], sizes = [1, 32], strides = [1, 1]} : vector<15x32xf32> to vector<1x32xf32>
    %853 = vector.broadcast %852 : vector<1x32xf32> to vector<16x32xf32>
    %854 = arith.addf %851, %853 : vector<16x32xf32>
    %855 = arith.addf %835, %854 : vector<16x32xf32>
    %856 = vector.extract_strided_slice %443 {offsets = [13, 0], sizes = [1, 32], strides = [1, 1]} : vector<15x32xf32> to vector<1x32xf32>
    %857 = vector.extract_strided_slice %443 {offsets = [14, 0], sizes = [1, 32], strides = [1, 1]} : vector<15x32xf32> to vector<1x32xf32>
    %cst_272 = arith.constant dense<0.000000e+00> : vector<16xf32>
    %858 = vector.multi_reduction <add>, %855, %cst_272 [1] : vector<16x32xf32> to vector<16xf32>
    %859 = vector.shape_cast %858 : vector<16xf32> to vector<16x1xf32>
    %cst_273 = arith.constant 3.200000e+01 : f32
    %860 = vector.broadcast %cst_273 : f32 to vector<16x1xf32>
    %861 = arith.divf %859, %860 : vector<16x1xf32>
    %862 = vector.broadcast %861 : vector<16x1xf32> to vector<16x32xf32>
    %863 = arith.subf %855, %862 : vector<16x32xf32>
    %864 = arith.mulf %863, %863 : vector<16x32xf32>
    %cst_274 = arith.constant dense<0.000000e+00> : vector<16xf32>
    %865 = vector.multi_reduction <add>, %864, %cst_274 [1] : vector<16x32xf32> to vector<16xf32>
    %866 = vector.shape_cast %865 : vector<16xf32> to vector<16x1xf32>
    %cst_275 = arith.constant 3.200000e+01 : f32
    %867 = vector.broadcast %cst_275 : f32 to vector<16x1xf32>
    %868 = arith.divf %866, %867 : vector<16x1xf32>
    %869 = vector.broadcast %861 : vector<16x1xf32> to vector<16x32xf32>
    %870 = arith.subf %855, %869 : vector<16x32xf32>
    %cst_276 = arith.constant 9.99999974E-6 : f32
    %871 = vector.broadcast %cst_276 : f32 to vector<16x1xf32>
    %872 = arith.addf %868, %871 : vector<16x1xf32>
    %873 = math.rsqrt %872 : vector<16x1xf32>
    %874 = vector.broadcast %873 : vector<16x1xf32> to vector<16x32xf32>
    %875 = arith.mulf %870, %874 : vector<16x32xf32>
    %876 = vector.broadcast %856 : vector<1x32xf32> to vector<16x32xf32>
    %877 = arith.mulf %875, %876 : vector<16x32xf32>
    %878 = vector.broadcast %857 : vector<1x32xf32> to vector<16x32xf32>
    %879 = arith.addf %877, %878 : vector<16x32xf32>
    %c0_277 = arith.constant 0 : index
    %c0_278 = arith.constant 0 : index
    %880 = vector.load %arg6[%c0_277, %c0_278] : memref<32x128xf32, #tpu.memory_space<vmem>>, vector<32x128xf32>
    %881 = arith.truncf %879 : vector<16x32xf32> to vector<16x32xbf16>
    %882 = arith.truncf %880 : vector<32x128xf32> to vector<32x128xbf16>
    %cst_279 = arith.constant dense<0.000000e+00> : vector<16x128xf32>
    %883 = tpu.matmul %881, %882, %cst_279 {dimension_numbers = #tpu.dot_dimension_numbers<[1], [0], [0], [1], [0, 0, 1, 1], [], []>} : vector<16x32xbf16>, vector<32x128xbf16>, vector<16x128xf32> -> vector<16x128xf32>
    %c0_280 = arith.constant 0 : index
    %c0_281 = arith.constant 0 : index
    %884 = vector.load %arg7[%c0_280, %c0_281] : memref<1x128xf32, #tpu.memory_space<vmem>>, vector<1x128xf32>
    %885 = vector.broadcast %884 : vector<1x128xf32> to vector<16x128xf32>
    %886 = arith.addf %883, %885 : vector<16x128xf32>
    %c0_282 = arith.constant 0 : index
    %c0_283 = arith.constant 0 : index
    %887 = vector.load %arg8[%c0_282, %c0_283] : memref<16x128xf32, #tpu.memory_space<vmem>>, vector<16x128xf32>
    tpu.vector_store %arg8[%c0_282, %c0_283], %886 {strides = array<i32>} : memref<16x128xf32, #tpu.memory_space<vmem>>, vector<16x128xf32>,
    return
  }
}

</mosaic_0001>

<bundles_post_ra>
// kernel: custom_gpt_forward.1
= control target key start
LH: loop header
LB: loop body
LE: loop exit
PB: predicated region body
PF: predicated region fallthrough
CT: control target
= control target key end

     0   :  { %13 = vsyncpa [#allocation3], 0  ;;  %s7993_s27 = smov [#allocation2]   ;;  %s9260_s0 = inlined_call_operand.vmem [shape: f32[16,32], index: 0, kind: input, shape index: {}]   ;;  %s9261_s1 = inlined_call_operand.vmem [shape: f32[2,8,32,32], index: 1, kind: input, shape index: {}]   ;;  %s9262_s2 = inlined_call_operand.vmem [shape: f32[2,15,32], index: 2, kind: input, shape index: {}]   ;;  %s9263_s3 = inlined_call_operand.vmem [shape: f32[2,32,64], index: 3, kind: input, shape index: {}]   ;;  %s9264_s4 = inlined_call_operand.vmem [shape: f32[2,1,64], index: 4, kind: input, shape index: {}]   ;;  %s9265_s5 = inlined_call_operand.vmem [shape: f32[2,64,32], index: 5, kind: input, shape index: {}]   ;;  %s9266_s6 = inlined_call_operand.hbm [shape: f32[32,128], index: 6, kind: input, shape index: {}]   ;;  %s9267_s7 = inlined_call_operand.vmem [shape: f32[1,128], index: 7, kind: input, shape index: {}]   ;;  %s9268_s8 = inlined_call_operand.vmem [shape: f32[16,128], index: 8, kind: output, shape index: {}]  }
   0x1   :  { %s31_s28 = sshll.u32 %s7993_s27, 4  ;;  %s7969_s9 = scalar_lea.hbm %s9266_s6, 512  ;;  %s32_s28 = int_to_ptr.vmem [resolvable:$true] %s31_s28 }
   0x2   :  { %p7970_p0 = scmp.ne.s32.totalorder %s9266_s6, %s7969_s9  ;;  %p7973_p1 = scmp.lt.u32.totalorder %s7969_s9, %s9266_s6 }
   0x4   :  { %p7975_p2 = pnand %p7973_p1, %p7970_p0 }
   0x6   :  { %7978 = shalt.err (!%p7975_p2)
}
   0x7   :  { %s7979_s14 = scalar_lea.vmem %s32_s28, 512  ;;  %p7984_p4 = scmp.lt.s32.totalorder %s32_s28, %s32_s28 }
   0x8   :  { %p7980_p3 = scmp.ne.s32.totalorder %s32_s28, %s7979_s14  ;;  %p7985_p5 = scmp.lt.s32.totalorder %s7979_s14, %s7979_s14 }
   0xa   :  { %p7986_p6 = por %p7985_p5, %p7984_p4 }
   0xc   :  { %p7987_p7 = pnand %p7986_p6, %p7980_p3 }
   0xe   :  { %7990 = shalt.err (!%p7987_p7)
}
   0xf   :  { %s7994_s15 = smov 128   ;;  %s7995_s16 = smov 8  }
  0x10   :  { %37 = dma.hbm_to_vmem [thread:$0]  %s9266_s6, 512, %s32_s28, [#allocation3], %s7994_s15, %s7994_s15, %s7995_s16  }
  0x11   :  { %7991 = dma.done.wait [#allocation3], 512  }
  0x12   :  { %7992 = vsyncadd [#allocation3], 4294966784  ;;  %v7996_v0 = vmov 0.0   ;;  %vm7997_vm0 = vmmov 0   ;;  %v53_v1 = vld [vmem:[%s9261_s1] sm:$0xff]  ;;  %v54_v2 = vld [vmem:[%s9261_s1 + $0x8] sm:$0xff]  ;;  %v46_v22 = vlaneseq }
  0x13   :  { %7249 = vmatprep.subr.bf16.mxu0 %v7996_v0  ;;  %7257 = vmatprep.subr.bf16.mxu1 %v7996_v0  ;;  %v6859_v3 = vld [vmem:[%s9261_s1 + $0x20] sm:$0xff]  ;;  %v73_v4 = vpack.c.bf16 %v54_v2, %v53_v1  ;;  %v6860_v5 = vld [vmem:[%s9261_s1 + $0x28] sm:$0xff]  ;;  %v55_v6 = vld [vmem:[%s9261_s1 + $0x10] sm:$0xff]  ;;  %vm79_vm1 = vcmask 261120   ;;  %vm218_vm2 = vcmask 64512   ;;  %s7998_s25 = smov 120  }
  0x14   :  { %7253 = vmatprep.mubr.msk.bf16.mxu0 %vm7997_vm0, %v7996_v0  ;;  %7261 = vmatprep.mubr.msk.bf16.mxu1 %vm7997_vm0, %v7996_v0  ;;  %v56_v7 = vld [vmem:[%s9261_s1 + $0x18] sm:$0xff]  ;;  %v124_v8 = vpack.c.bf16 %v6860_v5, %v6859_v3  ;;  %v6861_v9 = vld [vmem:[%s9261_s1 + $0x30] sm:$0xff]  ;;  %v8094_v12 = vld [vmem:[%s9260_s0] sm:$0xff]  ;;  %v8136_v23 = vshrl.u32 %v46_v22, 7  ;;  %s7999_s26 = smov 112   ;;  %s8000_s27 = smov 104  }
  0x15   :  { %v6862_v10 = vld [vmem:[%s9261_s1 + $0x38] sm:$0xff]  ;;  %7250 = vmatpush3.bf16.msra.mxu0 %v73_v4  ;;  %v74_v11 = vpack.c.bf16 %v56_v7, %v55_v6  ;;  %v8099_v13 = vld [vmem:[%s9260_s0 + $0x8] sm:$0xff]  ;;  %v6863_v16 = vld [vmem:[%s9261_s1 + $0x40] sm:$0xff]  ;;  %v49_v56 = vand.u32 127, %v46_v22  ;;  %s8001_s14 = smov 16   ;;  %s8002_s15 = smov 24  }
  0x16   :  { %7258 = vmatpush3.bf16.msra.mxu1 %v124_v8  ;;  %7251 = vmatprep.subr.bf16.mxu0 %v7996_v0  ;;  %v125_v14 = vpack.c.bf16 %v6862_v10, %v6861_v9  ;;  %v8105_v15 = vpack.c.bf16 %v8099_v13, %v8094_v12  ;;  %v6864_v17 = vld [vmem:[%s9261_s1 + $0x48] sm:$0xff]  ;;  %v6865_v18 = vld [vmem:[%s9261_s1 + $0x50] sm:$0xff]  ;;  %v6866_v20 = vld [vmem:[%s9261_s1 + $0x58] sm:$0xff]  ;;  %v8139_v24 = vsub.s32 0, %v8136_v23  ;;  %v8147_v26 = vsub.s32 1, %v8136_v23 }
  0x17   :  { %7259 = vmatprep.subr.bf16.mxu1 %v7996_v0  ;;  %v171_v19 = vpack.c.bf16 %v6864_v17, %v6863_v16  ;;  %v172_v21 = vpack.c.bf16 %v6866_v20, %v6865_v18  ;;  %v8144_v25 = vld [vmem:[%s9262_s2] sm:$0xff]  ;;  %v8177_v43 = vsub.s32 2, %v8136_v23  ;;  %vm8207_vm3 = vcmp.le.s32.totalorder %v49_v56, %v8136_v23 }
  0x18   :  { %v78_v27 = vrot.slane %v8144_v25, %v8139_v24  ;;  %v129_v28 = vrot.slane %v8144_v25, %v8147_v26  ;;  %vm892_vm4 = vcmask 130048   ;;  %vm894_vm5 = vcmask 195584  }
  0x19   :  { %7252 = vmatpush3.bf16.msra.mxu0 %v74_v11  ;;  %v176_v45 = vrot.slane %v8144_v25, %v8177_v43  ;;  %vm3338_vm6 = vcmask 523264  }
  0x1a   :  { %7260 = vmatpush3.bf16.msra.mxu1 %v125_v14  ;;  %7265 = vmatprep.subr.bf16.mxu0 %v7996_v0 }
  0x1b   :  { %7273 = vmatprep.subr.mxu1 %v7996_v0 }
  0x1c   :  { %7254 = vmatmul.mubr.msk.bf16.vlgmr.msra.gmra.mrb[0].mxu0 %vm79_vm1, %v8105_v15 }
  0x1d   :  { %7262 = vmatmul.mubr.msk.bf16.vlgmr.msra.gmra.mrb[0].mxu1 %vm79_vm1, %v8105_v15  ;;  %7269 = vmatprep.mubr.msk.bf16.mxu0 %vm7997_vm0, %v7996_v0 }
  0x1e   :  { %7275 = vmatprep.mubr.msk.f32.mxu1 %vm7997_vm0, %v7996_v0  ;;  %7266 = vmatpush3.bf16.msra.mxu0 %v171_v19 }
  0x1f   :  { %7267 = vmatprep.subr.bf16.mxu0 %v7996_v0 }
  0x22   :  { %7268 = vmatpush3.bf16.msra.mxu0 %v172_v21 }
  0x23   :  { %7293 = vmatprep.subr.mxu0 %v7996_v0 }
  0x25   :  { %7270 = vmatmul.mubr.msk.bf16.vlgmr.msra.gmra.mrb[4].mxu0 %vm79_vm1, %v8105_v15 }
  0x26   :  { %7295 = vmatprep.mubr.msk.f32.mxu0 %vm7997_vm0, %v7996_v0 }
  0xef   :  { %v117_v29 = vpop.f32.mrb[0].mxu0 }
  0xf0   :  { %v118_v30 = vadd.f32 %v117_v29, %v78_v27  ;;  %v164_v31 = vpop.f32.mrb[0].mxu1  ;;  %v7255_v32 = vpop.f32.mrb[1].mxu0 }
  0xf1   :  { %v8153_v33 = vadd.f32 %v164_v31, %v129_v28  ;;  %v7263_v34 = vpop.f32.mrb[1].mxu1  ;;  %v120_v35 = vpop.f32.mrb[2].mxu0 }
  0xf2   :  { %v167_v36 = vpop.f32.mrb[2].mxu1  ;;  %380 = vrot.lane.b32.xlu1 %v118_v30, %s7998_s25  ;;  %v7256_v37 = vpop.f32.mrb[3].mxu0  ;;  %v121_v40 = vadd.f32 %v120_v35, %v78_v27 }
  0xf3   :  { %v7264_v38 = vpop.f32.mrb[3].mxu1  ;;  %7274 = vmatpush3.xpose.msk.msra.mxu1 %vm218_vm2, %v8153_v33  ;;  %v168_v39 = vadd.f32 %v167_v36, %v129_v28 }
  0xf4   :  { %7278 = vmatprep.subr.mxu1 %v7996_v0 }
  0xf6   :  { %7276 = vmatmul.mubr.msk.f32.vlgmr.msra.gmra.mrb[4].mxu1 %vm218_vm2, %v118_v30  ;;  %549 = vrot.lane.b32.xlu1 %v8153_v33, %s7999_s26 }
  0xf7   :  { %7280 = vmatprep.mubr.msk.f32.mxu1 %vm7997_vm0, %v7996_v0 }
  0xf8   :  { %v211_v46 = vpop.f32.mrb[4].mxu0 }
  0xf9   :  { %v8184_v48 = vadd.f32 %v211_v46, %v176_v45  ;;  %v7271_v49 = vpop.f32.mrb[5].mxu0 }
  0xfa   :  { %547 = vrot.lane.b32.xlu1 %v118_v30, %s7999_s26  ;;  %v214_v50 = vpop.f32.mrb[6].mxu0 }
  0xfb   :  { %v8188_v51 = vadd.f32 %v214_v50, %v176_v45  ;;  %v7272_v52 = vpop.f32.mrb[7].mxu0  ;;  %7279 = vmatpush3.msra.mxu1 %v8184_v48 }
  0xfc   :  { %7283 = vmatprep.subr.mxu1 %v7996_v0 }
  0xfe   :  { %715 = vrot.lane.b32.xlu1 %v8153_v33, %s8000_s27 }
 0x102   :  { %713 = vrot.lane.b32.xlu1 %v118_v30, %s8000_s27 }
 0x106   :  { %1059 = vrot.lane.b32.xlu1 %v168_v39, %s7998_s25 }
 0x10a   :  { %1057 = vrot.lane.b32.xlu1 %v121_v40, %s7998_s25 }
 0x10e   :  { %1224 = vrot.lane.b32.xlu1 %v121_v40, %s7999_s26 }
 0x112   :  { %1390 = vrot.lane.b32.xlu1 %v121_v40, %s8000_s27 }
 0x164   :  { %v8172_v41 = vpop.permute.xlu1 %380 }
 0x168   :  { %v550_v42 = vpop.permute.xlu1 %549 }
 0x169   :  { %7294 = vmatpush3.xpose.msk.msra.mxu0 %vm218_vm2, %v550_v42 }
 0x16a   :  { %7303 = vmatprep.subr.mxu0 %v7996_v0 }
 0x16c   :  { %v548_v44 = vpop.permute.xlu1 %547 }
 0x16d   :  { %7296 = vmatmul.mubr.msk.f32.vlgmr.msra.gmra.mrb[8].mxu0 %vm218_vm2, %v548_v44 }
 0x16e   :  { %7305 = vmatprep.mubr.msk.f32.mxu0 %vm7997_vm0, %v7996_v0 }
 0x170   :  { %v716_v47 = vpop.permute.xlu1 %715 }
 0x171   :  { %7304 = vmatpush3.xpose.msk.msra.mxu0 %vm218_vm2, %v716_v47 }
 0x172   :  { %7313 = vmatprep.subr.mxu0 %v7996_v0 }
 0x174   :  { %v714_v53 = vpop.permute.xlu1 %713 }
 0x175   :  { %7306 = vmatmul.mubr.msk.f32.vlgmr.msra.gmra.mrb[10].mxu0 %vm218_vm2, %v714_v53 }
 0x176   :  { %7314 = vmatpush3.xpose.msk.msra.mxu0 %vm218_vm2, %v168_v39  ;;  %7315 = vmatprep.mubr.msk.f32.mxu0 %vm7997_vm0, %v7996_v0 }
 0x177   :  { %7323 = vmatprep.subr.mxu0 %v7996_v0 }
 0x178   :  { %v1060_v54 = vpop.permute.xlu1 %1059 }
 0x179   :  { %7316 = vmatmul.mubr.msk.f32.vlgmr.msra.gmra.mrb[12].mxu0 %vm218_vm2, %v121_v40 }
 0x17a   :  { %7324 = vmatpush3.xpose.msk.msra.mxu0 %vm218_vm2, %v1060_v54  ;;  %7325 = vmatprep.mubr.msk.f32.mxu0 %vm7997_vm0, %v7996_v0 }
 0x17b   :  { %7333 = vmatprep.subr.mxu0 %v7996_v0 }
 0x17c   :  { %v1058_v55 = vpop.permute.xlu1 %1057 }
 0x17d   :  { %7326 = vmatmul.mubr.msk.f32.vlgmr.msra.gmra.mrb[14].mxu0 %vm218_vm2, %v1058_v55 }
 0x17e   :  { %7335 = vmatprep.mubr.msk.f32.mxu0 %vm7997_vm0, %v7996_v0 }
 0x180   :  { %v1225_v27 = vpop.permute.xlu1 %1224 }
 0x184   :  { %v1391_v30 = vpop.permute.xlu1 %1390 }
 0x1c9   :  { %v291_v58 = vpop.f32.mrb[4].mxu1 }
 0x1ca   :  { %v295_v59 = vsel %vm8207_vm3, %v291_v58, -1e+30  ;;  %v7277_v60 = vpop.f32.mrb[5].mxu1 }
 0x1cb   :  { %v296_v61 = vsel %vm218_vm2, %v295_v59, -inf }
 0x1cc   :  { %297 = vmax.xlane.f32.xlu0 %v296_v61 }
 0x1e2   :  { %382 = vrot.lane.b32.xlu0 %v8153_v33, %s7998_s25 }
 0x1e6   :  { %1226 = vrot.lane.b32.xlu0 %v168_v39, %s7999_s26 }
 0x1ea   :  { %1392 = vrot.lane.b32.xlu0 %v168_v39, %s8000_s27 }
 0x240   :  { %v621_v62 = vpop.f32.mrb[8].mxu0 }
 0x241   :  { %v8220_v63 = vsel %vm8207_vm3, %v621_v62, -1e+30  ;;  %v7297_v1 = vpop.f32.mrb[9].mxu0 }
 0x242   :  { %v626_v2 = vsel %vm218_vm2, %v8220_v63, -inf }
 0x243   :  { %627 = vmax.xlane.f32.xlu1 %v626_v2 }
 0x248   :  { %v787_v3 = vpop.f32.mrb[10].mxu0 }
 0x249   :  { %v8226_v4 = vsel %vm8207_vm3, %v787_v3, -1e+30  ;;  %v7307_v5 = vpop.f32.mrb[11].mxu0 }
 0x24a   :  { %v792_v6 = vsel %vm218_vm2, %v8226_v4, -inf }
 0x24b   :  { %793 = vmax.xlane.f32.xlu0 %v792_v6 }
 0x24c   :  { %v968_v7 = vpop.f32.mrb[12].mxu0 }
 0x24d   :  { %v8232_v8 = vsel %vm8207_vm3, %v968_v7, -1e+30  ;;  %v7317_v9 = vpop.f32.mrb[13].mxu0 }
 0x24e   :  { %v973_v10 = vsel %vm218_vm2, %v8232_v8, -inf }
 0x24f   :  { %974 = vmax.xlane.f32.xlu0 %v973_v10 }
 0x250   :  { %v1131_v11 = vpop.f32.mrb[14].mxu0 }
 0x251   :  { %v1135_v14 = vsel %vm8207_vm3, %v1131_v11, -1e+30  ;;  %v7327_v16 = vpop.f32.mrb[15].mxu0 }
 0x252   :  { %v1136_v17 = vsel %vm218_vm2, %v1135_v14, -inf }
 0x253   :  { %1137 = vmax.xlane.f32.xlu1 %v1136_v17 }
 0x259   :  { %v298_v18 = vpop.xlane.xlu0 %297 }
 0x25a   :  { %v299_v19 = vsub.f32 %v295_v59, %v298_v18 }
 0x25c   :  { %v300_v20 = vmul.f32 1.442695, %v299_v19 }
 0x25d   :  { %v383_v21 = vpop.permute.xlu0 %382 }
 0x25e   :  { %7815 = vpow2.f32 %v300_v20 }
 0x261   :  { %v1227_v22 = vpop.permute.xlu0 %1226 }
 0x262   :  { %7334 = vmatpush3.xpose.msk.msra.mxu0 %vm218_vm2, %v1227_v22 }
 0x263   :  { %7343 = vmatprep.subr.mxu0 %v7996_v0 }
 0x265   :  { %v1393_v28 = vpop.permute.xlu0 %1392  ;;  %7336 = vmatmul.mubr.msk.f32.vlgmr.msra.gmra.mrb[16].mxu0 %vm218_vm2, %v1225_v27 }
 0x266   :  { %7344 = vmatpush3.xpose.msk.msra.mxu0 %vm218_vm2, %v1393_v28  ;;  %7345 = vmatprep.mubr.msk.f32.mxu0 %vm7997_vm0, %v7996_v0 }
 0x267   :  { %7353 = vmatprep.subr.bf16.mxu0 %v7996_v0 }
 0x268   :  { %v7816_v29 = vpop.eup %7815 }
 0x269   :  { %7281 = vmatmul.mubr.msk.f32.vlgmr.msra.gmra.mrb[6].mxu1 %vm218_vm2, %v7816_v29  ;;  %7346 = vmatmul.mubr.msk.f32.vlgmr.msra.gmra.mrb[18].mxu0 %vm218_vm2, %v1391_v30 }
 0x26a   :  { %7284 = vmatpush3.xpose.msk.msra.mxu1 %vm218_vm2, %v383_v21  ;;  %7285 = vmatprep.mubr.msk.f32.mxu1 %vm7997_vm0, %v7996_v0 }
 0x26b   :  { %7288 = vmatprep.subr.mxu1 %v7996_v0  ;;  %7357 = vmatprep.mubr.msk.bf16.mxu0 %vm7997_vm0, %v7996_v0 }
 0x26d   :  { %7286 = vmatmul.mubr.msk.f32.vlgmr.msra.gmra.mrb[8].mxu1 %vm218_vm2, %v8172_v41 }
 0x26e   :  { %7290 = vmatprep.mubr.msk.f32.mxu1 %vm7997_vm0, %v7996_v0 }
 0x2d0   :  { %v628_v46 = vpop.xlane.xlu1 %627 }
 0x2d1   :  { %v629_v50 = vsub.f32 %v8220_v63, %v628_v46  ;;  %v302_v63 = vsel %vm218_vm2, %v7816_v29, 0.0 }
 0x2d3   :  { %v630_v54 = vmul.f32 1.442695, %v629_v50  ;;  %v6868_v50 = vld [vmem:[%s9261_s1 + $0x68] sm:$0xff] }
 0x2d8   :  { %v794_v53 = vpop.xlane.xlu0 %793 }
 0x2d9   :  { %v795_v55 = vsub.f32 %v8226_v4, %v794_v53 }
 0x2db   :  { %v796_v56 = vmul.f32 1.442695, %v795_v55 }
 0x2dc   :  { %v975_v1 = vpop.xlane.xlu0 %974 }
 0x2dd   :  { %v976_v10 = vsub.f32 %v8232_v8, %v975_v1 }
 0x2df   :  { %v977_v18 = vmul.f32 1.442695, %v976_v10 }
 0x2e0   :  { %v1138_v47 = vpop.xlane.xlu1 %1137 }
 0x2e1   :  { %v1139_v49 = vsub.f32 %v1135_v14, %v1138_v47 }
 0x2e3   :  { %v1140_v52 = vmul.f32 1.442695, %v1139_v49  ;;  %v6867_v49 = vld [vmem:[%s9261_s1 + $0x60] sm:$0xff] }
 0x2e4   :  { %v1572_v53 = vpack.c.bf16 %v6868_v50, %v6867_v49 }
 0x2e5   :  { %7817 = vpow2.f32 %v1140_v52 }
 0x2e6   :  { %7819 = vpow2.f32 %v630_v54  ;;  %7354 = vmatpush3.bf16.msra.mxu0 %v1572_v53 }
 0x2e7   :  { %7821 = vpow2.f32 %v796_v56  ;;  %7355 = vmatprep.subr.bf16.mxu0 %v7996_v0 }
 0x338   :  { %v1298_v31 = vpop.f32.mrb[16].mxu0 }
 0x339   :  { %v1302_v32 = vsel %vm8207_vm3, %v1298_v31, -1e+30  ;;  %v7337_v33 = vpop.f32.mrb[17].mxu0 }
 0x33a   :  { %v1303_v34 = vsel %vm218_vm2, %v1302_v32, -inf }
 0x33b   :  { %1304 = vmax.xlane.f32.xlu0 %v1303_v34 }
 0x33c   :  { %v8261_v35 = vpop.f32.mrb[6].mxu1  ;;  %v1464_v36 = vpop.f32.mrb[18].mxu0 }
 0x33d   :  { %v1468_v37 = vsel %vm8207_vm3, %v1464_v36, -1e+30  ;;  %v7282_v38 = vpop.f32.mrb[7].mxu1  ;;  %v7347_v39 = vpop.f32.mrb[19].mxu0 }
 0x33e   :  { %v1469_v40 = vsel %vm218_vm2, %v1468_v37, -inf }
 0x33f   :  { %1470 = vmax.xlane.f32.xlu1 %v1469_v40 }
 0x340   :  { %v454_v41 = vpop.f32.mrb[8].mxu1 }
 0x341   :  { %v458_v42 = vsel %vm8207_vm3, %v454_v41, -1e+30  ;;  %v7287_v44 = vpop.f32.mrb[9].mxu1 }
 0x342   :  { %v459_v45 = vsel %vm218_vm2, %v458_v42, -inf }
 0x343   :  { %460 = vmax.xlane.f32.xlu0 %v459_v45 }
 0x350   :  { %635 = vrot.lane.b32.xlu1 %v8184_v48, %s7999_s26 }
 0x354   :  { %801 = vrot.lane.b32.xlu1 %v8184_v48, %s8000_s27 }
 0x358   :  { %1312 = vrot.lane.b32.xlu1 %v8188_v51, %s7999_s26 }
 0x359   :  { %469 = vrot.lane.b32.xlu0 %v8184_v48, %s7998_s25  ;;  %v7818_v48 = vpop.eup %7817 }
 0x35a   :  { %v1142_v58 = vsel %vm218_vm2, %v7818_v48, 0.0  ;;  %v7820_v59 = vpop.eup %7819 }
 0x35b   :  { %v632_v60 = vsel %vm218_vm2, %v7820_v59, 0.0  ;;  %v7822_v61 = vpop.eup %7821 }
 0x35c   :  { %v798_v62 = vsel %vm218_vm2, %v7822_v61, 0.0 }
 0x35d   :  { %1146 = vrot.lane.b32.xlu0 %v8188_v51, %s7998_s25 }
 0x361   :  { %1478 = vrot.lane.b32.xlu0 %v8188_v51, %s8000_s27 }
 0x380   :  { %1143 = vadd.xlane.f32.xlu0 %v1142_v58  ;;  %v6870_v58 = vld [vmem:[%s9261_s1 + $0x78] sm:$0xff] }
 0x384   :  { %633 = vadd.xlane.f32.xlu0 %v632_v60 }
 0x388   :  { %799 = vadd.xlane.f32.xlu0 %v798_v62 }
 0x38c   :  { %303 = vadd.xlane.f32.xlu0 %v302_v63 }
 0x3c8   :  { %v1305_v2 = vpop.xlane.xlu0 %1304 }
 0x3c9   :  { %v1306_v3 = vsub.f32 %v1302_v32, %v1305_v2 }
 0x3cb   :  { %v1307_v4 = vmul.f32 1.442695, %v1306_v3 }
 0x3cc   :  { %v1471_v5 = vpop.xlane.xlu1 %1470 }
 0x3cd   :  { %7823 = vpow2.f32 %v1307_v4  ;;  %v1472_v6 = vsub.f32 %v1468_v37, %v1471_v5 }
 0x3cf   :  { %v1473_v11 = vmul.f32 1.442695, %v1472_v6 }
 0x3d0   :  { %v461_v7 = vpop.xlane.xlu0 %460  ;;  %v636_v20 = vpop.permute.xlu1 %635 }
 0x3d1   :  { %v462_v9 = vsub.f32 %v458_v42, %v461_v7 }
 0x3d3   :  { %v463_v14 = vmul.f32 1.442695, %v462_v9 }
 0x3d4   :  { %v470_v16 = vpop.permute.xlu0 %469  ;;  %v802_v27 = vpop.permute.xlu1 %801 }
 0x3d5   :  { %7825 = vpow2.f32 %v463_v14  ;;  %7289 = vmatpush3.msra.mxu1 %v470_v16 }
 0x3d6   :  { %7298 = vmatprep.subr.mxu1 %v7996_v0  ;;  %7827 = vpow2.f32 %v1473_v11 }
 0x3d7   :  { %v7824_v17 = vpop.eup %7823  ;;  %7829 = vpow2.f32 %v977_v18 }
 0x3d8   :  { %v1309_v19 = vsel %vm218_vm2, %v7824_v17, 0.0  ;;  %v1147_v31 = vpop.permute.xlu0 %1146  ;;  %v1313_v32 = vpop.permute.xlu1 %1312 }
 0x3d9   :  { %1310 = vadd.xlane.f32.xlu1 %v1309_v19 }
 0x3df   :  { %v7826_v21 = vpop.eup %7825 }
 0x3e0   :  { %7291 = vmatmul.mubr.msk.f32.vlgmr.msra.gmra.mrb[10].mxu1 %vm218_vm2, %v7826_v21  ;;  %v465_v8 = vsel %vm218_vm2, %v7826_v21, 0.0  ;;  %v7828_v22 = vpop.eup %7827 }
 0x3e1   :  { %7299 = vmatpush3.msra.mxu1 %v636_v20  ;;  %466 = vadd.xlane.f32.xlu1 %v465_v8  ;;  %v1475_v28 = vsel %vm218_vm2, %v7828_v22, 0.0  ;;  %v7830_v29 = vpop.eup %7829 }
 0x3e2   :  { %7300 = vmatprep.mubr.msk.f32.mxu1 %vm7997_vm0, %v7996_v0  ;;  %7308 = vmatprep.subr.mxu1 %v7996_v0  ;;  %v979_v30 = vsel %vm218_vm2, %v7830_v29, 0.0 }
 0x3e4   :  { %7301 = vmatmul.mubr.msk.f32.vlgmr.msra.gmra.mrb[12].mxu1 %vm218_vm2, %v7820_v59 }
 0x3e5   :  { %7309 = vmatpush3.msra.mxu1 %v802_v27  ;;  %1476 = vadd.xlane.f32.xlu1 %v1475_v28 }
 0x3e6   :  { %7310 = vmatprep.mubr.msk.f32.mxu1 %vm7997_vm0, %v7996_v0  ;;  %7318 = vmatprep.subr.mxu1 %v7996_v0 }
 0x3e8   :  { %7311 = vmatmul.mubr.msk.f32.vlgmr.msra.gmra.mrb[14].mxu1 %vm218_vm2, %v7822_v61 }
 0x3e9   :  { %7319 = vmatpush3.msra.mxu1 %v8188_v51  ;;  %980 = vadd.xlane.f32.xlu1 %v979_v30  ;;  %v1479_v51 = vpop.permute.xlu0 %1478 }
 0x3ea   :  { %7320 = vmatprep.mubr.msk.f32.mxu1 %vm7997_vm0, %v7996_v0  ;;  %7328 = vmatprep.subr.mxu1 %v7996_v0 }
 0x3ec   :  { %7321 = vmatmul.mubr.msk.f32.vlgmr.msra.gmra.mrb[16].mxu1 %vm218_vm2, %v7830_v29 }
 0x3ed   :  { %7329 = vmatpush3.msra.mxu1 %v1147_v31  ;;  %7330 = vmatprep.mubr.msk.f32.mxu1 %vm7997_vm0, %v7996_v0 }
 0x3ee   :  { %7338 = vmatprep.subr.mxu1 %v7996_v0 }
 0x3f0   :  { %7331 = vmatmul.mubr.msk.f32.vlgmr.msra.gmra.mrb[18].mxu1 %vm218_vm2, %v7818_v48  ;;  %v6869_v48 = vld [vmem:[%s9261_s1 + $0x70] sm:$0xff] }
 0x3f1   :  { %7339 = vmatpush3.msra.mxu1 %v1313_v32  ;;  %7340 = vmatprep.mubr.msk.f32.mxu1 %vm7997_vm0, %v7996_v0  ;;  %v1573_v62 = vpack.c.bf16 %v6870_v58, %v6869_v48 }
 0x3f2   :  { %7348 = vmatprep.subr.mxu1 %v7996_v0 }
 0x3f3   :  { %7356 = vmatpush3.bf16.msra.mxu0 %v1573_v62 }
 0x3f4   :  { %7341 = vmatmul.mubr.msk.f32.vlgmr.msra.gmra.mrb[20].mxu1 %vm218_vm2, %v7824_v17  ;;  %7369 = vmatprep.subr.bf16.mxu0 %v7996_v0 }
 0x3f5   :  { %7349 = vmatpush3.msra.mxu1 %v1479_v51  ;;  %7350 = vmatprep.mubr.msk.f32.mxu1 %vm7997_vm0, %v7996_v0 }
 0x3f6   :  { %7361 = vmatprep.subr.bf16.mxu1 %v7996_v0 }
 0x3f8   :  { %7351 = vmatmul.mubr.msk.f32.vlgmr.msra.gmra.mrb[22].mxu1 %vm218_vm2, %v7828_v22 }
 0x3f9   :  { %7365 = vmatprep.mubr.msk.bf16.mxu1 %vm7997_vm0, %v7996_v0 }
 0x40d   :  { %v1144_v33 = vpop.xlane.xlu0 %1143 }
 0x40e   :  { %7831 = vrcp.f32 %v1144_v33 }
 0x411   :  { %v634_v39 = vpop.xlane.xlu0 %633 }
 0x415   :  { %v800_v45 = vpop.xlane.xlu0 %799 }
 0x418   :  { %v7832_v54 = vpop.eup %7831 }
 0x419   :  { %v304_v19 = vpop.xlane.xlu0 %303 }
 0x466   :  { %v1311_v34 = vpop.xlane.xlu1 %1310 }
 0x46e   :  { %v467_v38 = vpop.xlane.xlu1 %466 }
 0x46f   :  { %7833 = vrcp.f32 %v467_v38 }
 0x470   :  { %7835 = vrcp.f32 %v634_v39 }
 0x471   :  { %7837 = vrcp.f32 %v1311_v34 }
 0x472   :  { %v1477_v46 = vpop.xlane.xlu1 %1476  ;;  %7839 = vrcp.f32 %v800_v45 }
 0x473   :  { %7841 = vrcp.f32 %v1477_v46 }
 0x474   :  { %7843 = vrcp.f32 %v304_v19 }
 0x476   :  { %v981_v20 = vpop.xlane.xlu1 %980 }
 0x477   :  { %7845 = vrcp.f32 %v981_v20 }
 0x479   :  { %v7834_v55 = vpop.eup %7833 }
 0x47a   :  { %v7836_v63 = vpop.eup %7835 }
 0x47b   :  { %v7838_v2 = vpop.eup %7837 }
 0x47c   :  { %v7840_v7 = vpop.eup %7839 }
 0x47d   :  { %v7842_v10 = vpop.eup %7841 }
 0x47e   :  { %v7844_v8 = vpop.eup %7843 }
 0x47f   :  { %v379_v51 = vmul.f32 %v7844_v8, %v8261_v35  ;;  %v8349_v35 = vsub.s32 3, %v8136_v23 }
 0x481   :  { %v7846_v29 = vpop.eup %7845  ;;  %v1577_v45 = vrot.slane %v8144_v25, %v8349_v35 }
 0x4b3   :  { %v541_v36 = vpop.f32.mrb[10].mxu1 }
 0x4b4   :  { %v7292_v37 = vpop.f32.mrb[11].mxu1  ;;  %v546_v59 = vmul.f32 %v7834_v55, %v541_v36 }
 0x4b7   :  { %v707_v40 = vpop.f32.mrb[12].mxu1 }
 0x4b8   :  { %v7302_v41 = vpop.f32.mrb[13].mxu1  ;;  %v712_v4 = vmul.f32 %v7836_v63, %v707_v40 }
 0x4bb   :  { %v873_v42 = vpop.f32.mrb[14].mxu1 }
 0x4bc   :  { %v7312_v44 = vpop.f32.mrb[15].mxu1  ;;  %v878_v14 = vmul.f32 %v7840_v7, %v873_v42  ;;  %v6906_v7 = vld [vmem:[%s9261_s1 + $0xb8] sm:$0xff] }
 0x4bf   :  { %v1051_v47 = vpop.f32.mrb[16].mxu1 }
 0x4c0   :  { %v7322_v52 = vpop.f32.mrb[17].mxu1  ;;  %v1056_v32 = vmul.f32 %v7846_v29, %v1051_v47 }
 0x4c3   :  { %v1218_v56 = vpop.f32.mrb[18].mxu1 }
 0x4c4   :  { %v1223_v60 = vmul.f32 %v7832_v54, %v1218_v56  ;;  %v7332_v61 = vpop.f32.mrb[19].mxu1 }
 0x4c6   :  { %v7755_v1 = vpack.i.bf16 %v1223_v60, %v546_v59 }
 0x4c7   :  { %v1384_v3 = vpop.f32.mrb[20].mxu1 }
 0x4c8   :  { %v1389_v5 = vmul.f32 %v7838_v2, %v1384_v3  ;;  %v7342_v6 = vpop.f32.mrb[21].mxu1  ;;  %7756 = vrot.lane.b32.xlu0 %v7755_v1, %s7995_s16 }
 0x4c9   :  { %v6905_v6 = vld [vmem:[%s9261_s1 + $0xb0] sm:$0xff] }
 0x4ca   :  { %v7760_v9 = vpack.i.bf16 %v1389_v5, %v712_v4  ;;  %v6904_v4 = vld [vmem:[%s9261_s1 + $0xa8] sm:$0xff] }
 0x4cb   :  { %v1550_v11 = vpop.f32.mrb[22].mxu1 }
 0x4cc   :  { %v1555_v16 = vmul.f32 %v7842_v10, %v1550_v11  ;;  %v7352_v17 = vpop.f32.mrb[23].mxu1  ;;  %7761 = vrot.lane.b32.xlu1 %v7760_v9, %s8001_s14  ;;  %v1735_v9 = vpack.c.bf16 %v6906_v7, %v6905_v6  ;;  %v6899_v10 = vld [vmem:[%s9261_s1 + $0x80] sm:$0xff]  ;;  %v6900_v11 = vld [vmem:[%s9261_s1 + $0x88] sm:$0xff] }
 0x4cd   :  { %v6902_v17 = vld [vmem:[%s9261_s1 + $0x98] sm:$0xff] }
 0x4ce   :  { %v7765_v18 = vpack.i.bf16 %v1555_v16, %v878_v14  ;;  %v1684_v14 = vpack.c.bf16 %v6900_v11, %v6899_v10  ;;  %v6901_v16 = vld [vmem:[%s9261_s1 + $0x90] sm:$0xff] }
 0x4d0   :  { %7766 = vrot.lane.b32.xlu1 %v7765_v18, %s8002_s15  ;;  %7362 = vmatpush3.bf16.msra.mxu1 %v1684_v14  ;;  %v1685_v18 = vpack.c.bf16 %v6902_v17, %v6901_v16 }
 0x4d1   :  { %7363 = vmatprep.subr.bf16.mxu1 %v7996_v0 }
 0x4d4   :  { %7364 = vmatpush3.bf16.msra.mxu1 %v1685_v18 }
 0x4d5   :  { %7377 = vmatprep.subr.bf16.mxu1 %v7996_v0 }
 0x53a   :  { %v7757_v21 = vpop.permute.xlu0 %7756 }
 0x53b   :  { %v7759_v27 = vunpack.i.h.bf16 %v7757_v21  ;;  %v7758_v28 = vunpack.i.l.bf16 %v7757_v21 }
 0x53d   :  { %v891_v34 = vsel %vm218_vm2, %v379_v51, %v7758_v28  ;;  %v1568_v36 = vsel %vm218_vm2, %v1056_v32, %v7759_v27  ;;  %v8394_v28 = vld [vmem:[%s9262_s2 + $0x8] sm:$0x7f] }
 0x53e   :  { %v7762_v22 = vpop.permute.xlu1 %7761 }
 0x53f   :  { %v7764_v30 = vunpack.i.h.bf16 %v7762_v22  ;;  %v7763_v31 = vunpack.i.l.bf16 %v7762_v22 }
 0x541   :  { %v1569_v39 = vsel %vm892_vm4, %v1568_v36, %v7764_v30  ;;  %v893_v40 = vsel %vm892_vm4, %v891_v34, %v7763_v31  ;;  %v1654_v30 = vrot.slane %v8394_v28, %v8147_v26  ;;  %v1660_v34 = vrot.slane %v8394_v28, %v8177_v43 }
 0x542   :  { %v7767_v33 = vpop.permute.xlu1 %7766 }
 0x543   :  { %v7769_v37 = vunpack.i.h.bf16 %v7767_v33  ;;  %v7768_v38 = vunpack.i.l.bf16 %v7767_v33 }
 0x545   :  { %v895_v41 = vsel %vm894_vm5, %v893_v40, %v7768_v38  ;;  %v1570_v42 = vsel %vm894_vm5, %v1569_v39, %v7769_v37  ;;  %v8410_v40 = vsub.s32 5, %v8136_v23 }
 0x546   :  { %v1571_v44 = vpack.c.bf16 %v1570_v42, %v895_v41 }
 0x547   :  { %v1739_v41 = vrot.slane %v8144_v25, %v8410_v40 }
 0x548   :  { %7358 = vmatmul.mubr.msk.bf16.vlgmr.msra.gmra.mrb[20].mxu0 %vm79_vm1, %v1571_v44 }
 0x549   :  { %7373 = vmatprep.mubr.msk.bf16.mxu0 %vm7997_vm0, %v7996_v0 }
 0x61b   :  { %v1615_v46 = vpop.f32.mrb[20].mxu0 }
 0x61c   :  { %v1616_v47 = vadd.f32 %v1615_v46, %v1577_v45  ;;  %v7359_v49 = vpop.f32.mrb[21].mxu0 }
 0x61d   :  { %v1618_v50 = vpop.f32.mrb[22].mxu0 }
 0x61e   :  { %v1619_v52 = vadd.f32 %v1618_v50, %v1577_v45  ;;  %v7360_v53 = vpop.f32.mrb[23].mxu0  ;;  %v1622_v54 = vadd.f32 %v1616_v47, %v8094_v12  ;;  %v6907_v50 = vld [vmem:[%s9261_s1 + $0xc0] sm:$0xff] }
 0x61f   :  { %v6909_v53 = vld [vmem:[%s9261_s1 + $0xd0] sm:$0xff] }
 0x620   :  { %v1624_v55 = vsel %vm79_vm1, %v1622_v54, 0.0  ;;  %v1623_v56 = vadd.f32 %v1619_v52, %v8099_v13  ;;  %v6903_v13 = vld [vmem:[%s9261_s1 + $0xa0] sm:$0xff]  ;;  %v6908_v52 = vld [vmem:[%s9261_s1 + $0xc8] sm:$0xff] }
 0x621   :  { %1625 = vadd.xlane.f32.xlu0 %v1624_v55  ;;  %v1734_v5 = vpack.c.bf16 %v6904_v4, %v6903_v13  ;;  %v6910_v55 = vld [vmem:[%s9261_s1 + $0xd8] sm:$0xff] }
 0x622   :  { %v1627_v48 = vsel %vm79_vm1, %v1623_v56, 0.0 }
 0x623   :  { %1628 = vadd.xlane.f32.xlu1 %v1627_v48  ;;  %7370 = vmatpush3.bf16.msra.mxu0 %v1734_v5  ;;  %v8439_v48 = vsub.s32 4, %v8136_v23 }
 0x624   :  { %7371 = vmatprep.subr.bf16.mxu0 %v7996_v0 }
 0x627   :  { %7372 = vmatpush3.bf16.msra.mxu0 %v1735_v9 }
 0x628   :  { %7385 = vmatprep.subr.mxu0 %v7996_v0 }
 0x62a   :  { %7374 = vmatmul.mubr.msk.bf16.vlgmr.msra.gmra.mrb[24].mxu0 %vm79_vm1, %v8105_v15 }
 0x62b   :  { %7387 = vmatprep.mubr.msk.f32.mxu0 %vm7997_vm0, %v7996_v0 }
 0x6ae   :  { %v1626_v58 = vpop.xlane.xlu0 %1625 }
 0x6af   :  { %v1631_v59 = vmul.f32 0.03125, %v1626_v58  ;;  %v1689_v58 = vrot.slane %v8144_v25, %v8439_v48 }
 0x6b0   :  { %v1629_v60 = vpop.xlane.xlu1 %1628 }
 0x6b1   :  { %v1633_v61 = vsub.f32 %v1622_v54, %v1631_v59  ;;  %v1632_v62 = vmul.f32 0.03125, %v1629_v60  ;;  %v1781_v54 = vpack.c.bf16 %v6908_v52, %v6907_v50 }
 0x6b3   :  { %v1634_v63 = vsub.f32 %v1623_v56, %v1632_v62  ;;  %v1635_v1 = vmul.f32 %v1633_v61, %v1633_v61  ;;  %v1782_v56 = vpack.c.bf16 %v6910_v55, %v6909_v53 }
 0x6b5   :  { %v1637_v2 = vsel %vm79_vm1, %v1635_v1, 0.0  ;;  %v1636_v3 = vmul.f32 %v1634_v63, %v1634_v63 }
 0x6b6   :  { %1638 = vadd.xlane.f32.xlu0 %v1637_v2 }
 0x6b7   :  { %v1640_v12 = vsel %vm79_vm1, %v1636_v3, 0.0  ;;  %v8462_v3 = vsub.s32 6, %v8136_v23 }
 0x6ba   :  { %1641 = vadd.xlane.f32.xlu0 %v1640_v12  ;;  %v1786_v12 = vrot.slane %v8144_v25, %v8462_v3 }
 0x6fd   :  { %v1774_v42 = vpop.f32.mrb[24].mxu0 }
 0x6fe   :  { %v1775_v44 = vadd.f32 %v1774_v42, %v1739_v41  ;;  %v7375_v45 = vpop.f32.mrb[25].mxu0 }
 0x6ff   :  { %v1777_v46 = vpop.f32.mrb[26].mxu0 }
 0x700   :  { %1990 = vrot.lane.b32.xlu1 %v1775_v44, %s7998_s25  ;;  %v8415_v47 = vadd.f32 %v1777_v46, %v1739_v41  ;;  %v7376_v49 = vpop.f32.mrb[27].mxu0  ;;  %7386 = vmatpush3.xpose.msk.msra.mxu0 %vm218_vm2, %v1775_v44 }
 0x701   :  { %7395 = vmatprep.subr.mxu0 %v7996_v0 }
 0x704   :  { %2156 = vrot.lane.b32.xlu1 %v1775_v44, %s7999_s26 }
 0x743   :  { %v1639_v19 = vpop.xlane.xlu0 %1638 }
 0x744   :  { %v1643_v20 = vmul.f32 0.03125, %v1639_v19 }
 0x746   :  { %v1645_v21 = vadd.f32 1e-05, %v1643_v20 }
 0x747   :  { %v1642_v8 = vpop.xlane.xlu0 %1641 }
 0x748   :  { %7847 = vrsqrt.f32 %v1645_v21  ;;  %v1644_v22 = vmul.f32 0.03125, %v1642_v8 }
 0x74a   :  { %v1646_v27 = vadd.f32 1e-05, %v1644_v22 }
 0x74c   :  { %7849 = vrsqrt.f32 %v1646_v27 }
 0x752   :  { %v7848_v29 = vpop.eup %7847 }
 0x753   :  { %v1649_v31 = vmul.f32 %v7848_v29, %v1633_v61 }
 0x755   :  { %v1655_v51 = vmul.f32 %v1654_v30, %v1649_v31 }
 0x756   :  { %v7850_v32 = vpop.eup %7849 }
 0x757   :  { %v1650_v33 = vmul.f32 %v7850_v32, %v1634_v63  ;;  %v8400_v37 = vadd.f32 %v1660_v34, %v1655_v51 }
 0x759   :  { %v1656_v36 = vmul.f32 %v1654_v30, %v1650_v33 }
 0x75b   :  { %v8402_v38 = vadd.f32 %v1660_v34, %v1656_v36 }
 0x75d   :  { %v1683_v39 = vpack.c.bf16 %v8402_v38, %v8400_v37 }
 0x75f   :  { %7366 = vmatmul.mubr.msk.bf16.vlgmr.msra.gmra.mrb[24].mxu1 %vm79_vm1, %v1683_v39 }
 0x760   :  { %7381 = vmatprep.mubr.msk.bf16.mxu1 %vm7997_vm0, %v7996_v0  ;;  %7378 = vmatpush3.bf16.msra.mxu1 %v1781_v54 }
 0x761   :  { %7379 = vmatprep.subr.bf16.mxu1 %v7996_v0 }
 0x764   :  { %7380 = vmatpush3.bf16.msra.mxu1 %v1782_v56 }
 0x765   :  { %7390 = vmatprep.subr.mxu1 %v7996_v0 }
 0x767   :  { %7382 = vmatmul.mubr.msk.bf16.vlgmr.msra.gmra.mrb[28].mxu1 %vm79_vm1, %v8105_v15 }
 0x768   :  { %7392 = vmatprep.mubr.msk.f32.mxu1 %vm7997_vm0, %v7996_v0 }
 0x772   :  { %v1991_v1 = vpop.permute.xlu1 %1990 }
 0x776   :  { %v2157_v13 = vpop.permute.xlu1 %2156 }
 0x832   :  { %v1727_v59 = vpop.f32.mrb[24].mxu1 }
 0x833   :  { %v1728_v60 = vadd.f32 %v1727_v59, %v1689_v58  ;;  %v7367_v61 = vpop.f32.mrb[25].mxu1 }
 0x834   :  { %v1730_v62 = vpop.f32.mrb[26].mxu1 }
 0x835   :  { %1988 = vrot.lane.b32.xlu0 %v1728_v60, %s7998_s25  ;;  %v7368_v63 = vpop.f32.mrb[27].mxu1  ;;  %2154 = vrot.lane.b32.xlu1 %v1728_v60, %s7999_s26  ;;  %v1731_v2 = vadd.f32 %v1730_v62, %v1689_v58 }
 0x836   :  { %7388 = vmatmul.mubr.msk.f32.vlgmr.msra.gmra.mrb[28].mxu0 %vm218_vm2, %v1728_v60 }
 0x837   :  { %7396 = vmatpush3.xpose.msk.msra.mxu0 %vm218_vm2, %v1991_v1  ;;  %7397 = vmatprep.mubr.msk.f32.mxu0 %vm7997_vm0, %v7996_v0 }
 0x838   :  { %7405 = vmatprep.subr.mxu0 %v7996_v0 }
 0x839   :  { %2321 = vrot.lane.b32.xlu0 %v1775_v44, %s8000_s27  ;;  %2319 = vrot.lane.b32.xlu1 %v1728_v60, %s8000_s27 }
 0x83a   :  { %v1821_v4 = vpop.f32.mrb[28].mxu1 }
 0x83b   :  { %v8466_v5 = vadd.f32 %v1821_v4, %v1786_v12  ;;  %v7383_v6 = vpop.f32.mrb[29].mxu1 }
 0x83c   :  { %v1824_v7 = vpop.f32.mrb[30].mxu1 }
 0x83d   :  { %2659 = vrot.lane.b32.xlu1 %v1731_v2, %s7998_s25  ;;  %2661 = vrot.lane.b32.xlu0 %v8415_v47, %s7998_s25  ;;  %v8468_v9 = vadd.f32 %v1824_v7, %v1786_v12  ;;  %v7384_v10 = vpop.f32.mrb[31].mxu1 }
 0x83e   :  { %7391 = vmatpush3.msra.mxu1 %v8466_v5 }
 0x83f   :  { %7400 = vmatprep.subr.mxu1 %v7996_v0 }
 0x841   :  { %2825 = vrot.lane.b32.xlu1 %v1731_v2, %s7999_s26  ;;  %2827 = vrot.lane.b32.xlu0 %v8415_v47, %s7999_s26 }
 0x845   :  { %2990 = vrot.lane.b32.xlu1 %v1731_v2, %s8000_s27  ;;  %2992 = vrot.lane.b32.xlu0 %v8415_v47, %s8000_s27 }
 0x849   :  { %2076 = vrot.lane.b32.xlu1 %v8466_v5, %s7998_s25 }
 0x8a7   :  { %v1989_v11 = vpop.permute.xlu0 %1988  ;;  %v2155_v14 = vpop.permute.xlu1 %2154 }
 0x8a8   :  { %7398 = vmatmul.mubr.msk.f32.vlgmr.msra.gmra.mrb[30].mxu0 %vm218_vm2, %v1989_v11 }
 0x8a9   :  { %7406 = vmatpush3.xpose.msk.msra.mxu0 %vm218_vm2, %v2157_v13  ;;  %7407 = vmatprep.mubr.msk.f32.mxu0 %vm7997_vm0, %v7996_v0 }
 0x8aa   :  { %7415 = vmatprep.subr.mxu0 %v7996_v0 }
 0x8ab   :  { %v2322_v25 = vpop.permute.xlu0 %2321  ;;  %v2320_v16 = vpop.permute.xlu1 %2319 }
 0x8ac   :  { %7408 = vmatmul.mubr.msk.f32.vlgmr.msra.gmra.mrb[32].mxu0 %vm218_vm2, %v2155_v14 }
 0x8ad   :  { %7416 = vmatpush3.xpose.msk.msra.mxu0 %vm218_vm2, %v2322_v25  ;;  %7417 = vmatprep.mubr.msk.f32.mxu0 %vm7997_vm0, %v7996_v0 }
 0x8ae   :  { %7425 = vmatprep.subr.mxu0 %v7996_v0 }
 0x8af   :  { %v2662_v17 = vpop.permute.xlu0 %2661  ;;  %v2660_v18 = vpop.permute.xlu1 %2659 }
 0x8b0   :  { %7418 = vmatmul.mubr.msk.f32.vlgmr.msra.gmra.mrb[34].mxu0 %vm218_vm2, %v2320_v16 }
 0x8b1   :  { %7426 = vmatpush3.xpose.msk.msra.mxu0 %vm218_vm2, %v8415_v47  ;;  %7427 = vmatprep.mubr.msk.f32.mxu0 %vm7997_vm0, %v7996_v0 }
 0x8b2   :  { %7435 = vmatprep.subr.mxu0 %v7996_v0 }
 0x8b3   :  { %v2828_v19 = vpop.permute.xlu0 %2827  ;;  %v2826_v20 = vpop.permute.xlu1 %2825 }
 0x8b4   :  { %7428 = vmatmul.mubr.msk.f32.vlgmr.msra.gmra.mrb[36].mxu0 %vm218_vm2, %v1731_v2 }
 0x8b5   :  { %7436 = vmatpush3.xpose.msk.msra.mxu0 %vm218_vm2, %v2662_v17  ;;  %7437 = vmatprep.mubr.msk.f32.mxu0 %vm7997_vm0, %v7996_v0 }
 0x8b6   :  { %7445 = vmatprep.subr.mxu0 %v7996_v0 }
 0x8b7   :  { %v2993_v21 = vpop.permute.xlu0 %2992  ;;  %v2991_v8 = vpop.permute.xlu1 %2990 }
 0x8b8   :  { %7438 = vmatmul.mubr.msk.f32.vlgmr.msra.gmra.mrb[38].mxu0 %vm218_vm2, %v2660_v18 }
 0x8b9   :  { %7446 = vmatpush3.xpose.msk.msra.mxu0 %vm218_vm2, %v2828_v19  ;;  %7447 = vmatprep.mubr.msk.f32.mxu0 %vm7997_vm0, %v7996_v0 }
 0x8ba   :  { %7455 = vmatprep.subr.mxu0 %v7996_v0 }
 0x8bb   :  { %v2077_v56 = vpop.permute.xlu1 %2076 }
 0x8bc   :  { %7448 = vmatmul.mubr.msk.f32.vlgmr.msra.gmra.mrb[40].mxu0 %vm218_vm2, %v2826_v20 }
 0x8bd   :  { %7456 = vmatpush3.xpose.msk.msra.mxu0 %vm218_vm2, %v2993_v21  ;;  %7457 = vmatprep.mubr.msk.f32.mxu0 %vm7997_vm0, %v7996_v0 }
 0x8be   :  { %7465 = vmatprep.subr.bf16.mxu0 %v7996_v0 }
 0x8c0   :  { %7458 = vmatmul.mubr.msk.f32.vlgmr.msra.gmra.mrb[42].mxu0 %vm218_vm2, %v2991_v8 }
 0x8c1   :  { %7469 = vmatprep.mubr.msk.bf16.mxu0 %vm7997_vm0, %v7996_v0 }
 0x909   :  { %v1900_v22 = vpop.f32.mrb[28].mxu0 }
 0x90a   :  { %v7389_v27 = vpop.f32.mrb[29].mxu0  ;;  %v1904_v29 = vsel %vm218_vm2, %v1900_v22, -inf }
 0x90b   :  { %1905 = vmax.xlane.f32.xlu0 %v1904_v29 }
 0x97b   :  { %v2062_v30 = vpop.f32.mrb[30].mxu0 }
 0x97c   :  { %v7399_v31 = vpop.f32.mrb[31].mxu0  ;;  %v2066_v32 = vsel %vm218_vm2, %v2062_v30, -inf }
 0x97d   :  { %2067 = vmax.xlane.f32.xlu1 %v2066_v32 }
 0x97f   :  { %v2228_v51 = vpop.f32.mrb[32].mxu0 }
 0x980   :  { %v7409_v33 = vpop.f32.mrb[33].mxu0  ;;  %v2232_v34 = vsel %vm218_vm2, %v2228_v51, -inf }
 0x981   :  { %2233 = vmax.xlane.f32.xlu0 %v2232_v34 }
 0x983   :  { %v2393_v36 = vpop.f32.mrb[34].mxu0 }
 0x984   :  { %v7419_v39 = vpop.f32.mrb[35].mxu0  ;;  %v2397_v41 = vsel %vm218_vm2, %v2393_v36, -inf }
 0x985   :  { %2398 = vmax.xlane.f32.xlu0 %v2397_v41 }
 0x987   :  { %v8512_v42 = vpop.f32.mrb[36].mxu0 }
 0x988   :  { %v7429_v44 = vpop.f32.mrb[37].mxu0  ;;  %v2575_v59 = vsel %vm218_vm2, %v8512_v42, -inf }
 0x98b   :  { %v8514_v45 = vpop.f32.mrb[38].mxu0 }
 0x98c   :  { %v7439_v46 = vpop.f32.mrb[39].mxu0  ;;  %v2737_v60 = vsel %vm218_vm2, %v8514_v45, -inf }
 0x98e   :  { %2406 = vrot.lane.b32.xlu1 %v8466_v5, %s8000_s27 }
 0x98f   :  { %v8518_v47 = vpop.f32.mrb[40].mxu0 }
 0x990   :  { %v7449_v49 = vpop.f32.mrb[41].mxu0  ;;  %v2903_v61 = vsel %vm218_vm2, %v8518_v47, -inf }
 0x992   :  { %2747 = vrot.lane.b32.xlu1 %v8468_v9, %s7998_s25 }
 0x993   :  { %v8522_v50 = vpop.f32.mrb[42].mxu0 }
 0x994   :  { %v7459_v52 = vpop.f32.mrb[43].mxu0  ;;  %v3068_v62 = vsel %vm218_vm2, %v8522_v50, -inf }
 0x998   :  { %v1906_v53 = vpop.xlane.xlu0 %1905 }
 0x999   :  { %v1907_v54 = vsub.f32 %v1900_v22, %v1906_v53 }
 0x99b   :  { %v1908_v55 = vmul.f32 1.442695, %v1907_v54  ;;  %2241 = vrot.lane.b32.xlu0 %v8466_v5, %s7999_s26 }
 0x99d   :  { %7851 = vpow2.f32 %v1908_v55 }
 0x9a7   :  { %v8526_v58 = vpop.eup %7851 }
 0x9a8   :  { %7393 = vmatmul.mubr.msk.f32.vlgmr.msra.gmra.mrb[32].mxu1 %vm218_vm2, %v8526_v58 }
 0x9a9   :  { %7401 = vmatpush3.msra.mxu1 %v2077_v56  ;;  %7402 = vmatprep.mubr.msk.f32.mxu1 %vm7997_vm0, %v7996_v0 }
 0x9aa   :  { %7410 = vmatprep.subr.mxu1 %v7996_v0 }
 0x9b6   :  { %2576 = vmax.xlane.f32.xlu1 %v2575_v59 }
 0x9ba   :  { %2738 = vmax.xlane.f32.xlu0 %v2737_v60  ;;  %2904 = vmax.xlane.f32.xlu1 %v2903_v61 }
 0x9be   :  { %3069 = vmax.xlane.f32.xlu0 %v3068_v62 }
 0x9cb   :  { %3077 = vrot.lane.b32.xlu1 %v8468_v9, %s8000_s27 }
 0x9d4   :  { %2912 = vrot.lane.b32.xlu0 %v8468_v9, %s7999_s26 }
 0xa0a   :  { %v2068_v63 = vpop.xlane.xlu1 %2067 }
 0xa0b   :  { %v2069_v1 = vsub.f32 %v2062_v30, %v2068_v63 }
 0xa0d   :  { %v2070_v2 = vmul.f32 1.442695, %v2069_v1 }
 0xa0e   :  { %v2234_v12 = vpop.xlane.xlu0 %2233  ;;  %v2407_v16 = vpop.permute.xlu1 %2406 }
 0xa0f   :  { %7853 = vpow2.f32 %v2070_v2  ;;  %v2235_v13 = vsub.f32 %v2228_v51, %v2234_v12 }
 0xa11   :  { %v2236_v4 = vmul.f32 1.442695, %v2235_v13 }
 0xa12   :  { %v2399_v5 = vpop.xlane.xlu0 %2398  ;;  %v2748_v19 = vpop.permute.xlu1 %2747 }
 0xa13   :  { %7855 = vpow2.f32 %v2236_v4  ;;  %v2400_v6 = vsub.f32 %v2393_v36, %v2399_v5  ;;  %v6911_v5 = vld [vmem:[%s9261_s1 + $0xe0] sm:$0xff] }
 0xa15   :  { %v2401_v7 = vmul.f32 1.442695, %v2400_v6  ;;  %v6912_v6 = vld [vmem:[%s9261_s1 + $0xe8] sm:$0xff] }
 0xa16   :  { %v2242_v11 = vpop.permute.xlu0 %2241 }
 0xa17   :  { %7857 = vpow2.f32 %v2401_v7 }
 0xa19   :  { %v7854_v10 = vpop.eup %7853 }
 0xa1a   :  { %7403 = vmatmul.mubr.msk.f32.vlgmr.msra.gmra.mrb[34].mxu1 %vm218_vm2, %v7854_v10  ;;  %v2072_v14 = vsel %vm218_vm2, %v7854_v10, 0.0  ;;  %v3171_v10 = vpack.c.bf16 %v6912_v6, %v6911_v5 }
 0xa1b   :  { %7411 = vmatpush3.msra.mxu1 %v2242_v11  ;;  %2073 = vadd.xlane.f32.xlu0 %v2072_v14 }
 0xa1c   :  { %7412 = vmatprep.mubr.msk.f32.mxu1 %vm7997_vm0, %v7996_v0  ;;  %7420 = vmatprep.subr.mxu1 %v7996_v0 }
 0xa1d   :  { %v7856_v25 = vpop.eup %7855  ;;  %7466 = vmatpush3.bf16.msra.mxu0 %v3171_v10 }
 0xa1e   :  { %7413 = vmatmul.mubr.msk.f32.vlgmr.msra.gmra.mrb[36].mxu1 %vm218_vm2, %v7856_v25  ;;  %v2238_v17 = vsel %vm218_vm2, %v7856_v25, 0.0  ;;  %7467 = vmatprep.subr.bf16.mxu0 %v7996_v0 }
 0xa1f   :  { %7421 = vmatpush3.msra.mxu1 %v2407_v16  ;;  %2239 = vadd.xlane.f32.xlu0 %v2238_v17  ;;  %v6913_v16 = vld [vmem:[%s9261_s1 + $0xf0] sm:$0xff]  ;;  %v6914_v17 = vld [vmem:[%s9261_s1 + $0xf8] sm:$0xff] }
 0xa20   :  { %7422 = vmatprep.mubr.msk.f32.mxu1 %vm7997_vm0, %v7996_v0  ;;  %7430 = vmatprep.subr.mxu1 %v7996_v0 }
 0xa21   :  { %v7858_v18 = vpop.eup %7857 }
 0xa22   :  { %7423 = vmatmul.mubr.msk.f32.vlgmr.msra.gmra.mrb[38].mxu1 %vm218_vm2, %v7858_v18 }
 0xa23   :  { %7431 = vmatpush3.msra.mxu1 %v8468_v9  ;;  %7432 = vmatprep.mubr.msk.f32.mxu1 %vm7997_vm0, %v7996_v0 }
 0xa24   :  { %7440 = vmatprep.subr.mxu1 %v7996_v0 }
 0xa43   :  { %v2577_v20 = vpop.xlane.xlu1 %2576 }
 0xa44   :  { %v2578_v21 = vsub.f32 %v8512_v42, %v2577_v20 }
 0xa46   :  { %v2579_v8 = vmul.f32 1.442695, %v2578_v21  ;;  %v3172_v21 = vpack.c.bf16 %v6914_v17, %v6913_v16 }
 0xa47   :  { %v2739_v22 = vpop.xlane.xlu0 %2738  ;;  %v2905_v27 = vpop.xlane.xlu1 %2904 }
 0xa48   :  { %7859 = vpow2.f32 %v2579_v8  ;;  %v2740_v29 = vsub.f32 %v8514_v45, %v2739_v22  ;;  %v2906_v30 = vsub.f32 %v8518_v47, %v2905_v27  ;;  %v2403_v47 = vsel %vm218_vm2, %v7858_v18, 0.0  ;;  %7468 = vmatpush3.bf16.msra.mxu0 %v3172_v21 }
 0xa49   :  { %7481 = vmatprep.subr.bf16.mxu0 %v7996_v0 }
 0xa4a   :  { %v2741_v31 = vmul.f32 1.442695, %v2740_v29  ;;  %v2907_v32 = vmul.f32 1.442695, %v2906_v30 }
 0xa4b   :  { %v3070_v9 = vpop.xlane.xlu0 %3069  ;;  %v3078_v46 = vpop.permute.xlu1 %3077 }
 0xa4c   :  { %7861 = vpow2.f32 %v2741_v31  ;;  %v3071_v51 = vsub.f32 %v8522_v50, %v3070_v9  ;;  %v1910_v50 = vsel %vm218_vm2, %v8526_v58, 0.0 }
 0xa4d   :  { %7863 = vpow2.f32 %v2907_v32 }
 0xa4e   :  { %v3072_v33 = vmul.f32 1.442695, %v3071_v51 }
 0xa4f   :  { %v2913_v41 = vpop.permute.xlu0 %2912 }
 0xa50   :  { %7865 = vpow2.f32 %v3072_v33 }
 0xa52   :  { %v7860_v34 = vpop.eup %7859 }
 0xa53   :  { %7433 = vmatmul.mubr.msk.f32.vlgmr.msra.gmra.mrb[40].mxu1 %vm218_vm2, %v7860_v34  ;;  %v2581_v52 = vsel %vm218_vm2, %v7860_v34, 0.0 }
 0xa54   :  { %7441 = vmatpush3.msra.mxu1 %v2748_v19  ;;  %7442 = vmatprep.mubr.msk.f32.mxu1 %vm7997_vm0, %v7996_v0 }
 0xa55   :  { %7450 = vmatprep.subr.mxu1 %v7996_v0 }
 0xa56   :  { %v7862_v36 = vpop.eup %7861 }
 0xa57   :  { %v7864_v39 = vpop.eup %7863  ;;  %7443 = vmatmul.mubr.msk.f32.vlgmr.msra.gmra.mrb[42].mxu1 %vm218_vm2, %v7862_v36  ;;  %v2743_v42 = vsel %vm218_vm2, %v7862_v36, 0.0 }
 0xa58   :  { %7451 = vmatpush3.msra.mxu1 %v2913_v41  ;;  %2744 = vadd.xlane.f32.xlu1 %v2743_v42  ;;  %v2909_v44 = vsel %vm218_vm2, %v7864_v39, 0.0 }
 0xa59   :  { %2910 = vadd.xlane.f32.xlu0 %v2909_v44  ;;  %7452 = vmatprep.mubr.msk.f32.mxu1 %vm7997_vm0, %v7996_v0 }
 0xa5a   :  { %v7866_v45 = vpop.eup %7865  ;;  %7460 = vmatprep.subr.mxu1 %v7996_v0 }
 0xa5b   :  { %7453 = vmatmul.mubr.msk.f32.vlgmr.msra.gmra.mrb[44].mxu1 %vm218_vm2, %v7864_v39  ;;  %v3074_v49 = vsel %vm218_vm2, %v7866_v45, 0.0 }
 0xa5c   :  { %7461 = vmatpush3.msra.mxu1 %v3078_v46  ;;  %2404 = vadd.xlane.f32.xlu1 %v2403_v47 }
 0xa5d   :  { %3075 = vadd.xlane.f32.xlu0 %v3074_v49  ;;  %7462 = vmatprep.mubr.msk.f32.mxu1 %vm7997_vm0, %v7996_v0 }
 0xa5e   :  { %7473 = vmatprep.subr.bf16.mxu1 %v7996_v0 }
 0xa5f   :  { %7463 = vmatmul.mubr.msk.f32.vlgmr.msra.gmra.mrb[46].mxu1 %vm218_vm2, %v7866_v45 }
 0xa60   :  { %1911 = vadd.xlane.f32.xlu1 %v1910_v50  ;;  %7477 = vmatprep.mubr.msk.bf16.mxu1 %vm7997_vm0, %v7996_v0 }
 0xa61   :  { %2582 = vadd.xlane.f32.xlu0 %v2581_v52 }
 0xa7b   :  { %v8586_v53 = vpop.f32.mrb[32].mxu1 }
 0xa7c   :  { %v7394_v54 = vpop.f32.mrb[33].mxu1 }
 0xaa8   :  { %v2074_v63 = vpop.xlane.xlu0 %2073 }
 0xaa9   :  { %7867 = vrcp.f32 %v2074_v63 }
 0xaac   :  { %v2240_v1 = vpop.xlane.xlu0 %2239 }
 0xab3   :  { %v7868_v11 = vpop.eup %7867 }
 0xae5   :  { %v2745_v2 = vpop.xlane.xlu1 %2744 }
 0xae6   :  { %v2911_v58 = vpop.xlane.xlu0 %2910  ;;  %7869 = vrcp.f32 %v2745_v2 }
 0xae7   :  { %7871 = vrcp.f32 %v2240_v1 }
 0xae8   :  { %7873 = vrcp.f32 %v2911_v58 }
 0xae9   :  { %v2405_v12 = vpop.xlane.xlu1 %2404 }
 0xaea   :  { %v3076_v13 = vpop.xlane.xlu0 %3075  ;;  %7875 = vrcp.f32 %v2405_v12 }
 0xaeb   :  { %7877 = vrcp.f32 %v3076_v13 }
 0xaed   :  { %v2148_v55 = vpop.f32.mrb[34].mxu1  ;;  %v1912_v44 = vpop.xlane.xlu1 %1911 }
 0xaee   :  { %v7404_v56 = vpop.f32.mrb[35].mxu1  ;;  %v2153_v18 = vmul.f32 %v7868_v11, %v2148_v55  ;;  %v2583_v45 = vpop.xlane.xlu0 %2582  ;;  %7879 = vrcp.f32 %v1912_v44  ;;  %v3322_v44 = vld [vmem:[%s9265_s5 + $0x8] sm:$0xff] }
 0xaef   :  { %7881 = vrcp.f32 %v2583_v45  ;;  %v3323_v45 = vld [vmem:[%s9265_s5 + $0x10] sm:$0xff] }
 0xaf0   :  { %v7870_v14 = vpop.eup %7869 }
 0xaf1   :  { %v2313_v59 = vpop.f32.mrb[36].mxu1  ;;  %v7872_v8 = vpop.eup %7871 }
 0xaf2   :  { %v7414_v60 = vpop.f32.mrb[37].mxu1  ;;  %v7874_v27 = vpop.eup %7873  ;;  %v2318_v30 = vmul.f32 %v7872_v8, %v2313_v59 }
 0xaf4   :  { %v7876_v9 = vpop.eup %7875 }
 0xaf5   :  { %v2478_v61 = vpop.f32.mrb[38].mxu1  ;;  %v7878_v33 = vpop.eup %7877 }
 0xaf6   :  { %v7424_v62 = vpop.f32.mrb[39].mxu1  ;;  %v2483_v36 = vmul.f32 %v7876_v9, %v2478_v61 }
 0xaf8   :  { %v7880_v47 = vpop.eup %7879 }
 0xaf9   :  { %v7882_v54 = vpop.eup %7881  ;;  %v1987_v60 = vmul.f32 %v7880_v47, %v8586_v53  ;;  %v3175_v53 = vsub.s32 7, %v8136_v23  ;;  %v3324_v47 = vld [vmem:[%s9265_s5 + $0x18] sm:$0xff] }
 0xb26   :  { %v2653_v4 = vpop.f32.mrb[40].mxu1 }
 0xb27   :  { %v7434_v7 = vpop.f32.mrb[41].mxu1  ;;  %v2658_v59 = vmul.f32 %v7882_v54, %v2653_v4  ;;  %v7967_v4 = vld [vmem:[%s9262_s2] sm:$0xff] }
 0xb28   :  { %v3176_v7 = vrot.slane %v7967_v4, %v3175_v53  ;;  %v3325_v4 = vld [vmem:[%s9265_s5 + $0x20] sm:$0xff] }
 0xb2a   :  { %v2819_v25 = vpop.f32.mrb[42].mxu1 }
 0xb2b   :  { %v2824_v19 = vmul.f32 %v7870_v14, %v2819_v25  ;;  %v7444_v20 = vpop.f32.mrb[43].mxu1 }
 0xb2d   :  { %v7770_v22 = vpack.i.bf16 %v2824_v19, %v2153_v18 }
 0xb2e   :  { %v2984_v29 = vpop.f32.mrb[44].mxu1 }
 0xb2f   :  { %v2989_v31 = vmul.f32 %v7874_v27, %v2984_v29  ;;  %v7454_v32 = vpop.f32.mrb[45].mxu1  ;;  %7771 = vrot.lane.b32.xlu1 %v7770_v22, %s7995_s16 }
 0xb31   :  { %v7775_v51 = vpack.i.bf16 %v2989_v31, %v2318_v30 }
 0xb32   :  { %v3149_v34 = vpop.f32.mrb[46].mxu1 }
 0xb33   :  { %v3154_v39 = vmul.f32 %v7878_v33, %v3149_v34  ;;  %v7464_v41 = vpop.f32.mrb[47].mxu1  ;;  %7776 = vrot.lane.b32.xlu0 %v7775_v51, %s8001_s14  ;;  %v3262_v33 = vld [vmem:[%s9263_s3 + $0x8] sm:$0xff] }
 0xb35   :  { %v7780_v42 = vpack.i.bf16 %v3154_v39, %v2483_v36  ;;  %v3263_v36 = vld [vmem:[%s9263_s3 + $0x10] sm:$0xff]  ;;  %v3264_v39 = vld [vmem:[%s9263_s3 + $0x18] sm:$0xff] }
 0xb36   :  { %v3267_v41 = vpack.c.bf16 %v3264_v39, %v3263_v36 }
 0xb37   :  { %7781 = vrot.lane.b32.xlu1 %v7780_v42, %s8002_s15  ;;  %v3321_v42 = vld [vmem:[%s9265_s5] sm:$0xff] }
 0xba1   :  { %v7772_v46 = vpop.permute.xlu1 %7771 }
 0xba2   :  { %v7774_v50 = vunpack.i.h.bf16 %v7772_v46  ;;  %v7773_v52 = vunpack.i.l.bf16 %v7772_v46  ;;  %v3330_v46 = vpack.c.bf16 %v3322_v44, %v3321_v42 }
 0xba4   :  { %v2496_v62 = vsel %vm218_vm2, %v1987_v60, %v7773_v52  ;;  %v3167_v63 = vsel %vm218_vm2, %v2658_v59, %v7774_v50  ;;  %v3252_v60 = vrot.slane %v8394_v28, %v8349_v35 }
 0xba5   :  { %v7777_v49 = vpop.permute.xlu0 %7776 }
 0xba6   :  { %v7779_v55 = vunpack.i.h.bf16 %v7777_v49  ;;  %v7778_v56 = vunpack.i.l.bf16 %v7777_v49  ;;  %v3331_v49 = vpack.c.bf16 %v3324_v47, %v3323_v45 }
 0xba8   :  { %v3168_v58 = vsel %vm892_vm4, %v3167_v63, %v7779_v55  ;;  %v2497_v12 = vsel %vm892_vm4, %v2496_v62, %v7778_v56 }
 0xba9   :  { %v7782_v61 = vpop.permute.xlu1 %7781 }
 0xbaa   :  { %v7784_v1 = vunpack.i.h.bf16 %v7782_v61  ;;  %v7783_v2 = vunpack.i.l.bf16 %v7782_v61 }
 0xbac   :  { %v2498_v13 = vsel %vm894_vm5, %v2497_v12, %v7783_v2  ;;  %v3169_v5 = vsel %vm894_vm5, %v3168_v58, %v7784_v1  ;;  %v3258_v58 = vrot.slane %v8394_v28, %v8439_v48 }
 0xbad   :  { %v3170_v6 = vpack.c.bf16 %v3169_v5, %v2498_v13 }
 0xbaf   :  { %7470 = vmatmul.mubr.msk.bf16.vlgmr.msra.gmra.mrb[44].mxu0 %vm79_vm1, %v3170_v6 }
 0xbb0   :  { %7489 = vmatprep.mubr.msk.bf16.mxu0 %vm7997_vm0, %v7996_v0  ;;  %7482 = vmatpush3.bf16.msra.mxu0 %v3330_v46 }
 0xbb1   :  { %7483 = vmatprep.subr.bf16.mxu0 %v7996_v0 }
 0xbb4   :  { %7484 = vmatpush3.bf16.msra.mxu0 %v3331_v49 }
 0xbb5   :  { %7485 = vmatprep.subr.bf16.mxu0 %v7996_v0 }
 0xc82   :  { %v3214_v10 = vpop.f32.mrb[44].mxu0 }
 0xc83   :  { %v3215_v11 = vadd.f32 %v3214_v10, %v3176_v7  ;;  %v7471_v14 = vpop.f32.mrb[45].mxu0 }
 0xc84   :  { %v3217_v25 = vpop.f32.mrb[46].mxu0  ;;  %v3328_v14 = vld [vmem:[%s9265_s5 + $0x38] sm:$0xff] }
 0xc85   :  { %v3218_v16 = vadd.f32 %v3217_v25, %v3176_v7  ;;  %v7472_v17 = vpop.f32.mrb[47].mxu0  ;;  %v3221_v18 = vadd.f32 %v3215_v11, %v8400_v37  ;;  %v3326_v7 = vld [vmem:[%s9265_s5 + $0x28] sm:$0xff]  ;;  %v3327_v11 = vld [vmem:[%s9265_s5 + $0x30] sm:$0xff] }
 0xc86   :  { %v3332_v10 = vpack.c.bf16 %v3326_v7, %v3325_v4  ;;  %v3333_v25 = vpack.c.bf16 %v3328_v14, %v3327_v11  ;;  %v3414_v14 = vrot.slane %v8394_v28, %v8410_v40 }
 0xc87   :  { %v3223_v19 = vsel %vm79_vm1, %v3221_v18, 0.0  ;;  %v3222_v20 = vadd.f32 %v3218_v16, %v8402_v38  ;;  %v3261_v38 = vld [vmem:[%s9263_s3] sm:$0xff] }
 0xc88   :  { %3224 = vadd.xlane.f32.xlu1 %v3223_v19  ;;  %v3266_v34 = vpack.c.bf16 %v3262_v33, %v3261_v38  ;;  %7486 = vmatpush3.bf16.msra.mxu0 %v3332_v10  ;;  %v6943_v16 = vld [vmem:[%s9264_s4] ss:$0 sm:$0xff] }
 0xc89   :  { %v3226_v21 = vsel %vm79_vm1, %v3222_v20, 0.0  ;;  %7487 = vmatprep.subr.bf16.mxu0 %v7996_v0 }
 0xc8a   :  { %3227 = vadd.xlane.f32.xlu0 %v3226_v21  ;;  %7474 = vmatpush3.bf16.msra.mxu1 %v3266_v34 }
 0xc8b   :  { %7475 = vmatprep.subr.bf16.mxu1 %v7996_v0 }
 0xc8c   :  { %7488 = vmatpush3.bf16.msra.mxu0 %v3333_v25 }
 0xc8d   :  { %7509 = vmatprep.subr.bf16.mxu0 %v7996_v0 }
 0xc8e   :  { %7476 = vmatpush3.bf16.msra.mxu1 %v3267_v41 }
 0xc8f   :  { %7493 = vmatprep.subr.bf16.mxu1 %v7996_v0 }
 0xd15   :  { %v3225_v8 = vpop.xlane.xlu1 %3224 }
 0xd16   :  { %v3229_v22 = vmul.f32 0.03125, %v3225_v8 }
 0xd17   :  { %v3228_v27 = vpop.xlane.xlu0 %3227 }
 0xd18   :  { %v3231_v29 = vsub.f32 %v3221_v18, %v3229_v22  ;;  %v3230_v30 = vmul.f32 0.03125, %v3228_v27 }
 0xd1a   :  { %v3232_v31 = vsub.f32 %v3222_v20, %v3230_v30  ;;  %v3233_v32 = vmul.f32 %v3231_v29, %v3231_v29  ;;  %v3337_v30 = vrot.slane %v8394_v28, %v8139_v24 }
 0xd1c   :  { %v3235_v9 = vsel %vm79_vm1, %v3233_v32, 0.0  ;;  %v3234_v51 = vmul.f32 %v3232_v31, %v3232_v31 }
 0xd1d   :  { %3236 = vadd.xlane.f32.xlu0 %v3235_v9 }
 0xd1e   :  { %v3238_v37 = vsel %vm79_vm1, %v3234_v51, 0.0 }
 0xd1f   :  { %3239 = vadd.xlane.f32.xlu1 %v3238_v37 }
 0xdaa   :  { %v3237_v50 = vpop.xlane.xlu0 %3236 }
 0xdab   :  { %v3241_v52 = vmul.f32 0.03125, %v3237_v50 }
 0xdac   :  { %v3240_v54 = vpop.xlane.xlu1 %3239 }
 0xdad   :  { %v3243_v55 = vadd.f32 1e-05, %v3241_v52  ;;  %v3242_v56 = vmul.f32 0.03125, %v3240_v54 }
 0xdaf   :  { %7883 = vrsqrt.f32 %v3243_v55  ;;  %v3244_v59 = vadd.f32 1e-05, %v3242_v56  ;;  %v6948_v55 = vld [vmem:[%s9261_s1 + $0x100] sm:$0xff]  ;;  %v6949_v56 = vld [vmem:[%s9261_s1 + $0x108] sm:$0xff] }
 0xdb1   :  { %7885 = vrsqrt.f32 %v3244_v59  ;;  %v6956_v59 = vld [vmem:[%s9261_s1 + $0x140] sm:$0xff] }
 0xdb9   :  { %v7884_v61 = vpop.eup %7883 }
 0xdba   :  { %v3247_v62 = vmul.f32 %v7884_v61, %v3231_v29  ;;  %v6957_v61 = vld [vmem:[%s9261_s1 + $0x148] sm:$0xff] }
 0xdbb   :  { %v7886_v63 = vpop.eup %7885 }
 0xdbc   :  { %v3253_v1 = vmul.f32 %v3252_v60, %v3247_v62  ;;  %v3248_v2 = vmul.f32 %v7886_v63, %v3232_v31  ;;  %v3544_v62 = vpack.c.bf16 %v6957_v61, %v6956_v59  ;;  %v6950_v63 = vld [vmem:[%s9261_s1 + $0x110] sm:$0xff] }
 0xdbe   :  { %v3254_v12 = vmul.f32 %v3252_v60, %v3248_v2  ;;  %v3259_v13 = vadd.f32 %v3258_v58, %v3253_v1  ;;  %v3447_v60 = vpack.c.bf16 %v6949_v56, %v6948_v55  ;;  %v6951_v1 = vld [vmem:[%s9261_s1 + $0x118] sm:$0xff]  ;;  %v6958_v2 = vld [vmem:[%s9261_s1 + $0x150] sm:$0xff] }
 0xdc0   :  { %v3260_v5 = vadd.f32 %v3258_v58, %v3254_v12  ;;  %v3448_v58 = vpack.c.bf16 %v6951_v1, %v6950_v63  ;;  %v6959_v12 = vld [vmem:[%s9261_s1 + $0x158] sm:$0xff] }
 0xdc2   :  { %v3265_v6 = vpack.c.bf16 %v3260_v5, %v3259_v13 }
 0xdc4   :  { %7478 = vmatmul.mubr.msk.bf16.vlgmr.msra.gmra.mrb[48].mxu1 %vm79_vm1, %v3265_v6 }
 0xdc5   :  { %7497 = vmatprep.mubr.msk.bf16.mxu1 %vm7997_vm0, %v7996_v0  ;;  %7494 = vmatpush3.bf16.msra.mxu1 %v3447_v60 }
 0xdc6   :  { %7495 = vmatprep.subr.bf16.mxu1 %v7996_v0 }
 0xdc9   :  { %7496 = vmatpush3.bf16.msra.mxu1 %v3448_v58 }
 0xdca   :  { %7501 = vmatprep.subr.bf16.mxu1 %v7996_v0 }
 0xe97   :  { %v3312_v17 = vpop.f32.mrb[48].mxu1 }
 0xe98   :  { %v3313_v18 = vadd.f32 %v6943_v16, %v3312_v17  ;;  %v7479_v19 = vpop.f32.mrb[49].mxu1 }
 0xe99   :  { %v3315_v20 = vpop.f32.mrb[50].mxu1 }
 0xe9a   :  { %v3316_v21 = vadd.f32 %v6943_v16, %v3315_v20  ;;  %v7480_v8 = vpop.f32.mrb[51].mxu1  ;;  %v3319_v22 = vmax.f32 %v3313_v18, 0.0  ;;  %v3420_v20 = vrot.slane %v8394_v28, %v8462_v3  ;;  %v6954_v28 = vld [vmem:[%s9261_s1 + $0x130] sm:$0xff] }
 0xe9b   :  { %v6952_v8 = vld [vmem:[%s9261_s1 + $0x120] sm:$0xff] }
 0xe9c   :  { %v3320_v27 = vmax.f32 %v3316_v21, 0.0 }
 0xe9e   :  { %v3329_v29 = vpack.c.bf16 %v3320_v27, %v3319_v22  ;;  %v6953_v22 = vld [vmem:[%s9261_s1 + $0x128] sm:$0xff] }
 0xea0   :  { %7490 = vmatmul.mubr.msk.bf16.vlgmr.msra.gmra.mrb[48].mxu0 %vm3338_vm6, %v3329_v29 }
 0xea1   :  { %7513 = vmatprep.mubr.msk.bf16.mxu0 %vm7997_vm0, %v7996_v0  ;;  %7510 = vmatpush3.bf16.msra.mxu0 %v3544_v62 }
 0xea2   :  { %7511 = vmatprep.subr.bf16.mxu0 %v7996_v0 }
 0xf73   :  { %v3376_v31 = vpop.f32.mrb[48].mxu0 }
 0xf74   :  { %v3377_v32 = vadd.f32 %v3376_v31, %v3337_v30  ;;  %v7491_v9 = vpop.f32.mrb[49].mxu0 }
 0xf75   :  { %v3379_v51 = vpop.f32.mrb[50].mxu0 }
 0xf76   :  { %v3380_v37 = vadd.f32 %v3379_v51, %v3337_v30  ;;  %v7492_v38 = vpop.f32.mrb[51].mxu0  ;;  %v3383_v33 = vadd.f32 %v3377_v32, %v3259_v13  ;;  %v3545_v13 = vpack.c.bf16 %v6959_v12, %v6958_v2  ;;  %v3497_v30 = vpack.c.bf16 %v6953_v22, %v6952_v8  ;;  %v6955_v32 = vld [vmem:[%s9261_s1 + $0x138] sm:$0xff]  ;;  %v8752_v51 = vld [vmem:[%s9262_s2 + $0x10] sm:$0xff] }
 0xf77   :  { %v3498_v9 = vpack.c.bf16 %v6955_v32, %v6954_v28 }
 0xf78   :  { %v3385_v34 = vsel %vm79_vm1, %v3383_v33, 0.0  ;;  %v3384_v36 = vadd.f32 %v3380_v37, %v3260_v5  ;;  %7512 = vmatpush3.bf16.msra.mxu0 %v3545_v13  ;;  %v3452_v37 = vrot.slane %v8752_v51, %v8139_v24 }
 0xf79   :  { %3386 = vadd.xlane.f32.xlu0 %v3385_v34  ;;  %7527 = vmatprep.subr.mxu0 %v7996_v0 }
 0xf7a   :  { %v3388_v39 = vsel %vm79_vm1, %v3384_v36, 0.0 }
 0xf7b   :  { %3389 = vadd.xlane.f32.xlu1 %v3388_v39 }
0x1006   :  { %v3387_v41 = vpop.xlane.xlu0 %3386 }
0x1007   :  { %v3391_v42 = vmul.f32 0.03125, %v3387_v41 }
0x1008   :  { %v3390_v44 = vpop.xlane.xlu1 %3389 }
0x1009   :  { %v3393_v45 = vsub.f32 %v3383_v33, %v3391_v42  ;;  %v3392_v46 = vmul.f32 0.03125, %v3390_v44 }
0x100b   :  { %v3394_v47 = vsub.f32 %v3384_v36, %v3392_v46  ;;  %v3395_v49 = vmul.f32 %v3393_v45, %v3393_v45  ;;  %v3549_v36 = vrot.slane %v8752_v51, %v8177_v43 }
0x100d   :  { %v3397_v50 = vsel %vm79_vm1, %v3395_v49, 0.0  ;;  %v3396_v52 = vmul.f32 %v3394_v47, %v3394_v47  ;;  %v3502_v49 = vrot.slane %v8752_v51, %v8147_v26 }
0x100e   :  { %3398 = vadd.xlane.f32.xlu0 %v3397_v50 }
0x100f   :  { %v3400_v54 = vsel %vm79_vm1, %v3396_v52, 0.0 }
0x1010   :  { %3401 = vadd.xlane.f32.xlu1 %v3400_v54 }
0x109b   :  { %v3399_v5 = vpop.xlane.xlu0 %3398 }
0x109c   :  { %v3403_v6 = vmul.f32 0.03125, %v3399_v5 }
0x109d   :  { %v3402_v4 = vpop.xlane.xlu1 %3401 }
0x109e   :  { %v3405_v7 = vadd.f32 1e-05, %v3403_v6  ;;  %v3404_v10 = vmul.f32 0.03125, %v3402_v4 }
0x10a0   :  { %7887 = vrsqrt.f32 %v3405_v7  ;;  %v3406_v11 = vadd.f32 1e-05, %v3404_v10 }
0x10a2   :  { %7889 = vrsqrt.f32 %v3406_v11 }
0x10aa   :  { %v7888_v25 = vpop.eup %7887 }
0x10ab   :  { %v3409_v16 = vmul.f32 %v7888_v25, %v3393_v45 }
0x10ac   :  { %v7890_v17 = vpop.eup %7889 }
0x10ad   :  { %v3415_v18 = vmul.f32 %v3414_v14, %v3409_v16  ;;  %v3410_v19 = vmul.f32 %v7890_v17, %v3394_v47 }
0x10af   :  { %v3416_v21 = vmul.f32 %v3414_v14, %v3410_v19  ;;  %v8726_v27 = vadd.f32 %v3420_v20, %v3415_v18 }
0x10b1   :  { %v8728_v29 = vadd.f32 %v3420_v20, %v3416_v21 }
0x10b3   :  { %v3446_v31 = vpack.c.bf16 %v8728_v29, %v8726_v27 }
0x10b5   :  { %7498 = vmatmul.mubr.msk.bf16.vlgmr.msra.gmra.mrb[52].mxu1 %vm79_vm1, %v3446_v31  ;;  %7514 = vmatmul.mubr.msk.bf16.vlgmr.msra.gmra.mrb[52].mxu0 %vm79_vm1, %v3446_v31 }
0x10b6   :  { %7502 = vmatpush3.bf16.msra.mxu1 %v3497_v30  ;;  %7505 = vmatprep.mubr.msk.bf16.mxu1 %vm7997_vm0, %v7996_v0 }
0x10b7   :  { %7503 = vmatprep.subr.bf16.mxu1 %v7996_v0  ;;  %7529 = vmatprep.mubr.msk.f32.mxu0 %vm7997_vm0, %v7996_v0 }
0x10ba   :  { %7504 = vmatpush3.bf16.msra.mxu1 %v3498_v9 }
0x10bb   :  { %7517 = vmatprep.subr.mxu1 %v7996_v0 }
0x10bd   :  { %7506 = vmatmul.mubr.msk.bf16.vlgmr.msra.gmra.mrb[56].mxu1 %vm79_vm1, %v3446_v31 }
0x10be   :  { %7519 = vmatprep.mubr.msk.f32.mxu1 %vm7997_vm0, %v7996_v0 }
0x1188   :  { %v3490_v38 = vpop.f32.mrb[52].mxu1  ;;  %v3584_v33 = vpop.f32.mrb[52].mxu0 }
0x1189   :  { %v3491_v34 = vadd.f32 %v3490_v38, %v3452_v37  ;;  %v7499_v39 = vpop.f32.mrb[53].mxu1  ;;  %v7515_v41 = vpop.f32.mrb[53].mxu0  ;;  %v8767_v59 = vadd.f32 %v3584_v33, %v3549_v36 }
0x118a   :  { %v3493_v42 = vpop.f32.mrb[54].mxu1  ;;  %v3587_v44 = vpop.f32.mrb[54].mxu0 }
0x118b   :  { %v8758_v45 = vadd.f32 %v3587_v44, %v3549_v36  ;;  %3752 = vrot.lane.b32.xlu1 %v3491_v34, %s7998_s25  ;;  %v7500_v46 = vpop.f32.mrb[55].mxu1  ;;  %v7516_v47 = vpop.f32.mrb[55].mxu0  ;;  %v3494_v61 = vadd.f32 %v3493_v42, %v3452_v37 }
0x1190   :  { %v3537_v50 = vpop.f32.mrb[56].mxu1 }
0x1191   :  { %v3538_v52 = vadd.f32 %v3537_v50, %v3502_v49  ;;  %v7507_v54 = vpop.f32.mrb[57].mxu1 }
0x1192   :  { %v3540_v55 = vpop.f32.mrb[58].mxu1 }
0x1193   :  { %3921 = vrot.lane.b32.xlu1 %v3538_v52, %s7999_s26  ;;  %3754 = vrot.lane.b32.xlu0 %v3538_v52, %s7998_s25  ;;  %v7508_v56 = vpop.f32.mrb[59].mxu1  ;;  %v3541_v60 = vadd.f32 %v3540_v55, %v3502_v49 }
0x1194   :  { %7518 = vmatpush3.xpose.msk.msra.mxu1 %vm218_vm2, %v3538_v52 }
0x1195   :  { %7522 = vmatprep.subr.mxu1 %v7996_v0 }
0x1197   :  { %7520 = vmatmul.mubr.msk.f32.vlgmr.msra.gmra.mrb[60].mxu1 %vm218_vm2, %v3491_v34  ;;  %4087 = vrot.lane.b32.xlu1 %v3538_v52, %s8000_s27 }
0x1198   :  { %3919 = vrot.lane.b32.xlu0 %v3491_v34, %s7999_s26  ;;  %7523 = vmatpush3.msra.mxu1 %v8767_v59 }
0x1199   :  { %7524 = vmatprep.mubr.msk.f32.mxu1 %vm7997_vm0, %v7996_v0  ;;  %7532 = vmatprep.subr.mxu1 %v7996_v0 }
0x119b   :  { %4429 = vrot.lane.b32.xlu1 %v3541_v60, %s7998_s25 }
0x119c   :  { %4085 = vrot.lane.b32.xlu0 %v3491_v34, %s8000_s27 }
0x119f   :  { %4596 = vrot.lane.b32.xlu1 %v3541_v60, %s7999_s26 }
0x11a0   :  { %4427 = vrot.lane.b32.xlu0 %v3494_v61, %s7998_s25 }
0x11a3   :  { %4762 = vrot.lane.b32.xlu1 %v3541_v60, %s8000_s27 }
0x11a4   :  { %4594 = vrot.lane.b32.xlu0 %v3494_v61, %s7999_s26 }
0x11a8   :  { %4760 = vrot.lane.b32.xlu0 %v3494_v61, %s8000_s27 }
0x11fd   :  { %v3753_v62 = vpop.permute.xlu1 %3752 }
0x1205   :  { %v3922_v63 = vpop.permute.xlu1 %3921  ;;  %v3755_v1 = vpop.permute.xlu0 %3754 }
0x1206   :  { %7528 = vmatpush3.xpose.msk.msra.mxu0 %vm218_vm2, %v3755_v1 }
0x1207   :  { %7537 = vmatprep.subr.mxu0 %v7996_v0 }
0x1209   :  { %7530 = vmatmul.mubr.msk.f32.vlgmr.msra.gmra.mrb[56].mxu0 %vm218_vm2, %v3753_v62  ;;  %v4088_v58 = vpop.permute.xlu1 %4087 }
0x120a   :  { %v3920_v2 = vpop.permute.xlu0 %3919  ;;  %7538 = vmatpush3.xpose.msk.msra.mxu0 %vm218_vm2, %v3922_v63  ;;  %7539 = vmatprep.mubr.msk.f32.mxu0 %vm7997_vm0, %v7996_v0 }
0x120b   :  { %7547 = vmatprep.subr.mxu0 %v7996_v0 }
0x120d   :  { %7540 = vmatmul.mubr.msk.f32.vlgmr.msra.gmra.mrb[58].mxu0 %vm218_vm2, %v3920_v2  ;;  %v4430_v13 = vpop.permute.xlu1 %4429 }
0x120e   :  { %v4086_v12 = vpop.permute.xlu0 %4085  ;;  %7548 = vmatpush3.xpose.msk.msra.mxu0 %vm218_vm2, %v4088_v58  ;;  %7549 = vmatprep.mubr.msk.f32.mxu0 %vm7997_vm0, %v7996_v0 }
0x120f   :  { %7557 = vmatprep.subr.mxu0 %v7996_v0 }
0x1211   :  { %7550 = vmatmul.mubr.msk.f32.vlgmr.msra.gmra.mrb[60].mxu0 %vm218_vm2, %v4086_v12  ;;  %v4597_v6 = vpop.permute.xlu1 %4596 }
0x1212   :  { %7558 = vmatpush3.xpose.msk.msra.mxu0 %vm218_vm2, %v3541_v60  ;;  %7559 = vmatprep.mubr.msk.f32.mxu0 %vm7997_vm0, %v7996_v0  ;;  %v4428_v5 = vpop.permute.xlu0 %4427 }
0x1213   :  { %7567 = vmatprep.subr.mxu0 %v7996_v0 }
0x1215   :  { %7560 = vmatmul.mubr.msk.f32.vlgmr.msra.gmra.mrb[62].mxu0 %vm218_vm2, %v3494_v61  ;;  %v4763_v7 = vpop.permute.xlu1 %4762 }
0x1216   :  { %7568 = vmatpush3.xpose.msk.msra.mxu0 %vm218_vm2, %v4430_v13  ;;  %7569 = vmatprep.mubr.msk.f32.mxu0 %vm7997_vm0, %v7996_v0  ;;  %v4595_v4 = vpop.permute.xlu0 %4594 }
0x1217   :  { %7577 = vmatprep.subr.mxu0 %v7996_v0 }
0x1219   :  { %7570 = vmatmul.mubr.msk.f32.vlgmr.msra.gmra.mrb[64].mxu0 %vm218_vm2, %v4428_v5 }
0x121a   :  { %7578 = vmatpush3.xpose.msk.msra.mxu0 %vm218_vm2, %v4597_v6  ;;  %7579 = vmatprep.mubr.msk.f32.mxu0 %vm7997_vm0, %v7996_v0  ;;  %v4761_v10 = vpop.permute.xlu0 %4760 }
0x121b   :  { %7587 = vmatprep.subr.mxu0 %v7996_v0 }
0x121d   :  { %7580 = vmatmul.mubr.msk.f32.vlgmr.msra.gmra.mrb[66].mxu0 %vm218_vm2, %v4595_v4 }
0x121e   :  { %7588 = vmatpush3.xpose.msk.msra.mxu0 %vm218_vm2, %v4763_v7  ;;  %7589 = vmatprep.mubr.msk.f32.mxu0 %vm7997_vm0, %v7996_v0 }
0x121f   :  { %7597 = vmatprep.subr.bf16.mxu0 %v7996_v0 }
0x1221   :  { %7590 = vmatmul.mubr.msk.f32.vlgmr.msra.gmra.mrb[68].mxu0 %vm218_vm2, %v4761_v10 }
0x1222   :  { %7601 = vmatprep.mubr.msk.bf16.mxu0 %vm7997_vm0, %v7996_v0 }
0x126a   :  { %v3663_v11 = vpop.f32.mrb[60].mxu1 }
0x126b   :  { %v3667_v14 = vsel %vm8207_vm3, %v3663_v11, -1e+30  ;;  %v7521_v25 = vpop.f32.mrb[61].mxu1 }
0x126c   :  { %v3668_v16 = vsel %vm218_vm2, %v3667_v14, -inf }
0x126d   :  { %3669 = vmax.xlane.f32.xlu1 %v3668_v16 }
0x127e   :  { %4007 = vrot.lane.b32.xlu1 %v8767_v59, %s7999_s26 }
0x1282   :  { %4173 = vrot.lane.b32.xlu1 %v8767_v59, %s8000_s27 }
0x12dc   :  { %v3826_v17 = vpop.f32.mrb[56].mxu0 }
0x12dd   :  { %v3830_v18 = vsel %vm8207_vm3, %v3826_v17, -1e+30  ;;  %v7531_v19 = vpop.f32.mrb[57].mxu0 }
0x12de   :  { %v3831_v20 = vsel %vm218_vm2, %v3830_v18, -inf }
0x12df   :  { %3832 = vmax.xlane.f32.xlu0 %v3831_v20 }
0x12e0   :  { %v3993_v21 = vpop.f32.mrb[58].mxu0 }
0x12e1   :  { %v3997_v8 = vsel %vm8207_vm3, %v3993_v21, -1e+30  ;;  %v7541_v22 = vpop.f32.mrb[59].mxu0 }
0x12e2   :  { %v3998_v30 = vsel %vm218_vm2, %v3997_v8, -inf }
0x12e3   :  { %3999 = vmax.xlane.f32.xlu0 %v3998_v30 }
0x12e4   :  { %v4159_v31 = vpop.f32.mrb[60].mxu0 }
0x12e5   :  { %v4163_v28 = vsel %vm8207_vm3, %v4159_v31, -1e+30  ;;  %v7551_v32 = vpop.f32.mrb[61].mxu0 }
0x12e6   :  { %v4164_v9 = vsel %vm218_vm2, %v4163_v28, -inf }
0x12e7   :  { %4165 = vmax.xlane.f32.xlu1 %v4164_v9 }
0x12e8   :  { %v4338_v37 = vpop.f32.mrb[62].mxu0 }
0x12e9   :  { %v7561_v38 = vpop.f32.mrb[63].mxu0  ;;  %v4342_v56 = vsel %vm8207_vm3, %v4338_v37, -1e+30 }
0x12ea   :  { %v4343_v60 = vsel %vm218_vm2, %v4342_v56, -inf }
0x12ec   :  { %v4501_v33 = vpop.f32.mrb[64].mxu0 }
0x12ed   :  { %v4505_v34 = vsel %vm8207_vm3, %v4501_v33, -1e+30  ;;  %v7571_v36 = vpop.f32.mrb[65].mxu0 }
0x12ee   :  { %v4506_v39 = vsel %vm218_vm2, %v4505_v34, -inf }
0x12ef   :  { %4507 = vmax.xlane.f32.xlu1 %v4506_v39 }
0x12f0   :  { %v4668_v41 = vpop.f32.mrb[66].mxu0 }
0x12f1   :  { %v7581_v42 = vpop.f32.mrb[67].mxu0 }
0x12f4   :  { %v4834_v44 = vpop.f32.mrb[68].mxu0 }
0x12f5   :  { %v8839_v46 = vsel %vm8207_vm3, %v4834_v44, -1e+30  ;;  %v7591_v47 = vpop.f32.mrb[69].mxu0 }
0x12f6   :  { %v4839_v49 = vsel %vm218_vm2, %v8839_v46, -inf }
0x12f7   :  { %4840 = vmax.xlane.f32.xlu1 %v4839_v49 }
0x12f9   :  { %3841 = vrot.lane.b32.xlu0 %v8767_v59, %s7998_s25  ;;  %v4672_v59 = vsel %vm8207_vm3, %v4668_v41, -1e+30 }
0x12fa   :  { %v3670_v50 = vpop.xlane.xlu1 %3669  ;;  %v4673_v61 = vsel %vm218_vm2, %v4672_v59, -inf }
0x12fb   :  { %v3671_v52 = vsub.f32 %v3667_v14, %v3670_v50 }
0x12fd   :  { %v3672_v54 = vmul.f32 1.442695, %v3671_v52 }
0x12fe   :  { %v4008_v62 = vpop.permute.xlu1 %4007 }
0x12ff   :  { %7891 = vpow2.f32 %v3672_v54 }
0x1302   :  { %v4174_v58 = vpop.permute.xlu1 %4173 }
0x1308   :  { %4682 = vrot.lane.b32.xlu1 %v8758_v45, %s7999_s26 }
0x1309   :  { %v7892_v55 = vpop.eup %7891 }
0x130a   :  { %7525 = vmatmul.mubr.msk.f32.vlgmr.msra.gmra.mrb[62].mxu1 %vm218_vm2, %v7892_v55  ;;  %v3674_v22 = vsel %vm218_vm2, %v7892_v55, 0.0 }
0x130b   :  { %7534 = vmatprep.mubr.msk.f32.mxu1 %vm7997_vm0, %v7996_v0 }
0x1318   :  { %4344 = vmax.xlane.f32.xlu0 %v4343_v60 }
0x131c   :  { %4674 = vmax.xlane.f32.xlu0 %v4673_v61 }
0x1332   :  { %4516 = vrot.lane.b32.xlu0 %v8758_v45, %s7998_s25 }
0x1336   :  { %4848 = vrot.lane.b32.xlu0 %v8758_v45, %s8000_s27 }
0x136c   :  { %v3833_v63 = vpop.xlane.xlu0 %3832 }
0x136d   :  { %v3834_v1 = vsub.f32 %v3830_v18, %v3833_v63 }
0x136f   :  { %v3835_v2 = vmul.f32 1.442695, %v3834_v1 }
0x1370   :  { %v4000_v12 = vpop.xlane.xlu0 %3999 }
0x1371   :  { %7893 = vpow2.f32 %v3835_v2  ;;  %v4001_v13 = vsub.f32 %v3997_v8, %v4000_v12 }
0x1373   :  { %v4002_v57 = vmul.f32 1.442695, %v4001_v13 }
0x1374   :  { %v3842_v5 = vpop.permute.xlu0 %3841  ;;  %v4166_v6 = vpop.xlane.xlu1 %4165 }
0x1375   :  { %7895 = vpow2.f32 %v4002_v57  ;;  %v4167_v4 = vsub.f32 %v4163_v28, %v4166_v6  ;;  %7533 = vmatpush3.msra.mxu1 %v3842_v5  ;;  %v6960_v57 = vld [vmem:[%s9261_s1 + $0x160] sm:$0xff]  ;;  %v6961_v5 = vld [vmem:[%s9261_s1 + $0x168] sm:$0xff] }
0x1376   :  { %7542 = vmatprep.subr.mxu1 %v7996_v0 }
0x1377   :  { %v4168_v7 = vmul.f32 1.442695, %v4167_v4  ;;  %v4942_v4 = vpack.c.bf16 %v6961_v5, %v6960_v57 }
0x1379   :  { %7897 = vpow2.f32 %v4168_v7  ;;  %7598 = vmatpush3.bf16.msra.mxu0 %v4942_v4 }
0x137a   :  { %7599 = vmatprep.subr.bf16.mxu0 %v7996_v0 }
0x137b   :  { %v7894_v10 = vpop.eup %7893 }
0x137c   :  { %7535 = vmatmul.mubr.msk.f32.vlgmr.msra.gmra.mrb[64].mxu1 %vm218_vm2, %v7894_v10  ;;  %v4508_v11 = vpop.xlane.xlu1 %4507  ;;  %v3837_v14 = vsel %vm218_vm2, %v7894_v10, 0.0 }
0x137d   :  { %7543 = vmatpush3.msra.mxu1 %v4008_v62  ;;  %v4509_v25 = vsub.f32 %v4505_v34, %v4508_v11  ;;  %3838 = vadd.xlane.f32.xlu1 %v3837_v14  ;;  %v6962_v14 = vld [vmem:[%s9261_s1 + $0x170] sm:$0xff] }
0x137e   :  { %7544 = vmatprep.mubr.msk.f32.mxu1 %vm7997_vm0, %v7996_v0  ;;  %7552 = vmatprep.subr.mxu1 %v7996_v0 }
0x137f   :  { %v7896_v16 = vpop.eup %7895  ;;  %v4510_v17 = vmul.f32 1.442695, %v4509_v25  ;;  %v6963_v25 = vld [vmem:[%s9261_s1 + $0x178] sm:$0xff] }
0x1380   :  { %7545 = vmatmul.mubr.msk.f32.vlgmr.msra.gmra.mrb[66].mxu1 %vm218_vm2, %v7896_v16  ;;  %v4004_v18 = vsel %vm218_vm2, %v7896_v16, 0.0 }
0x1381   :  { %7899 = vpow2.f32 %v4510_v17  ;;  %7553 = vmatpush3.msra.mxu1 %v4174_v58  ;;  %4005 = vadd.xlane.f32.xlu0 %v4004_v18 }
0x1382   :  { %7554 = vmatprep.mubr.msk.f32.mxu1 %vm7997_vm0, %v7996_v0  ;;  %7562 = vmatprep.subr.mxu1 %v7996_v0 }
0x1383   :  { %v7898_v19 = vpop.eup %7897 }
0x1384   :  { %7555 = vmatmul.mubr.msk.f32.vlgmr.msra.gmra.mrb[68].mxu1 %vm218_vm2, %v7898_v19  ;;  %v4170_v8 = vsel %vm218_vm2, %v7898_v19, 0.0  ;;  %v4841_v30 = vpop.xlane.xlu1 %4840  ;;  %v4943_v19 = vpack.c.bf16 %v6963_v25, %v6962_v14 }
0x1385   :  { %7563 = vmatpush3.msra.mxu1 %v8758_v45  ;;  %7564 = vmatprep.mubr.msk.f32.mxu1 %vm7997_vm0, %v7996_v0  ;;  %v4842_v45 = vsub.f32 %v8839_v46, %v4841_v30 }
0x1386   :  { %7572 = vmatprep.subr.mxu1 %v7996_v0  ;;  %7600 = vmatpush3.bf16.msra.mxu0 %v4943_v19 }
0x1387   :  { %v4843_v38 = vmul.f32 1.442695, %v4842_v45  ;;  %7613 = vmatprep.subr.bf16.mxu0 %v7996_v0 }
0x1388   :  { %v4683_v41 = vpop.permute.xlu1 %4682 }
0x138b   :  { %v7900_v20 = vpop.eup %7899 }
0x138c   :  { %v4512_v21 = vsel %vm218_vm2, %v7900_v20, 0.0 }
0x138d   :  { %4513 = vadd.xlane.f32.xlu0 %v4512_v21 }
0x1391   :  { %4171 = vadd.xlane.f32.xlu0 %v4170_v8 }
0x1395   :  { %3675 = vadd.xlane.f32.xlu0 %v3674_v22 }
0x13a5   :  { %v4345_v31 = vpop.xlane.xlu0 %4344 }
0x13a6   :  { %v4346_v28 = vsub.f32 %v4342_v56, %v4345_v31 }
0x13a8   :  { %v4347_v32 = vmul.f32 1.442695, %v4346_v28 }
0x13a9   :  { %v4675_v9 = vpop.xlane.xlu0 %4674 }
0x13aa   :  { %7901 = vpow2.f32 %v4347_v32  ;;  %v4676_v37 = vsub.f32 %v4672_v59, %v4675_v9 }
0x13ac   :  { %v4677_v33 = vmul.f32 1.442695, %v4676_v37 }
0x13ad   :  { %v4517_v36 = vpop.permute.xlu0 %4516 }
0x13ae   :  { %7903 = vpow2.f32 %v4677_v33 }
0x13af   :  { %7905 = vpow2.f32 %v4843_v38 }
0x13b1   :  { %v4849_v46 = vpop.permute.xlu0 %4848 }
0x13b4   :  { %v7902_v34 = vpop.eup %7901 }
0x13b5   :  { %7565 = vmatmul.mubr.msk.f32.vlgmr.msra.gmra.mrb[70].mxu1 %vm218_vm2, %v7902_v34  ;;  %v4349_v49 = vsel %vm218_vm2, %v7902_v34, 0.0 }
0x13b6   :  { %7573 = vmatpush3.msra.mxu1 %v4517_v36  ;;  %7574 = vmatprep.mubr.msk.f32.mxu1 %vm7997_vm0, %v7996_v0 }
0x13b7   :  { %7582 = vmatprep.subr.mxu1 %v7996_v0 }
0x13b8   :  { %v7904_v39 = vpop.eup %7903 }
0x13b9   :  { %7575 = vmatmul.mubr.msk.f32.vlgmr.msra.gmra.mrb[72].mxu1 %vm218_vm2, %v7900_v20  ;;  %v4679_v42 = vsel %vm218_vm2, %v7904_v39, 0.0  ;;  %v7906_v44 = vpop.eup %7905 }
0x13ba   :  { %7583 = vmatpush3.msra.mxu1 %v4683_v41  ;;  %4680 = vadd.xlane.f32.xlu1 %v4679_v42  ;;  %v4845_v47 = vsel %vm218_vm2, %v7906_v44, 0.0 }
0x13bb   :  { %7584 = vmatprep.mubr.msk.f32.mxu1 %vm7997_vm0, %v7996_v0  ;;  %7592 = vmatprep.subr.mxu1 %v7996_v0 }
0x13bd   :  { %7585 = vmatmul.mubr.msk.f32.vlgmr.msra.gmra.mrb[74].mxu1 %vm218_vm2, %v7904_v39 }
0x13be   :  { %7593 = vmatpush3.msra.mxu1 %v4849_v46  ;;  %4846 = vadd.xlane.f32.xlu1 %v4845_v47 }
0x13bf   :  { %7594 = vmatprep.mubr.msk.f32.mxu1 %vm7997_vm0, %v7996_v0  ;;  %7605 = vmatprep.subr.bf16.mxu1 %v7996_v0 }
0x13c1   :  { %7595 = vmatmul.mubr.msk.f32.vlgmr.msra.gmra.mrb[76].mxu1 %vm218_vm2, %v7906_v44 }
0x13c2   :  { %4350 = vadd.xlane.f32.xlu1 %v4349_v49  ;;  %7609 = vmatprep.mubr.msk.bf16.mxu1 %vm7997_vm0, %v7996_v0 }
0x13dd   :  { %v8898_v50 = vpop.f32.mrb[62].mxu1 }
0x13de   :  { %v7526_v52 = vpop.f32.mrb[63].mxu1 }
0x140a   :  { %v3839_v63 = vpop.xlane.xlu1 %3838 }
0x140b   :  { %7907 = vrcp.f32 %v3839_v63 }
0x140e   :  { %v4006_v62 = vpop.xlane.xlu0 %4005 }
0x1415   :  { %v7908_v7 = vpop.eup %7907 }
0x141a   :  { %v4514_v1 = vpop.xlane.xlu0 %4513 }
0x141b   :  { %7909 = vrcp.f32 %v4514_v1 }
0x141c   :  { %7911 = vrcp.f32 %v4006_v62 }
0x141e   :  { %v4172_v58 = vpop.xlane.xlu0 %4171 }
0x1422   :  { %v3676_v39 = vpop.xlane.xlu0 %3675 }
0x1425   :  { %v7910_v10 = vpop.eup %7909 }
0x1426   :  { %v7912_v20 = vpop.eup %7911 }
0x1447   :  { %v4681_v2 = vpop.xlane.xlu1 %4680 }
0x1448   :  { %7913 = vrcp.f32 %v4681_v2 }
0x1449   :  { %7915 = vrcp.f32 %v4172_v58 }
0x144b   :  { %v4847_v12 = vpop.xlane.xlu1 %4846 }
0x144c   :  { %7917 = vrcp.f32 %v4847_v12 }
0x144d   :  { %7919 = vrcp.f32 %v3676_v39  ;;  %v6994_v39 = vld [vmem:[%s9261_s1 + $0x190] sm:$0xff] }
0x144f   :  { %v3913_v54 = vpop.f32.mrb[64].mxu1  ;;  %v4351_v41 = vpop.xlane.xlu1 %4350 }
0x1450   :  { %v7536_v55 = vpop.f32.mrb[65].mxu1  ;;  %v3918_v16 = vmul.f32 %v7908_v7, %v3913_v54  ;;  %7921 = vrcp.f32 %v4351_v41  ;;  %v6995_v41 = vld [vmem:[%s9261_s1 + $0x198] sm:$0xff] }
0x1452   :  { %v7914_v8 = vpop.eup %7913 }
0x1453   :  { %v4079_v56 = vpop.f32.mrb[66].mxu1  ;;  %v7916_v45 = vpop.eup %7915 }
0x1454   :  { %v7546_v60 = vpop.f32.mrb[67].mxu1  ;;  %v4084_v30 = vmul.f32 %v7912_v20, %v4079_v56 }
0x1456   :  { %v7918_v9 = vpop.eup %7917 }
0x1457   :  { %v4245_v59 = vpop.f32.mrb[68].mxu1  ;;  %v7920_v44 = vpop.eup %7919 }
0x1458   :  { %v7556_v61 = vpop.f32.mrb[69].mxu1  ;;  %v4250_v38 = vmul.f32 %v7916_v45, %v4245_v59  ;;  %v3751_v60 = vmul.f32 %v7920_v44, %v8898_v50  ;;  %v4947_v50 = vrot.slane %v8752_v51, %v8349_v35  ;;  %v6997_v45 = vld [vmem:[%s9261_s1 + $0x1a8] sm:$0xff] }
0x145a   :  { %v7922_v52 = vpop.eup %7921 }
0x1488   :  { %v4421_v13 = vpop.f32.mrb[70].mxu1 }
0x1489   :  { %v7566_v6 = vpop.f32.mrb[71].mxu1  ;;  %v4426_v56 = vmul.f32 %v7922_v52, %v4421_v13 }
0x148c   :  { %v4588_v11 = vpop.f32.mrb[72].mxu1 }
0x148d   :  { %v4593_v17 = vmul.f32 %v7910_v10, %v4588_v11  ;;  %v7576_v18 = vpop.f32.mrb[73].mxu1 }
0x148f   :  { %v7785_v21 = vpack.i.bf16 %v4593_v17, %v3918_v16 }
0x1490   :  { %v4754_v22 = vpop.f32.mrb[74].mxu1 }
0x1491   :  { %v4759_v31 = vmul.f32 %v7914_v8, %v4754_v22  ;;  %v7586_v28 = vpop.f32.mrb[75].mxu1  ;;  %7786 = vrot.lane.b32.xlu0 %v7785_v21, %s7995_s16 }
0x1493   :  { %v7790_v32 = vpack.i.bf16 %v4759_v31, %v4084_v30 }
0x1494   :  { %v4920_v37 = vpop.f32.mrb[76].mxu1 }
0x1495   :  { %v4925_v33 = vmul.f32 %v7918_v9, %v4920_v37  ;;  %v7596_v34 = vpop.f32.mrb[77].mxu1  ;;  %7791 = vrot.lane.b32.xlu1 %v7790_v32, %s8001_s14  ;;  %v6998_v9 = vld [vmem:[%s9261_s1 + $0x1b0] sm:$0xff]  ;;  %v6999_v37 = vld [vmem:[%s9261_s1 + $0x1b8] sm:$0xff] }
0x1496   :  { %v6993_v34 = vld [vmem:[%s9261_s1 + $0x188] sm:$0xff] }
0x1497   :  { %v7795_v36 = vpack.i.bf16 %v4925_v33, %v4250_v38  ;;  %v5104_v38 = vpack.c.bf16 %v6999_v37, %v6998_v9  ;;  %v6992_v33 = vld [vmem:[%s9261_s1 + $0x180] sm:$0xff] }
0x1499   :  { %7796 = vrot.lane.b32.xlu1 %v7795_v36, %s8002_s15  ;;  %v5053_v36 = vpack.c.bf16 %v6993_v34, %v6992_v33 }
0x149b   :  { %7606 = vmatpush3.bf16.msra.mxu1 %v5053_v36 }
0x149c   :  { %7607 = vmatprep.subr.bf16.mxu1 %v7996_v0 }
0x1503   :  { %v7787_v42 = vpop.permute.xlu0 %7786 }
0x1504   :  { %v7789_v47 = vunpack.i.h.bf16 %v7787_v42  ;;  %v7788_v49 = vunpack.i.l.bf16 %v7787_v42  ;;  %v5054_v42 = vpack.c.bf16 %v6995_v41, %v6994_v39 }
0x1506   :  { %v4263_v61 = vsel %vm218_vm2, %v3751_v60, %v7788_v49  ;;  %v4938_v62 = vsel %vm218_vm2, %v4426_v56, %v7789_v47  ;;  %7608 = vmatpush3.bf16.msra.mxu1 %v5054_v42 }
0x1507   :  { %v7792_v46 = vpop.permute.xlu1 %7791  ;;  %7621 = vmatprep.subr.bf16.mxu1 %v7996_v0 }
0x1508   :  { %v7794_v54 = vunpack.i.h.bf16 %v7792_v46  ;;  %v7793_v55 = vunpack.i.l.bf16 %v7792_v46 }
0x150a   :  { %v4939_v2 = vsel %vm892_vm4, %v4938_v62, %v7794_v54  ;;  %v4264_v58 = vsel %vm892_vm4, %v4263_v61, %v7793_v55  ;;  %v8970_v55 = vld [vmem:[%s9262_s2 + $0x18] sm:$0x7f] }
0x150b   :  { %v7797_v59 = vpop.permute.xlu1 %7796  ;;  %v5023_v60 = vrot.slane %v8970_v55, %v8147_v26  ;;  %v5108_v26 = vrot.slane %v8752_v51, %v8410_v40 }
0x150c   :  { %v7799_v63 = vunpack.i.h.bf16 %v7797_v59  ;;  %v7798_v1 = vunpack.i.l.bf16 %v7797_v59 }
0x150e   :  { %v4265_v12 = vsel %vm894_vm5, %v4264_v58, %v7798_v1  ;;  %v4940_v57 = vsel %vm894_vm5, %v4939_v2, %v7799_v63  ;;  %v5029_v1 = vrot.slane %v8970_v55, %v8177_v43 }
0x150f   :  { %v4941_v5 = vpack.c.bf16 %v4940_v57, %v4265_v12 }
0x1511   :  { %7602 = vmatmul.mubr.msk.bf16.vlgmr.msra.gmra.mrb[72].mxu0 %vm79_vm1, %v4941_v5 }
0x1512   :  { %7617 = vmatprep.mubr.msk.bf16.mxu0 %vm7997_vm0, %v7996_v0 }
0x15e4   :  { %v4985_v13 = vpop.f32.mrb[72].mxu0 }
0x15e5   :  { %v4986_v6 = vadd.f32 %v4985_v13, %v4947_v50  ;;  %v7603_v4 = vpop.f32.mrb[73].mxu0 }
0x15e6   :  { %v4988_v7 = vpop.f32.mrb[74].mxu0 }
0x15e7   :  { %v4992_v10 = vadd.f32 %v4986_v6, %v8726_v27  ;;  %v4989_v11 = vadd.f32 %v4988_v7, %v4947_v50  ;;  %v7604_v14 = vpop.f32.mrb[75].mxu0  ;;  %v7000_v7 = vld [vmem:[%s9261_s1 + $0x1c0] sm:$0xff] }
0x15e9   :  { %v4993_v25 = vadd.f32 %v4989_v11, %v8728_v29  ;;  %v4994_v16 = vsel %vm79_vm1, %v4992_v10, 0.0  ;;  %v6996_v29 = vld [vmem:[%s9261_s1 + $0x1a0] sm:$0xff]  ;;  %v7002_v11 = vld [vmem:[%s9261_s1 + $0x1d0] sm:$0xff] }
0x15ea   :  { %4995 = vadd.xlane.f32.xlu0 %v4994_v16  ;;  %v5103_v32 = vpack.c.bf16 %v6997_v45, %v6996_v29 }
0x15eb   :  { %v4997_v17 = vsel %vm79_vm1, %v4993_v25, 0.0 }
0x15ec   :  { %4998 = vadd.xlane.f32.xlu1 %v4997_v17  ;;  %7614 = vmatpush3.bf16.msra.mxu0 %v5103_v32  ;;  %v5058_v17 = vrot.slane %v8752_v51, %v8439_v48 }
0x15ed   :  { %7615 = vmatprep.subr.bf16.mxu0 %v7996_v0 }
0x15f0   :  { %7616 = vmatpush3.bf16.msra.mxu0 %v5104_v38 }
0x15f1   :  { %7629 = vmatprep.subr.mxu0 %v7996_v0 }
0x15f3   :  { %7618 = vmatmul.mubr.msk.bf16.vlgmr.msra.gmra.mrb[76].mxu0 %vm79_vm1, %v8105_v15 }
0x15f4   :  { %7631 = vmatprep.mubr.msk.f32.mxu0 %vm7997_vm0, %v7996_v0 }
0x1677   :  { %v4996_v18 = vpop.xlane.xlu0 %4995 }
0x1678   :  { %v5000_v19 = vmul.f32 0.03125, %v4996_v18 }
0x1679   :  { %v4999_v20 = vpop.xlane.xlu1 %4998 }
0x167a   :  { %v5002_v21 = vsub.f32 %v4992_v10, %v5000_v19  ;;  %v5001_v8 = vmul.f32 0.03125, %v4999_v20  ;;  %v7001_v10 = vld [vmem:[%s9261_s1 + $0x1c8] sm:$0xff] }
0x167b   :  { %v5150_v14 = vpack.c.bf16 %v7001_v10, %v7000_v7 }
0x167c   :  { %v5003_v22 = vsub.f32 %v4993_v25, %v5001_v8  ;;  %v5004_v30 = vmul.f32 %v5002_v21, %v5002_v21  ;;  %v7003_v25 = vld [vmem:[%s9261_s1 + $0x1d8] sm:$0xff] }
0x167d   :  { %v5151_v16 = vpack.c.bf16 %v7003_v25, %v7002_v11 }
0x167e   :  { %v5006_v31 = vsel %vm79_vm1, %v5004_v30, 0.0  ;;  %v5005_v27 = vmul.f32 %v5003_v22, %v5003_v22  ;;  %v5155_v30 = vrot.slane %v8752_v51, %v8462_v3 }
0x167f   :  { %5007 = vadd.xlane.f32.xlu0 %v5006_v31 }
0x1680   :  { %v5009_v28 = vsel %vm79_vm1, %v5005_v27, 0.0 }
0x1683   :  { %5010 = vadd.xlane.f32.xlu0 %v5009_v28 }
0x16c6   :  { %v5143_v5 = vpop.f32.mrb[76].mxu0 }
0x16c7   :  { %v5144_v50 = vadd.f32 %v5143_v5, %v5108_v26  ;;  %v7619_v13 = vpop.f32.mrb[77].mxu0 }
0x16c8   :  { %v5146_v43 = vpop.f32.mrb[78].mxu0 }
0x16c9   :  { %5359 = vrot.lane.b32.xlu1 %v5144_v50, %s7998_s25  ;;  %7630 = vmatpush3.xpose.msk.msra.mxu0 %vm218_vm2, %v5144_v50  ;;  %v7620_v6 = vpop.f32.mrb[79].mxu0  ;;  %v5147_v4 = vadd.f32 %v5146_v43, %v5108_v26 }
0x16ca   :  { %7639 = vmatprep.subr.mxu0 %v7996_v0 }
0x16cd   :  { %5525 = vrot.lane.b32.xlu1 %v5144_v50, %s7999_s26 }
0x170c   :  { %v5008_v44 = vpop.xlane.xlu0 %5007 }
0x170d   :  { %v5012_v46 = vmul.f32 0.03125, %v5008_v44 }
0x170f   :  { %v5014_v47 = vadd.f32 1e-05, %v5012_v46 }
0x1710   :  { %v5011_v49 = vpop.xlane.xlu0 %5010 }
0x1711   :  { %7923 = vrsqrt.f32 %v5014_v47  ;;  %v5013_v52 = vmul.f32 0.03125, %v5011_v49 }
0x1713   :  { %v5015_v54 = vadd.f32 1e-05, %v5013_v52 }
0x1715   :  { %7925 = vrsqrt.f32 %v5015_v54 }
0x171b   :  { %v7924_v56 = vpop.eup %7923 }
0x171c   :  { %v5018_v59 = vmul.f32 %v7924_v56, %v5002_v21 }
0x171e   :  { %v5024_v62 = vmul.f32 %v5023_v60, %v5018_v59 }
0x171f   :  { %v7926_v61 = vpop.eup %7925 }
0x1720   :  { %v5019_v63 = vmul.f32 %v7926_v61, %v5003_v22  ;;  %v8976_v58 = vadd.f32 %v5029_v1, %v5024_v62 }
0x1722   :  { %v5025_v2 = vmul.f32 %v5023_v60, %v5019_v63 }
0x1724   :  { %v8978_v12 = vadd.f32 %v5029_v1, %v5025_v2 }
0x1726   :  { %v5052_v57 = vpack.c.bf16 %v8978_v12, %v8976_v58 }
0x1728   :  { %7610 = vmatmul.mubr.msk.bf16.vlgmr.msra.gmra.mrb[80].mxu1 %vm79_vm1, %v5052_v57 }
0x1729   :  { %7625 = vmatprep.mubr.msk.bf16.mxu1 %vm7997_vm0, %v7996_v0  ;;  %7622 = vmatpush3.bf16.msra.mxu1 %v5150_v14 }
0x172a   :  { %7623 = vmatprep.subr.bf16.mxu1 %v7996_v0 }
0x172d   :  { %7624 = vmatpush3.bf16.msra.mxu1 %v5151_v16 }
0x172e   :  { %7634 = vmatprep.subr.mxu1 %v7996_v0 }
0x1730   :  { %7626 = vmatmul.mubr.msk.bf16.vlgmr.msra.gmra.mrb[84].mxu1 %vm79_vm1, %v8105_v15 }
0x1731   :  { %7636 = vmatprep.mubr.msk.f32.mxu1 %vm7997_vm0, %v7996_v0 }
0x173b   :  { %v5360_v22 = vpop.permute.xlu1 %5359 }
0x173f   :  { %v5526_v31 = vpop.permute.xlu1 %5525 }
0x17fb   :  { %v5096_v18 = vpop.f32.mrb[80].mxu1 }
0x17fc   :  { %v5097_v19 = vadd.f32 %v5096_v18, %v5058_v17  ;;  %v7611_v20 = vpop.f32.mrb[81].mxu1 }
0x17fd   :  { %v5099_v21 = vpop.f32.mrb[82].mxu1 }
0x17fe   :  { %5357 = vrot.lane.b32.xlu0 %v5097_v19, %s7998_s25  ;;  %v7612_v8 = vpop.f32.mrb[83].mxu1  ;;  %5523 = vrot.lane.b32.xlu1 %v5097_v19, %s7999_s26  ;;  %v5100_v15 = vadd.f32 %v5099_v21, %v5058_v17 }
0x17ff   :  { %7632 = vmatmul.mubr.msk.f32.vlgmr.msra.gmra.mrb[70].mxu0 %vm218_vm2, %v5097_v19 }
0x1800   :  { %7640 = vmatpush3.xpose.msk.msra.mxu0 %vm218_vm2, %v5360_v22  ;;  %7641 = vmatprep.mubr.msk.f32.mxu0 %vm7997_vm0, %v7996_v0 }
0x1801   :  { %7649 = vmatprep.subr.mxu0 %v7996_v0 }
0x1802   :  { %5690 = vrot.lane.b32.xlu0 %v5144_v50, %s8000_s27  ;;  %5688 = vrot.lane.b32.xlu1 %v5097_v19, %s8000_s27 }
0x1803   :  { %v5190_v27 = vpop.f32.mrb[84].mxu1 }
0x1804   :  { %v9028_v28 = vadd.f32 %v5190_v27, %v5155_v30  ;;  %v7627_v29 = vpop.f32.mrb[85].mxu1 }
0x1805   :  { %v5193_v45 = vpop.f32.mrb[86].mxu1 }
0x1806   :  { %6028 = vrot.lane.b32.xlu1 %v5100_v15, %s7998_s25  ;;  %6030 = vrot.lane.b32.xlu0 %v5147_v4, %s7998_s25  ;;  %v9032_v32 = vadd.f32 %v5193_v45, %v5155_v30  ;;  %v7628_v9 = vpop.f32.mrb[87].mxu1 }
0x1807   :  { %7635 = vmatpush3.msra.mxu1 %v9028_v28 }
0x1808   :  { %7644 = vmatprep.subr.mxu1 %v7996_v0 }
0x180a   :  { %6194 = vrot.lane.b32.xlu1 %v5100_v15, %s7999_s26  ;;  %6196 = vrot.lane.b32.xlu0 %v5147_v4, %s7999_s26 }
0x180e   :  { %6359 = vrot.lane.b32.xlu1 %v5100_v15, %s8000_s27  ;;  %6361 = vrot.lane.b32.xlu0 %v5147_v4, %s8000_s27 }
0x1812   :  { %5445 = vrot.lane.b32.xlu1 %v9028_v28, %s7998_s25 }
0x1870   :  { %v5358_v37 = vpop.permute.xlu0 %5357  ;;  %v5524_v38 = vpop.permute.xlu1 %5523 }
0x1871   :  { %7642 = vmatmul.mubr.msk.f32.vlgmr.msra.gmra.mrb[80].mxu0 %vm218_vm2, %v5358_v37 }
0x1872   :  { %7650 = vmatpush3.xpose.msk.msra.mxu0 %vm218_vm2, %v5526_v31  ;;  %7651 = vmatprep.mubr.msk.f32.mxu0 %vm7997_vm0, %v7996_v0 }
0x1873   :  { %7659 = vmatprep.subr.mxu0 %v7996_v0 }
0x1874   :  { %v5691_v51 = vpop.permute.xlu0 %5690  ;;  %v5689_v33 = vpop.permute.xlu1 %5688 }
0x1875   :  { %7652 = vmatmul.mubr.msk.f32.vlgmr.msra.gmra.mrb[82].mxu0 %vm218_vm2, %v5524_v38 }
0x1876   :  { %7660 = vmatpush3.xpose.msk.msra.mxu0 %vm218_vm2, %v5691_v51  ;;  %7661 = vmatprep.mubr.msk.f32.mxu0 %vm7997_vm0, %v7996_v0 }
0x1877   :  { %7669 = vmatprep.subr.mxu0 %v7996_v0 }
0x1878   :  { %v6031_v34 = vpop.permute.xlu0 %6030  ;;  %v6029_v36 = vpop.permute.xlu1 %6028 }
0x1879   :  { %7662 = vmatmul.mubr.msk.f32.vlgmr.msra.gmra.mrb[84].mxu0 %vm218_vm2, %v5689_v33 }
0x187a   :  { %7670 = vmatpush3.xpose.msk.msra.mxu0 %vm218_vm2, %v5147_v4  ;;  %7671 = vmatprep.mubr.msk.f32.mxu0 %vm7997_vm0, %v7996_v0 }
0x187b   :  { %7679 = vmatprep.subr.mxu0 %v7996_v0 }
0x187c   :  { %v6197_v39 = vpop.permute.xlu0 %6196  ;;  %v6195_v41 = vpop.permute.xlu1 %6194 }
0x187d   :  { %7672 = vmatmul.mubr.msk.f32.vlgmr.msra.gmra.mrb[86].mxu0 %vm218_vm2, %v5100_v15 }
0x187e   :  { %7680 = vmatpush3.xpose.msk.msra.mxu0 %vm218_vm2, %v6031_v34  ;;  %7681 = vmatprep.mubr.msk.f32.mxu0 %vm7997_vm0, %v7996_v0 }
0x187f   :  { %7689 = vmatprep.subr.mxu0 %v7996_v0 }
0x1880   :  { %v6362_v42 = vpop.permute.xlu0 %6361  ;;  %v6360_v44 = vpop.permute.xlu1 %6359 }
0x1881   :  { %7682 = vmatmul.mubr.msk.f32.vlgmr.msra.gmra.mrb[88].mxu0 %vm218_vm2, %v6029_v36 }
0x1882   :  { %7690 = vmatpush3.xpose.msk.msra.mxu0 %vm218_vm2, %v6197_v39  ;;  %7691 = vmatprep.mubr.msk.f32.mxu0 %vm7997_vm0, %v7996_v0 }
0x1883   :  { %7699 = vmatprep.subr.mxu0 %v7996_v0 }
0x1884   :  { %v5446_v11 = vpop.permute.xlu1 %5445 }
0x1885   :  { %7692 = vmatmul.mubr.msk.f32.vlgmr.msra.gmra.mrb[90].mxu0 %vm218_vm2, %v6195_v41 }
0x1886   :  { %7700 = vmatpush3.xpose.msk.msra.mxu0 %vm218_vm2, %v6362_v42  ;;  %7701 = vmatprep.mubr.msk.f32.mxu0 %vm7997_vm0, %v7996_v0 }
0x1887   :  { %7709 = vmatprep.subr.bf16.mxu0 %v7996_v0 }
0x1889   :  { %7702 = vmatmul.mubr.msk.f32.vlgmr.msra.gmra.mrb[92].mxu0 %vm218_vm2, %v6360_v44 }
0x188a   :  { %7713 = vmatprep.mubr.msk.bf16.mxu0 %vm7997_vm0, %v7996_v0 }
0x18d2   :  { %v5269_v46 = vpop.f32.mrb[70].mxu0 }
0x18d3   :  { %v7633_v47 = vpop.f32.mrb[71].mxu0  ;;  %v5273_v49 = vsel %vm218_vm2, %v5269_v46, -inf }
0x18d4   :  { %5274 = vmax.xlane.f32.xlu0 %v5273_v49 }
0x1944   :  { %v5431_v52 = vpop.f32.mrb[80].mxu0 }
0x1945   :  { %v7643_v54 = vpop.f32.mrb[81].mxu0  ;;  %v5435_v56 = vsel %vm218_vm2, %v5431_v52, -inf }
0x1946   :  { %5436 = vmax.xlane.f32.xlu1 %v5435_v56 }
0x1948   :  { %v5597_v60 = vpop.f32.mrb[82].mxu0 }
0x1949   :  { %v7653_v59 = vpop.f32.mrb[83].mxu0  ;;  %v5601_v61 = vsel %vm218_vm2, %v5597_v60, -inf }
0x194a   :  { %5602 = vmax.xlane.f32.xlu0 %v5601_v61 }
0x194c   :  { %v5762_v62 = vpop.f32.mrb[84].mxu0 }
0x194d   :  { %v7663_v63 = vpop.f32.mrb[85].mxu0  ;;  %v5766_v1 = vsel %vm218_vm2, %v5762_v62, -inf }
0x194e   :  { %5767 = vmax.xlane.f32.xlu0 %v5766_v1 }
0x1950   :  { %v9073_v2 = vpop.f32.mrb[86].mxu0 }
0x1951   :  { %v7673_v57 = vpop.f32.mrb[87].mxu0  ;;  %v5944_v25 = vsel %vm218_vm2, %v9073_v2, -inf }
0x1954   :  { %v9075_v26 = vpop.f32.mrb[88].mxu0 }
0x1955   :  { %v7683_v5 = vpop.f32.mrb[89].mxu0  ;;  %v6106_v16 = vsel %vm218_vm2, %v9075_v26, -inf }
0x1957   :  { %5775 = vrot.lane.b32.xlu1 %v9028_v28, %s8000_s27 }
0x1958   :  { %v9079_v50 = vpop.f32.mrb[90].mxu0 }
0x1959   :  { %v7693_v13 = vpop.f32.mrb[91].mxu0  ;;  %v6272_v17 = vsel %vm218_vm2, %v9079_v50, -inf }
0x195b   :  { %6116 = vrot.lane.b32.xlu1 %v9032_v32, %s7998_s25 }
0x195c   :  { %v9083_v43 = vpop.f32.mrb[92].mxu0 }
0x195d   :  { %v7703_v6 = vpop.f32.mrb[93].mxu0  ;;  %v6437_v18 = vsel %vm218_vm2, %v9083_v43, -inf }
0x1961   :  { %v5275_v4 = vpop.xlane.xlu0 %5274 }
0x1962   :  { %v5276_v7 = vsub.f32 %v5269_v46, %v5275_v4 }
0x1964   :  { %v5277_v10 = vmul.f32 1.442695, %v5276_v7  ;;  %5610 = vrot.lane.b32.xlu0 %v9028_v28, %s7999_s26 }
0x1966   :  { %7927 = vpow2.f32 %v5277_v10 }
0x1970   :  { %v9087_v14 = vpop.eup %7927 }
0x1971   :  { %7637 = vmatmul.mubr.msk.f32.vlgmr.msra.gmra.mrb[78].mxu1 %vm218_vm2, %v9087_v14  ;;  %v5279_v5 = vsel %vm218_vm2, %v9087_v14, 0.0 }
0x1972   :  { %7645 = vmatpush3.msra.mxu1 %v5446_v11  ;;  %7646 = vmatprep.mubr.msk.f32.mxu1 %vm7997_vm0, %v7996_v0 }
0x1973   :  { %7654 = vmatprep.subr.mxu1 %v7996_v0 }
0x197f   :  { %5945 = vmax.xlane.f32.xlu1 %v5944_v25 }
0x1983   :  { %6107 = vmax.xlane.f32.xlu0 %v6106_v16  ;;  %6273 = vmax.xlane.f32.xlu1 %v6272_v17 }
0x1987   :  { %6438 = vmax.xlane.f32.xlu0 %v6437_v18 }
0x1994   :  { %6446 = vrot.lane.b32.xlu1 %v9032_v32, %s8000_s27 }
0x199d   :  { %6281 = vrot.lane.b32.xlu0 %v9032_v32, %s7999_s26 }
0x19d3   :  { %v5437_v19 = vpop.xlane.xlu1 %5436 }
0x19d4   :  { %v5438_v20 = vsub.f32 %v5431_v52, %v5437_v19 }
0x19d6   :  { %v5439_v21 = vmul.f32 1.442695, %v5438_v20 }
0x19d7   :  { %v5603_v8 = vpop.xlane.xlu0 %5602  ;;  %v5776_v37 = vpop.permute.xlu1 %5775 }
0x19d8   :  { %7929 = vpow2.f32 %v5439_v21  ;;  %v5604_v22 = vsub.f32 %v5597_v60, %v5603_v8  ;;  %v7004_v8 = vld [vmem:[%s9261_s1 + $0x1e0] sm:$0xff] }
0x19da   :  { %v5605_v15 = vmul.f32 1.442695, %v5604_v22  ;;  %v7005_v22 = vld [vmem:[%s9261_s1 + $0x1e8] sm:$0xff] }
0x19db   :  { %v5768_v30 = vpop.xlane.xlu0 %5767  ;;  %v6117_v33 = vpop.permute.xlu1 %6116 }
0x19dc   :  { %7931 = vpow2.f32 %v5605_v15  ;;  %v5769_v31 = vsub.f32 %v5762_v62, %v5768_v30  ;;  %v6540_v30 = vpack.c.bf16 %v7005_v22, %v7004_v8 }
0x19de   :  { %v5770_v27 = vmul.f32 1.442695, %v5769_v31  ;;  %7710 = vmatpush3.bf16.msra.mxu0 %v6540_v30 }
0x19df   :  { %v5611_v29 = vpop.permute.xlu0 %5610  ;;  %7711 = vmatprep.subr.bf16.mxu0 %v7996_v0 }
0x19e0   :  { %7933 = vpow2.f32 %v5770_v27 }
0x19e2   :  { %v7930_v28 = vpop.eup %7929 }
0x19e3   :  { %7647 = vmatmul.mubr.msk.f32.vlgmr.msra.gmra.mrb[88].mxu1 %vm218_vm2, %v7930_v28  ;;  %v5441_v45 = vsel %vm218_vm2, %v7930_v28, 0.0 }
0x19e4   :  { %7655 = vmatpush3.msra.mxu1 %v5611_v29  ;;  %5442 = vadd.xlane.f32.xlu0 %v5441_v45  ;;  %v7006_v29 = vld [vmem:[%s9261_s1 + $0x1f0] sm:$0xff]  ;;  %v7007_v45 = vld [vmem:[%s9261_s1 + $0x1f8] sm:$0xff] }
0x19e5   :  { %7656 = vmatprep.mubr.msk.f32.mxu1 %vm7997_vm0, %v7996_v0  ;;  %7664 = vmatprep.subr.mxu1 %v7996_v0 }
0x19e6   :  { %v7932_v9 = vpop.eup %7931 }
0x19e7   :  { %7657 = vmatmul.mubr.msk.f32.vlgmr.msra.gmra.mrb[90].mxu1 %vm218_vm2, %v7932_v9  ;;  %v5607_v38 = vsel %vm218_vm2, %v7932_v9, 0.0 }
0x19e8   :  { %7665 = vmatpush3.msra.mxu1 %v5776_v37  ;;  %5608 = vadd.xlane.f32.xlu0 %v5607_v38 }
0x19e9   :  { %7666 = vmatprep.mubr.msk.f32.mxu1 %vm7997_vm0, %v7996_v0  ;;  %7674 = vmatprep.subr.mxu1 %v7996_v0 }
0x19ea   :  { %v7934_v51 = vpop.eup %7933 }
0x19eb   :  { %7667 = vmatmul.mubr.msk.f32.vlgmr.msra.gmra.mrb[92].mxu1 %vm218_vm2, %v7934_v51  ;;  %v5772_v57 = vsel %vm218_vm2, %v7934_v51, 0.0  ;;  %v6541_v51 = vpack.c.bf16 %v7007_v45, %v7006_v29 }
0x19ec   :  { %7675 = vmatpush3.msra.mxu1 %v9032_v32  ;;  %7676 = vmatprep.mubr.msk.f32.mxu1 %vm7997_vm0, %v7996_v0 }
0x19ed   :  { %7684 = vmatprep.subr.mxu1 %v7996_v0  ;;  %7712 = vmatpush3.bf16.msra.mxu0 %v6541_v51 }
0x19ee   :  { %7725 = vmatprep.subr.bf16.mxu0 %v7996_v0 }
0x1a0c   :  { %v5946_v34 = vpop.xlane.xlu1 %5945 }
0x1a0d   :  { %v5947_v36 = vsub.f32 %v9073_v2, %v5946_v34 }
0x1a0f   :  { %v5948_v39 = vmul.f32 1.442695, %v5947_v36 }
0x1a10   :  { %v6108_v41 = vpop.xlane.xlu0 %6107  ;;  %v6274_v42 = vpop.xlane.xlu1 %6273 }
0x1a11   :  { %7935 = vpow2.f32 %v5948_v39  ;;  %v6109_v44 = vsub.f32 %v9075_v26, %v6108_v41  ;;  %v6275_v46 = vsub.f32 %v9079_v50, %v6274_v42 }
0x1a13   :  { %v6110_v47 = vmul.f32 1.442695, %v6109_v44  ;;  %v6276_v49 = vmul.f32 1.442695, %v6275_v46 }
0x1a14   :  { %v6439_v32 = vpop.xlane.xlu0 %6438  ;;  %v6447_v2 = vpop.permute.xlu1 %6446 }
0x1a15   :  { %7937 = vpow2.f32 %v6110_v47  ;;  %v6440_v52 = vsub.f32 %v9083_v43, %v6439_v32 }
0x1a16   :  { %7939 = vpow2.f32 %v6276_v49 }
0x1a17   :  { %v6441_v54 = vmul.f32 1.442695, %v6440_v52 }
0x1a18   :  { %v6282_v61 = vpop.permute.xlu0 %6281 }
0x1a19   :  { %7941 = vpow2.f32 %v6441_v54 }
0x1a1b   :  { %v7936_v56 = vpop.eup %7935 }
0x1a1c   :  { %7677 = vmatmul.mubr.msk.f32.vlgmr.msra.gmra.mrb[94].mxu1 %vm218_vm2, %v7936_v56  ;;  %v5950_v50 = vsel %vm218_vm2, %v7936_v56, 0.0 }
0x1a1d   :  { %7685 = vmatpush3.msra.mxu1 %v6117_v33  ;;  %7686 = vmatprep.mubr.msk.f32.mxu1 %vm7997_vm0, %v7996_v0 }
0x1a1e   :  { %7694 = vmatprep.subr.mxu1 %v7996_v0 }
0x1a1f   :  { %v7938_v60 = vpop.eup %7937 }
0x1a20   :  { %v7940_v59 = vpop.eup %7939  ;;  %7687 = vmatmul.mubr.msk.f32.vlgmr.msra.gmra.mrb[96].mxu1 %vm218_vm2, %v7938_v60  ;;  %v6112_v62 = vsel %vm218_vm2, %v7938_v60, 0.0 }
0x1a21   :  { %7695 = vmatpush3.msra.mxu1 %v6282_v61  ;;  %6113 = vadd.xlane.f32.xlu1 %v6112_v62  ;;  %v6278_v63 = vsel %vm218_vm2, %v7940_v59, 0.0 }
0x1a22   :  { %6279 = vadd.xlane.f32.xlu0 %v6278_v63  ;;  %7696 = vmatprep.mubr.msk.f32.mxu1 %vm7997_vm0, %v7996_v0 }
0x1a23   :  { %v7942_v1 = vpop.eup %7941  ;;  %7704 = vmatprep.subr.mxu1 %v7996_v0 }
0x1a24   :  { %7697 = vmatmul.mubr.msk.f32.vlgmr.msra.gmra.mrb[98].mxu1 %vm218_vm2, %v7940_v59  ;;  %v6443_v26 = vsel %vm218_vm2, %v7942_v1, 0.0 }
0x1a25   :  { %7705 = vmatpush3.msra.mxu1 %v6447_v2  ;;  %5773 = vadd.xlane.f32.xlu1 %v5772_v57 }
0x1a26   :  { %6444 = vadd.xlane.f32.xlu0 %v6443_v26  ;;  %7706 = vmatprep.mubr.msk.f32.mxu1 %vm7997_vm0, %v7996_v0 }
0x1a27   :  { %7717 = vmatprep.subr.bf16.mxu1 %v7996_v0 }
0x1a28   :  { %7707 = vmatmul.mubr.msk.f32.vlgmr.msra.gmra.mrb[100].mxu1 %vm218_vm2, %v7942_v1 }
0x1a29   :  { %5280 = vadd.xlane.f32.xlu1 %v5279_v5  ;;  %7721 = vmatprep.mubr.msk.bf16.mxu1 %vm7997_vm0, %v7996_v0 }
0x1a2a   :  { %5951 = vadd.xlane.f32.xlu0 %v5950_v50 }
0x1a44   :  { %v9147_v13 = vpop.f32.mrb[78].mxu1 }
0x1a45   :  { %v7638_v43 = vpop.f32.mrb[79].mxu1 }
0x1a71   :  { %v5443_v16 = vpop.xlane.xlu0 %5442 }
0x1a72   :  { %7943 = vrcp.f32 %v5443_v16 }
0x1a75   :  { %v5609_v17 = vpop.xlane.xlu0 %5608 }
0x1a7c   :  { %v7944_v31 = vpop.eup %7943 }
0x1aae   :  { %v6114_v18 = vpop.xlane.xlu1 %6113 }
0x1aaf   :  { %v6280_v14 = vpop.xlane.xlu0 %6279  ;;  %7945 = vrcp.f32 %v6114_v18 }
0x1ab0   :  { %7947 = vrcp.f32 %v5609_v17 }
0x1ab1   :  { %7949 = vrcp.f32 %v6280_v14 }
0x1ab2   :  { %v5774_v19 = vpop.xlane.xlu1 %5773 }
0x1ab3   :  { %v6445_v20 = vpop.xlane.xlu0 %6444  ;;  %7951 = vrcp.f32 %v5774_v19 }
0x1ab4   :  { %7953 = vrcp.f32 %v6445_v20 }
0x1ab6   :  { %v5517_v6 = vpop.f32.mrb[88].mxu1  ;;  %v5281_v59 = vpop.xlane.xlu1 %5280 }
0x1ab7   :  { %v7648_v4 = vpop.f32.mrb[89].mxu1  ;;  %v5522_v9 = vmul.f32 %v7944_v31, %v5517_v6  ;;  %v5952_v61 = vpop.xlane.xlu0 %5951  ;;  %7955 = vrcp.f32 %v5281_v59 }
0x1ab8   :  { %7957 = vrcp.f32 %v5952_v61 }
0x1ab9   :  { %v7946_v27 = vpop.eup %7945 }
0x1aba   :  { %v5682_v7 = vpop.f32.mrb[90].mxu1  ;;  %v7948_v33 = vpop.eup %7947 }
0x1abb   :  { %v7658_v10 = vpop.f32.mrb[91].mxu1  ;;  %v7950_v36 = vpop.eup %7949  ;;  %v5687_v41 = vmul.f32 %v7948_v33, %v5682_v7 }
0x1abd   :  { %v7952_v46 = vpop.eup %7951 }
0x1abe   :  { %v5847_v11 = vpop.f32.mrb[92].mxu1  ;;  %v7954_v49 = vpop.eup %7953 }
0x1abf   :  { %v7668_v25 = vpop.f32.mrb[93].mxu1  ;;  %v5852_v52 = vmul.f32 %v7952_v46, %v5847_v11 }
0x1ac1   :  { %v7956_v63 = vpop.eup %7955 }
0x1ac2   :  { %v7958_v26 = vpop.eup %7957  ;;  %v5356_v6 = vmul.f32 %v7956_v63, %v9147_v13  ;;  %v7968_v13 = vld [vmem:[%s9262_s2 + $0x10] sm:$0xff] }
0x1ac3   :  { %v6545_v20 = vrot.slane %v7968_v13, %v3175_v53 }
0x1aef   :  { %v6022_v21 = vpop.f32.mrb[94].mxu1 }
0x1af0   :  { %v7678_v15 = vpop.f32.mrb[95].mxu1  ;;  %v6027_v43 = vmul.f32 %v7958_v26, %v6022_v21 }
0x1af3   :  { %v6188_v28 = vpop.f32.mrb[96].mxu1 }
0x1af4   :  { %v6193_v37 = vmul.f32 %v7946_v27, %v6188_v28  ;;  %v7688_v38 = vpop.f32.mrb[97].mxu1 }
0x1af6   :  { %v7800_v34 = vpack.i.bf16 %v6193_v37, %v5522_v9 }
0x1af7   :  { %v6353_v39 = vpop.f32.mrb[98].mxu1 }
0x1af8   :  { %v6358_v42 = vmul.f32 %v7950_v36, %v6353_v39  ;;  %v7698_v44 = vpop.f32.mrb[99].mxu1  ;;  %7801 = vrot.lane.b32.xlu1 %v7800_v34, %s7995_s16  ;;  %v7037_v39 = vld [vmem:[%s9263_s3 + $0x28] sm:$0xff] }
0x1af9   :  { %v7039_v44 = vld [vmem:[%s9263_s3 + $0x38] sm:$0xff] }
0x1afa   :  { %v7805_v47 = vpack.i.bf16 %v6358_v42, %v5687_v41  ;;  %v7038_v42 = vld [vmem:[%s9263_s3 + $0x30] sm:$0xff] }
0x1afb   :  { %v6518_v32 = vpop.f32.mrb[100].mxu1  ;;  %v6637_v46 = vpack.c.bf16 %v7039_v44, %v7038_v42 }
0x1afc   :  { %v6523_v54 = vmul.f32 %v7954_v49, %v6518_v32  ;;  %v7708_v56 = vpop.f32.mrb[101].mxu1  ;;  %7806 = vrot.lane.b32.xlu0 %v7805_v47, %s8001_s14  ;;  %v7043_v47 = vld [vmem:[%s9265_s5 + $0x40] sm:$0xff]  ;;  %v7044_v49 = vld [vmem:[%s9265_s5 + $0x48] sm:$0xff]  ;;  %v7045_v32 = vld [vmem:[%s9265_s5 + $0x50] sm:$0xff] }
0x1afe   :  { %v7810_v60 = vpack.i.bf16 %v6523_v54, %v5852_v52  ;;  %v6702_v52 = vpack.c.bf16 %v7044_v49, %v7043_v47  ;;  %v7046_v54 = vld [vmem:[%s9265_s5 + $0x58] sm:$0xff]  ;;  %v6794_v47 = vld [vmem:[#allocation2] sm:$0xff]  ;;  %v6795_v49 = vld [vmem:[#allocation2 + $0x8] sm:$0xff] }
0x1aff   :  { %v6703_v56 = vpack.c.bf16 %v7046_v54, %v7045_v32  ;;  %v6799_v32 = vpack.c.bf16 %v6795_v49, %v6794_v47  ;;  %v6797_v54 = vld [vmem:[#allocation2 + $0x18] sm:$0xff] }
0x1b00   :  { %7811 = vrot.lane.b32.xlu1 %v7810_v60, %s8002_s15 }
0x1b6a   :  { %v7802_v62 = vpop.permute.xlu1 %7801 }
0x1b6b   :  { %v7804_v2 = vunpack.i.h.bf16 %v7802_v62  ;;  %v7803_v57 = vunpack.i.l.bf16 %v7802_v62 }
0x1b6d   :  { %v5865_v7 = vsel %vm218_vm2, %v5356_v6, %v7803_v57  ;;  %v6536_v10 = vsel %vm218_vm2, %v6027_v43, %v7804_v2  ;;  %v6621_v2 = vrot.slane %v8970_v55, %v8349_v35  ;;  %v6627_v6 = vrot.slane %v8970_v55, %v8439_v48  ;;  %v7047_v35 = vld [vmem:[%s9265_s5 + $0x60] sm:$0xff]  ;;  %v7049_v48 = vld [vmem:[%s9265_s5 + $0x70] sm:$0xff] }
0x1b6e   :  { %v7807_v1 = vpop.permute.xlu0 %7806 }
0x1b6f   :  { %v7809_v5 = vunpack.i.h.bf16 %v7807_v1  ;;  %v7808_v50 = vunpack.i.l.bf16 %v7807_v1 }
0x1b71   :  { %v6537_v16 = vsel %vm892_vm4, %v6536_v10, %v7809_v5  ;;  %v5866_v17 = vsel %vm892_vm4, %v5865_v7, %v7808_v50 }
0x1b72   :  { %v7812_v4 = vpop.permute.xlu1 %7811 }
0x1b73   :  { %v7814_v11 = vunpack.i.h.bf16 %v7812_v4  ;;  %v7813_v25 = vunpack.i.l.bf16 %v7812_v4 }
0x1b75   :  { %v5867_v18 = vsel %vm894_vm5, %v5866_v17, %v7813_v25  ;;  %v6538_v14 = vsel %vm894_vm5, %v6537_v16, %v7814_v11  ;;  %v7048_v25 = vld [vmem:[%s9265_s5 + $0x68] sm:$0xff]  ;;  %v7050_v17 = vld [vmem:[%s9265_s5 + $0x78] sm:$0xff] }
0x1b76   :  { %v6539_v19 = vpack.c.bf16 %v6538_v14, %v5867_v18  ;;  %v6704_v16 = vpack.c.bf16 %v7048_v25, %v7047_v35  ;;  %v6705_v18 = vpack.c.bf16 %v7050_v17, %v7049_v48  ;;  %v7041_v14 = vld [vmem:[%s9264_s4 + $0x1] ss:$0 sm:$0xff] }
0x1b78   :  { %7714 = vmatmul.mubr.msk.bf16.vlgmr.msra.gmra.mrb[96].mxu0 %vm79_vm1, %v6539_v19 }
0x1b79   :  { %7733 = vmatprep.mubr.msk.bf16.mxu0 %vm7997_vm0, %v7996_v0  ;;  %7726 = vmatpush3.bf16.msra.mxu0 %v6702_v52  ;;  %v6796_v52 = vld [vmem:[#allocation2 + $0x10] sm:$0xff] }
0x1b7a   :  { %7727 = vmatprep.subr.bf16.mxu0 %v7996_v0 }
0x1b7d   :  { %7728 = vmatpush3.bf16.msra.mxu0 %v6703_v56  ;;  %v6800_v56 = vpack.c.bf16 %v6797_v54, %v6796_v52 }
0x1b7e   :  { %7729 = vmatprep.subr.bf16.mxu0 %v7996_v0 }
0x1b81   :  { %7730 = vmatpush3.bf16.msra.mxu0 %v6704_v16 }
0x1b82   :  { %7731 = vmatprep.subr.bf16.mxu0 %v7996_v0 }
0x1b85   :  { %7732 = vmatpush3.bf16.msra.mxu0 %v6705_v18 }
0x1c4b   :  { %v6583_v21 = vpop.f32.mrb[96].mxu0 }
0x1c4c   :  { %v6584_v8 = vadd.f32 %v6583_v21, %v6545_v20  ;;  %v7715_v22 = vpop.f32.mrb[97].mxu0 }
0x1c4d   :  { %v6586_v15 = vpop.f32.mrb[98].mxu0 }
0x1c4e   :  { %v6590_v30 = vadd.f32 %v6584_v8, %v8976_v58  ;;  %v6587_v31 = vadd.f32 %v6586_v15, %v6545_v20  ;;  %v7716_v27 = vpop.f32.mrb[99].mxu0 }
0x1c4f   :  { %v6709_v27 = vrot.slane %v8970_v55, %v8139_v24 }
0x1c50   :  { %v6591_v28 = vadd.f32 %v6587_v31, %v8978_v12  ;;  %v6592_v29 = vsel %vm79_vm1, %v6590_v30, 0.0  ;;  %v7036_v12 = vld [vmem:[%s9263_s3 + $0x20] sm:$0xff] }
0x1c51   :  { %6593 = vadd.xlane.f32.xlu1 %v6592_v29  ;;  %v6636_v41 = vpack.c.bf16 %v7037_v39, %v7036_v12 }
0x1c52   :  { %v6595_v45 = vsel %vm79_vm1, %v6591_v28, 0.0 }
0x1c53   :  { %6596 = vadd.xlane.f32.xlu0 %v6595_v45  ;;  %7718 = vmatpush3.bf16.msra.mxu1 %v6636_v41 }
0x1c54   :  { %7719 = vmatprep.subr.bf16.mxu1 %v7996_v0 }
0x1c57   :  { %7720 = vmatpush3.bf16.msra.mxu1 %v6637_v46 }
0x1c58   :  { %7737 = vmatprep.subr.bf16.mxu1 %v7996_v0 }
0x1cde   :  { %v6594_v9 = vpop.xlane.xlu1 %6593 }
0x1cdf   :  { %v6598_v37 = vmul.f32 0.03125, %v6594_v9 }
0x1ce0   :  { %v6597_v23 = vpop.xlane.xlu0 %6596 }
0x1ce1   :  { %v6600_v53 = vsub.f32 %v6590_v30, %v6598_v37  ;;  %v6599_v38 = vmul.f32 0.03125, %v6597_v23 }
0x1ce3   :  { %v6601_v51 = vsub.f32 %v6591_v28, %v6599_v38  ;;  %v6602_v33 = vmul.f32 %v6600_v53, %v6600_v53 }
0x1ce5   :  { %v6604_v34 = vsel %vm79_vm1, %v6602_v33, 0.0  ;;  %v6603_v58 = vmul.f32 %v6601_v51, %v6601_v51 }
0x1ce6   :  { %6605 = vadd.xlane.f32.xlu0 %v6604_v34 }
0x1ce7   :  { %v6607_v36 = vsel %vm79_vm1, %v6603_v58, 0.0 }
0x1ce8   :  { %6608 = vadd.xlane.f32.xlu1 %v6607_v36 }
0x1d73   :  { %v6606_v60 = vpop.xlane.xlu0 %6605 }
0x1d74   :  { %v6610_v59 = vmul.f32 0.03125, %v6606_v60 }
0x1d75   :  { %v6609_v61 = vpop.xlane.xlu1 %6608 }
0x1d76   :  { %v6612_v62 = vadd.f32 1e-05, %v6610_v59  ;;  %v6611_v63 = vmul.f32 0.03125, %v6609_v61 }
0x1d78   :  { %7959 = vrsqrt.f32 %v6612_v62  ;;  %v6613_v1 = vadd.f32 1e-05, %v6611_v63 }
0x1d7a   :  { %7961 = vrsqrt.f32 %v6613_v1 }
0x1d82   :  { %v7960_v57 = vpop.eup %7959 }
0x1d83   :  { %v6616_v26 = vmul.f32 %v7960_v57, %v6600_v53 }
0x1d84   :  { %v7962_v5 = vpop.eup %7961 }
0x1d85   :  { %v6622_v50 = vmul.f32 %v6621_v2, %v6616_v26  ;;  %v6617_v43 = vmul.f32 %v7962_v5, %v6601_v51 }
0x1d87   :  { %v6623_v4 = vmul.f32 %v6621_v2, %v6617_v43  ;;  %v6628_v7 = vadd.f32 %v6627_v6, %v6622_v50  ;;  %v6785_v2 = vrot.slane %v8970_v55, %v8410_v40 }
0x1d89   :  { %v6629_v10 = vadd.f32 %v6627_v6, %v6623_v4 }
0x1d8b   :  { %v6635_v11 = vpack.c.bf16 %v6629_v10, %v6628_v7 }
0x1d8d   :  { %7722 = vmatmul.mubr.msk.bf16.vlgmr.msra.gmra.mrb[104].mxu1 %vm79_vm1, %v6635_v11  ;;  %v7052_v11 = vld [vmem:[%s9267_s7] ss:$0 sm:$0xff] }
0x1d8e   :  { %7741 = vmatprep.mubr.msk.bf16.mxu1 %vm7997_vm0, %v7996_v0  ;;  %7738 = vmatpush3.bf16.msra.mxu1 %v6799_v32 }
0x1d8f   :  { %7739 = vmatprep.subr.bf16.mxu1 %v7996_v0  ;;  %v6791_v0 = vrot.slane %v8970_v55, %v8462_v3 }
0x1d92   :  { %7740 = vmatpush3.bf16.msra.mxu1 %v6800_v56 }
0x1e60   :  { %v6683_v19 = vpop.f32.mrb[104].mxu1 }
0x1e61   :  { %v6684_v13 = vadd.f32 %v7041_v14, %v6683_v19  ;;  %v7723_v20 = vpop.f32.mrb[105].mxu1 }
0x1e62   :  { %v6686_v21 = vpop.f32.mrb[106].mxu1 }
0x1e63   :  { %v6687_v8 = vadd.f32 %v7041_v14, %v6686_v21  ;;  %v7724_v22 = vpop.f32.mrb[107].mxu1  ;;  %v6690_v15 = vmax.f32 %v6684_v13, 0.0 }
0x1e65   :  { %v6691_v30 = vmax.f32 %v6687_v8, 0.0 }
0x1e67   :  { %v6701_v31 = vpack.c.bf16 %v6691_v30, %v6690_v15 }
0x1e69   :  { %7734 = vmatmul.mubr.msk.bf16.vlgmr.msra.gmra.mrb[100].mxu0 %vm3338_vm6, %v6701_v31 }
0x1f3c   :  { %v6747_v28 = vpop.f32.mrb[100].mxu0 }
0x1f3d   :  { %v6748_v29 = vadd.f32 %v6747_v28, %v6709_v27  ;;  %v7735_v45 = vpop.f32.mrb[101].mxu0 }
0x1f3e   :  { %v6750_v9 = vpop.f32.mrb[102].mxu0 }
0x1f3f   :  { %v6754_v37 = vadd.f32 %v6748_v29, %v6628_v7  ;;  %v6751_v23 = vadd.f32 %v6750_v9, %v6709_v27  ;;  %v7736_v53 = vpop.f32.mrb[103].mxu0 }
0x1f41   :  { %v6755_v38 = vadd.f32 %v6751_v23, %v6629_v10  ;;  %v6756_v51 = vsel %vm79_vm1, %v6754_v37, 0.0 }
0x1f42   :  { %6757 = vadd.xlane.f32.xlu0 %v6756_v51 }
0x1f43   :  { %v6759_v33 = vsel %vm79_vm1, %v6755_v38, 0.0 }
0x1f44   :  { %6760 = vadd.xlane.f32.xlu1 %v6759_v33 }
0x1fcf   :  { %v6758_v34 = vpop.xlane.xlu0 %6757 }
0x1fd0   :  { %v6762_v58 = vmul.f32 0.03125, %v6758_v34 }
0x1fd1   :  { %v6761_v36 = vpop.xlane.xlu1 %6760 }
0x1fd2   :  { %v6764_v12 = vsub.f32 %v6754_v37, %v6762_v58  ;;  %v6763_v39 = vmul.f32 0.03125, %v6761_v36 }
0x1fd4   :  { %v6765_v24 = vsub.f32 %v6755_v38, %v6763_v39  ;;  %v6766_v41 = vmul.f32 %v6764_v12, %v6764_v12 }
0x1fd6   :  { %v6768_v42 = vsel %vm79_vm1, %v6766_v41, 0.0  ;;  %v6767_v44 = vmul.f32 %v6765_v24, %v6765_v24 }
0x1fd7   :  { %6769 = vadd.xlane.f32.xlu0 %v6768_v42 }
0x1fd8   :  { %v6771_v46 = vsel %vm79_vm1, %v6767_v44, 0.0 }
0x1fd9   :  { %6772 = vadd.xlane.f32.xlu1 %v6771_v46 }
0x2064   :  { %v6770_v60 = vpop.xlane.xlu0 %6769 }
0x2065   :  { %v6774_v59 = vmul.f32 0.03125, %v6770_v60 }
0x2066   :  { %v6773_v61 = vpop.xlane.xlu1 %6772 }
0x2067   :  { %v6776_v62 = vadd.f32 1e-05, %v6774_v59  ;;  %v6775_v63 = vmul.f32 0.03125, %v6773_v61 }
0x2069   :  { %7963 = vrsqrt.f32 %v6776_v62  ;;  %v6777_v1 = vadd.f32 1e-05, %v6775_v63 }
0x206b   :  { %7965 = vrsqrt.f32 %v6777_v1 }
0x2073   :  { %v7964_v57 = vpop.eup %7963 }
0x2074   :  { %v6780_v26 = vmul.f32 %v7964_v57, %v6764_v12 }
0x2075   :  { %v7966_v5 = vpop.eup %7965 }
0x2076   :  { %v6786_v50 = vmul.f32 %v6785_v2, %v6780_v26  ;;  %v6781_v43 = vmul.f32 %v7966_v5, %v6765_v24 }
0x2078   :  { %v6787_v6 = vmul.f32 %v6785_v2, %v6781_v43  ;;  %v6792_v4 = vadd.f32 %v6791_v0, %v6786_v50 }
0x207a   :  { %v6793_v7 = vadd.f32 %v6791_v0, %v6787_v6 }
0x207c   :  { %v6798_v10 = vpack.c.bf16 %v6793_v7, %v6792_v4 }
0x207e   :  { %7742 = vmatmul.mubr.msk.bf16.vlgmr.msra.gmra.mrb[108].mxu1 %vm79_vm1, %v6798_v10 }
0x2151   :  { %v6845_v35 = vpop.f32.mrb[108].mxu1 }
0x2152   :  { %v6846_v40 = vadd.f32 %v7052_v11, %v6845_v35  ;;  %v7743_v25 = vpop.f32.mrb[109].mxu1 }
0x2153   :  { %v6848_v16 = vpop.f32.mrb[110].mxu1 }
0x2154   :  { %6852 = vst [vmem:[%s9268_s8] sm:$0xff] %v6846_v40  ;;  %v6849_v48 = vadd.f32 %v7052_v11, %v6848_v16  ;;  %v7744_v3 = vpop.f32.mrb[111].mxu1 }
0x2156   :  { %6853 = vst [vmem:[%s9268_s8 + $0x8] sm:$0xff] %v6849_v48 }
0x2157   :  { %6858 = vsyncpa [#allocation3], 1 }

</bundles_post_ra>
